<compile_context>
chip_gen: v6e
topology: v6e:2x2x1
jax: 0.10.0
libtpu: 0.0.40
codegen_flags: <defaults>
</compile_context>

<pallas_src>
import functools
import numpy as np
import jax
import jax.numpy as jnp
from jax.experimental import pallas as pl
from jax.experimental.pallas import tpu as pltpu


def _round_up(x, m):
    return (x + m - 1) // m * m


# ----------------------------------------------------------------------------
# Lane-dense GEMM + bias kernel: X (N, K) @ W (K, V) + b (1, V)
# Used for the hoisted (non-recurrent) embedding projection.
# ----------------------------------------------------------------------------
def _matmul_bias_kernel(x_ref, w_ref, b_ref, o_ref):
    o_ref[...] = (
        jnp.dot(x_ref[...], w_ref[...], preferred_element_type=jnp.float32)
        + b_ref[...]
    )


def matmul_bias(x, w, b, *, max_row_tile=512, max_col_tile=1024):
    N, K = x.shape
    V = w.shape[1]
    N_pad = _round_up(N, 8)
    if N_pad != N:
        x = jnp.pad(x, ((0, N_pad - N), (0, 0)))
    tm = N_pad
    for cand in (max_row_tile, 256, 128, 64, 32, 16, 8):
        if cand <= N_pad and N_pad % cand == 0:
            tm = cand
            break
    # Tile the output lanes so (K,V) weight + (tm,V) output never blow VMEM at
    # real vocab sizes (v7x 64 MiB).
    tn = V
    if V > max_col_tile:
        for cand in (max_col_tile, 512, 256, 128):
            if V % cand == 0:
                tn = cand
                break
    out = pl.pallas_call(
        _matmul_bias_kernel,
        out_shape=jax.ShapeDtypeStruct((N_pad, V), jnp.float32),
        grid=(N_pad // tm, V // tn),
        in_specs=[
            pl.BlockSpec((tm, K), lambda i, j: (i, 0)),
            pl.BlockSpec((K, tn), lambda i, j: (0, j)),
            pl.BlockSpec((1, tn), lambda i, j: (0, j)),
        ],
        out_specs=pl.BlockSpec((tm, tn), lambda i, j: (i, j)),
        compiler_params=pltpu.CompilerParams(
            dimension_semantics=("parallel", "parallel")),
    )(x, w, b)
    return out[:N]


# ----------------------------------------------------------------------------
# Recurrent hot-path kernel.  Grid = (batch_part [parallel], time_chunk
# [arbitrary]); lax.fori_loop over timesteps inside.  xproj already contains
# emb @ W_emb_low + b_low (gate order [i|f|o|g]).  Final h/c states live in
# resident output blocks (index constant across the chunk axis) and carry the
# state across chunks.  The decoder GEMM is fused per step.
# ----------------------------------------------------------------------------
def _hrnn_kernel(
    xproj_ref, mask_ref,
    h_low0_ref, c_low0_ref, h_high0_ref, c_high0_ref,
    w_hh_pack_ref, w_low_rec_ref, w_high_in_ref, b_high_ref,
    w_dec_ref, b_dec_ref,
    logits_ref, h_low_out, c_low_out, h_high_out, c_high_out,
):
    chunk = pl.program_id(1)
    TC = xproj_ref.shape[0]
    H = h_low0_ref.shape[-1]
    G = 4 * H

    @pl.when(chunk == 0)
    def _():
        h_low_out[...] = h_low0_ref[...]
        c_low_out[...] = c_low0_ref[...]
        h_high_out[...] = h_high0_ref[...]
        c_high_out[...] = c_high0_ref[...]

    def step(s, carry):
        h_low, c_low, h_high, c_high = carry
        x = xproj_ref[s]      # (B, 4H) gates [i|f|o|g], low-cell bias folded
        m = mask_ref[s]       # (B, H)  measure mask, pre-broadcast over lanes

        # h_high's contributions to BOTH cells in one wide MXU pass.  This dot
        # does not depend on h_low_new, so it sits off the critical path.
        # (With H=32, 8H=256 exactly fills the 256-wide MXU on v6e/v7x and the
        # split at 4H=128 is vreg-aligned.)
        gw = jnp.dot(h_high, w_hh_pack_ref[...],
                     preferred_element_type=jnp.float32)          # (B, 8H)

        # --- low LSTM cell ---
        g_low = x + gw[:, :G] + jnp.dot(h_low, w_low_rec_ref[...],
                                        preferred_element_type=jnp.float32)
        sl = jax.nn.sigmoid(g_low[:, :3 * H])                     # [i|f|o]
        gl = jnp.tanh(g_low[:, 3 * H:])
        c_low_n = sl[:, H:2 * H] * c_low + sl[:, :H] * gl
        h_low_n = sl[:, 2 * H:3 * H] * jnp.tanh(c_low_n)

        # --- high LSTM cell: only this (B,H)@(H,4H) dot waits on h_low_n ---
        g_high = gw[:, G:] + b_high_ref[...] + jnp.dot(
            h_low_n, w_high_in_ref[...], preferred_element_type=jnp.float32)
        sh = jax.nn.sigmoid(g_high[:, :3 * H])                    # [i|f|o]
        gh = jnp.tanh(g_high[:, 3 * H:])
        c_high_t = sh[:, H:2 * H] * c_high + sh[:, :H] * gh
        h_high_t = sh[:, 2 * H:3 * H] * jnp.tanh(c_high_t)

        # --- measure-mask blend: h + m*(h_tmp - h) ---
        h_high_n = h_high + m * (h_high_t - h_high)
        c_high_n = c_high + m * (c_high_t - c_high)

        # Fused decoder: off the recurrent chain, rides the idle MXU.
        logits_ref[s] = (jnp.dot(h_low_n, w_dec_ref[...],
                                 preferred_element_type=jnp.float32)
                         + b_dec_ref[...])
        return h_low_n, c_low_n, h_high_n, c_high_n

    carry0 = (h_low_out[...], c_low_out[...], h_high_out[...], c_high_out[...])
    h_low, c_low, h_high, c_high = jax.lax.fori_loop(
        0, TC, step, carry0, unroll=min(TC, 8))

    h_low_out[...] = h_low
    c_low_out[...] = c_low
    h_high_out[...] = h_high
    c_high_out[...] = c_high


def hrnn_recurrent(xproj_seq, mask_seq, h_low0, c_low0, h_high0, c_high0,
                   w_hh_pack, w_low_rec, w_high_in, b_high, w_dec, b_dec,
                   *, vmem_budget_bytes=20 * 1024 * 1024):
    T, B_pad, G = xproj_seq.shape       # G = 4H
    H = h_low0.shape[-1]
    Vp = w_dec.shape[-1]

    # Megacore (v7x): split the padded batch across a leading 'parallel' grid
    # axis; the recurrence is independent per batch row.  1 part elsewhere.
    nb = 2 if (B_pad >= 16 and B_pad % 16 == 0) else 1
    Bp = B_pad // nb

    # VMEM-budget-derived time chunk.  Streamed per-chunk blocks (xproj, mask,
    # logits) are double-buffered; constant blocks (weights, init states,
    # resident state outputs) counted once at 2x for default double buffering.
    per_step_bytes = 4 * Bp * (G + H + Vp)
    const_bytes = 2 * 4 * (w_hh_pack.size + w_low_rec.size + w_high_in.size
                           + b_high.size + w_dec.size + b_dec.size
                           + 8 * Bp * H)
    TC = 1
    for cand in range(1, T + 1):
        if T % cand == 0 and 2 * cand * per_step_bytes + const_bytes <= vmem_budget_bytes:
            TC = cand
    nchunks = T // TC

    grid_spec = pltpu.PrefetchScalarGridSpec(
        num_scalar_prefetch=0,
        grid=(nb, nchunks),
        in_specs=[
            pl.BlockSpec((TC, Bp, G), lambda bp, c: (c, bp, 0)),   # xproj
            pl.BlockSpec((TC, Bp, H), lambda bp, c: (c, bp, 0)),   # mask
            pl.BlockSpec((Bp, H), lambda bp, c: (bp, 0)),          # h_low0
            pl.BlockSpec((Bp, H), lambda bp, c: (bp, 0)),          # c_low0
            pl.BlockSpec((Bp, H), lambda bp, c: (bp, 0)),          # h_high0
            pl.BlockSpec((Bp, H), lambda bp, c: (bp, 0)),          # c_high0
            pl.BlockSpec(w_hh_pack.shape, lambda bp, c: (0, 0)),
            pl.BlockSpec(w_low_rec.shape, lambda bp, c: (0, 0)),
            pl.BlockSpec(w_high_in.shape, lambda bp, c: (0, 0)),
            pl.BlockSpec(b_high.shape, lambda bp, c: (0, 0)),
            pl.BlockSpec(w_dec.shape, lambda bp, c: (0, 0)),
            pl.BlockSpec(b_dec.shape, lambda bp, c: (0, 0)),
        ],
        out_specs=[
            pl.BlockSpec((TC, Bp, Vp), lambda bp, c: (c, bp, 0)),  # logits
            pl.BlockSpec((Bp, H), lambda bp, c: (bp, 0)),          # final h_low
            pl.BlockSpec((Bp, H), lambda bp, c: (bp, 0)),          # final c_low
            pl.BlockSpec((Bp, H), lambda bp, c: (bp, 0)),          # final h_high
            pl.BlockSpec((Bp, H), lambda bp, c: (bp, 0)),          # final c_high
        ],
    )
    out_shapes = (
        jax.ShapeDtypeStruct((T, B_pad, Vp), jnp.float32),
        jax.ShapeDtypeStruct((B_pad, H), jnp.float32),
        jax.ShapeDtypeStruct((B_pad, H), jnp.float32),
        jax.ShapeDtypeStruct((B_pad, H), jnp.float32),
        jax.ShapeDtypeStruct((B_pad, H), jnp.float32),
    )
    return pl.pallas_call(
        _hrnn_kernel,
        out_shape=out_shapes,
        grid_spec=grid_spec,
        compiler_params=pltpu.CompilerParams(
            dimension_semantics=("parallel", "arbitrary"),
            vmem_limit_bytes=32 * 1024 * 1024),
    )(xproj_seq, mask_seq, h_low0, c_low0, h_high0, c_high0,
      w_hh_pack, w_low_rec, w_high_in, b_high, w_dec, b_dec)


# ----------------------------------------------------------------------------
# Full forward (glue in plain JAX: embedding gather, transposes, padding)
# ----------------------------------------------------------------------------
def factor_hrnn_forward(params, tokens, hiddens, measure_token_idx):
    encoders = params["encoders"]            # list of (V_i, ninp)
    C, B, T = tokens.shape
    H = params["w_low_rec"].shape[0]
    B_pad = max(8, _round_up(B, 8))          # sublane-aligned batch

    embs = [jnp.take(encoders[i], tokens[i], axis=0) for i in range(C)]  # (B,T,ninp)
    emb_cat = jnp.concatenate(embs, axis=-1)                             # (B,T,E)
    emb_seq = jnp.transpose(emb_cat, (1, 0, 2))                          # (T,B,E)
    if B_pad != B:
        emb_seq = jnp.pad(emb_seq, ((0, 0), (0, B_pad - B), (0, 0)))
    E = emb_seq.shape[-1]

    # Hoisted input projection (no recurrent dependence): one lane-dense GEMM,
    # low-cell bias folded in, gate columns already in [i|f|o|g] order.
    xproj = matmul_bias(emb_seq.reshape(T * B_pad, E),
                        params["w_emb_low"], params["b_low"])
    xproj_seq = xproj.reshape(T, B_pad, 4 * H)

    # Measure mask, pre-broadcast over the H lanes so the kernel needs no
    # per-step lane broadcast on the serial critical path.
    mask_tb = (jnp.transpose(tokens[0]) == measure_token_idx).astype(jnp.float32)
    mask_seq = jnp.broadcast_to(mask_tb[:, :, None], (T, B, H))
    if B_pad != B:
        mask_seq = jnp.pad(mask_seq, ((0, 0), (0, B_pad - B), (0, 0)))

    (h_low0, c_low0), (h_high0, c_high0) = hiddens

    def pad_state(x):
        return jnp.pad(x, ((0, B_pad - B), (0, 0))) if B_pad != B else x

    logits, h_low, c_low, h_high, c_high = hrnn_recurrent(
        xproj_seq, mask_seq,
        pad_state(h_low0), pad_state(c_low0),
        pad_state(h_high0), pad_state(c_high0),
        params["w_hh_pack"], params["w_low_rec"], params["w_high_in"],
        params["b_high"], params["w_dec"], params["b_dec"])

    logits = jnp.transpose(logits[:, :B], (1, 0, 2))      # (B, T, Vpad)
    decs = []
    off = 0
    for v in params["vocab_sizes"]:
        decs.append(logits[:, :, off:off + v])
        off += v
    return decs, ((h_low[:B], c_low[:B]), (h_high[:B], c_high[:B]))


# ----------------------------------------------------------------------------
# Pure-numpy reference (mirrors the PyTorch forward semantics, raw weights)
# ----------------------------------------------------------------------------
def _sig(x):
    return 1.0 / (1.0 + np.exp(-x))


def reference_forward(raw, tokens, h0, measure_token_idx):
    tokens = np.asarray(tokens)
    C, B, T = tokens.shape
    enc = [np.asarray(e) for e in raw["encoders"]]
    (h_low, c_low), (h_high, c_high) = [[np.asarray(x) for x in p] for p in h0]
    w_ih_low = np.asarray(raw["w_ih_low"]); w_hh_low = np.asarray(raw["w_hh_low"])
    b_low = np.asarray(raw["b_ih_low"]) + np.asarray(raw["b_hh_low"])
    w_ih_high = np.asarray(raw["w_ih_high"]); w_hh_high = np.asarray(raw["w_hh_high"])
    b_high = np.asarray(raw["b_ih_high"]) + np.asarray(raw["b_hh_high"])
    outs = []
    for t in range(T):
        emb = np.concatenate([enc[i][tokens[i, :, t]] for i in range(C)], axis=-1)
        mask = (tokens[0, :, t:t + 1] == measure_token_idx).astype(np.float32)
        inp = np.concatenate([emb, h_high], axis=-1)
        g = inp @ w_ih_low.T + h_low @ w_hh_low.T + b_low
        i_g, f_g, g_g, o_g = np.split(g, 4, axis=-1)
        c_low = _sig(f_g) * c_low + _sig(i_g) * np.tanh(g_g)
        h_low = _sig(o_g) * np.tanh(c_low)
        g = h_low @ w_ih_high.T + h_high @ w_hh_high.T + b_high
        i_g, f_g, g_g, o_g = np.split(g, 4, axis=-1)
        c_tmp = _sig(f_g) * c_high + _sig(i_g) * np.tanh(g_g)
        h_tmp = _sig(o_g) * np.tanh(c_tmp)
        h_high = mask * h_tmp + (1.0 - mask) * h_high
        c_high = mask * c_tmp + (1.0 - mask) * c_high
        outs.append(h_low)
    output = np.stack(outs, axis=1)                       # (B, T, H)
    flat = output.reshape(B * T, -1)
    decs = []
    for i in range(C):
        w, b = raw["decoders"][i]
        decs.append((flat @ np.asarray(w) + np.asarray(b)).reshape(B, T, -1))
    return decs, ((h_low, c_low), (h_high, c_high))


# ----------------------------------------------------------------------------
if __name__ == "__main__":
    ntokens = [40, 33]          # two factored channels
    ninp, nhid = 16, 32
    B, T = 2, 8
    measure_token_idx = 3
    C = len(ntokens)
    E = ninp * C

    key = jax.random.PRNGKey(0)
    keys = iter(jax.random.split(key, 32))

    def unif(shape, r):
        return jax.random.uniform(next(keys), shape, jnp.float32, -r, r)

    initrange = 0.1
    krange = 1.0 / np.sqrt(nhid)

    # Module parameters (PyTorch layouts), deterministic init.
    encoders = [unif((ntokens[i], ninp), initrange) for i in range(C)]
    decoders = [(unif((nhid, ntokens[i]), initrange),          # Linear weight, stored (H, V)
                 jnp.zeros((1, ntokens[i]), jnp.float32))      # bias filled with 0
                for i in range(C)]
    w_ih_low = unif((4 * nhid, E + nhid), krange)
    w_hh_low = unif((4 * nhid, nhid), krange)
    b_ih_low = unif((4 * nhid,), krange)
    b_hh_low = unif((4 * nhid,), krange)
    w_ih_high = unif((4 * nhid, nhid), krange)
    w_hh_high = unif((4 * nhid, nhid), krange)
    b_ih_high = unif((4 * nhid,), krange)
    b_hh_high = unif((4 * nhid,), krange)

    raw = dict(encoders=encoders, decoders=decoders,
               w_ih_low=w_ih_low, w_hh_low=w_hh_low,
               b_ih_low=b_ih_low, b_hh_low=b_hh_low,
               w_ih_high=w_ih_high, w_hh_high=w_hh_high,
               b_ih_high=b_ih_high, b_hh_high=b_hh_high)

    # Kernel-friendly parameter forms:
    #   * emb projection weight split out (hoisted GEMM), low bias folded in
    #   * gate columns reordered PyTorch (i,f,g,o) -> kernel (i,f,o,g)
    #   * w_hh_pack (H, 8H): h_high -> [g_low gates | g_high gates] in one pass
    #   * w_low_rec (H, 4H): h_low -> g_low ; w_high_in (H,4H): h_low_new -> g_high
    #   * decoder weights concatenated along V and padded to 128 lanes
    def reorder_gates(w):   # columns (..., 4H) in (i,f,g,o) -> (i,f,o,g)
        i_, f_, g_, o_ = jnp.split(w, 4, axis=-1)
        return jnp.concatenate([i_, f_, o_, g_], axis=-1)

    V_total = sum(ntokens)
    V_pad = _round_up(V_total, 128)
    w_dec = jnp.concatenate([decoders[i][0] for i in range(C)], axis=1)
    b_dec = jnp.concatenate([decoders[i][1] for i in range(C)], axis=1)
    w_dec = jnp.pad(w_dec, ((0, 0), (0, V_pad - V_total)))
    b_dec = jnp.pad(b_dec, ((0, 0), (0, V_pad - V_total)))

    params = dict(
        encoders=encoders,
        w_emb_low=reorder_gates(jnp.transpose(w_ih_low[:, :E])),          # (E, 4H)
        b_low=reorder_gates((b_ih_low + b_hh_low).reshape(1, -1)),        # (1, 4H)
        w_hh_pack=jnp.concatenate(
            [reorder_gates(jnp.transpose(w_ih_low[:, E:])),
             reorder_gates(jnp.transpose(w_hh_high))], axis=1),           # (H, 8H)
        w_low_rec=reorder_gates(jnp.transpose(w_hh_low)),                 # (H, 4H)
        w_high_in=reorder_gates(jnp.transpose(w_ih_high)),                # (H, 4H)
        b_high=reorder_gates((b_ih_high + b_hh_high).reshape(1, -1)),     # (1, 4H)
        w_dec=w_dec,                                                      # (H, Vpad)
        b_dec=b_dec,                                                      # (1, Vpad)
        vocab_sizes=tuple(ntokens),
    )

    # Token inputs: (C, B, T); force the measure token to appear in channel 0.
    tok_keys = jax.random.split(next(keys), C)
    tokens = jnp.stack([jax.random.randint(tok_keys[i], (B, T), 0, ntokens[i], jnp.int32)
                        for i in range(C)], axis=0)
    tokens = tokens.at[0, 0, 3].set(measure_token_idx)
    tokens = tokens.at[0, 1, 6].set(measure_token_idx)

    h0 = ((jnp.zeros((B, nhid), jnp.float32), jnp.zeros((B, nhid), jnp.float32)),
          (jnp.zeros((B, nhid), jnp.float32), jnp.zeros((B, nhid), jnp.float32)))

    fwd = jax.jit(functools.partial(factor_hrnn_forward, params))
    decs, ((h_low, c_low), (h_high, c_high)) = fwd(
        tokens, h0, jnp.int32(measure_token_idx))
    jax.block_until_ready((decs, h_low, c_low, h_high, c_high))

    # Verify against the numpy reference.
    ref_decs, ((rh_low, rc_low), (rh_high, rc_high)) = reference_forward(
        raw, tokens, h0, measure_token_idx)
    for i in range(C):
        np.testing.assert_allclose(np.asarray(decs[i]), ref_decs[i],
                                   rtol=2e-3, atol=2e-3)
    np.testing.assert_allclose(np.asarray(h_low), rh_low, rtol=2e-3, atol=2e-3)
    np.testing.assert_allclose(np.asarray(c_low), rc_low, rtol=2e-3, atol=2e-3)
    np.testing.assert_allclose(np.asarray(h_high), rh_high, rtol=2e-3, atol=2e-3)
    np.testing.assert_allclose(np.asarray(c_high), rc_high, rtol=2e-3, atol=2e-3)

    print("KERNEL_OK")
</pallas_src>

<mosaic_0001>
module attributes {stable_mosaic.version = 11 : i64} {
  func.func @_matmul_bias_kernel(%arg0: i32, %arg1: i32, %arg2: memref<64x32xf32, #tpu.memory_space<vmem>>, %arg3: memref<32x128xf32, #tpu.memory_space<vmem>>, %arg4: memref<1x128xf32, #tpu.memory_space<vmem>>, %arg5: memref<64x128xf32, #tpu.memory_space<vmem>>) attributes {dimension_semantics = [#tpu.dimension_semantics<parallel>, #tpu.dimension_semantics<parallel>], iteration_bounds = array<i64: 1, 1>, scalar_prefetch = 0 : i64, scratch_operands = 0 : i64, tpu.core_type = #tpu.core_type<tc>, window_params = [{transform_indices = @transform_0, window_bounds = array<i64: 64, 32>}, {transform_indices = @transform_1, window_bounds = array<i64: 32, 128>}, {transform_indices = @transform_2, window_bounds = array<i64: 1, 128>}, {transform_indices = @transform_3, window_bounds = array<i64: 64, 128>}]} {
    %c0 = arith.constant 0 : index
    %c0_0 = arith.constant 0 : index
    %0 = vector.load %arg2[%c0, %c0_0] : memref<64x32xf32, #tpu.memory_space<vmem>>, vector<64x32xf32>
    %c0_1 = arith.constant 0 : index
    %c0_2 = arith.constant 0 : index
    %1 = vector.load %arg3[%c0_1, %c0_2] : memref<32x128xf32, #tpu.memory_space<vmem>>, vector<32x128xf32>
    %cst = arith.constant dense<0.000000e+00> : vector<64x128xf32>
    %2 = tpu.matmul %0, %1, %cst {dimension_numbers = #tpu.dot_dimension_numbers<[1], [0], [0], [1], [0, 0, 1, 1], [], []>} : vector<64x32xf32>, vector<32x128xf32>, vector<64x128xf32> -> vector<64x128xf32>
    %c0_3 = arith.constant 0 : index
    %c0_4 = arith.constant 0 : index
    %3 = vector.load %arg4[%c0_3, %c0_4] : memref<1x128xf32, #tpu.memory_space<vmem>>, vector<1x128xf32>
    %4 = vector.broadcast %3 : vector<1x128xf32> to vector<64x128xf32>
    %5 = arith.addf %2, %4 : vector<64x128xf32>
    %c0_5 = arith.constant 0 : index
    %c0_6 = arith.constant 0 : index
    %6 = vector.load %arg5[%c0_5, %c0_6] : memref<64x128xf32, #tpu.memory_space<vmem>>, vector<64x128xf32>
    tpu.vector_store %arg5[%c0_5, %c0_6], %5 {strides = array<i32>} : memref<64x128xf32, #tpu.memory_space<vmem>>, vector<64x128xf32>,
    return
  }
  func.func @transform_0(%arg0: i32, %arg1: i32) -> (i32, i32) {
    %c0_i32 = arith.constant 0 : i32
    %c0_i32_0 = arith.constant 0 : i32
    return %arg0, %c0_i32 : i32, i32
  }
  func.func @transform_1(%arg0: i32, %arg1: i32) -> (i32, i32) {
    %c0_i32 = arith.constant 0 : i32
    %c0_i32_0 = arith.constant 0 : i32
    return %c0_i32, %arg1 : i32, i32
  }
  func.func @transform_2(%arg0: i32, %arg1: i32) -> (i32, i32) {
    %c0_i32 = arith.constant 0 : i32
    %c0_i32_0 = arith.constant 0 : i32
    return %c0_i32, %arg1 : i32, i32
  }
  func.func @transform_3(%arg0: i32, %arg1: i32) -> (i32, i32) {
    %c0_i32 = arith.constant 0 : i32
    return %arg0, %arg1 : i32, i32
  }
}

module attributes {stable_mosaic.version = 11 : i64} {
  func.func @_hrnn_kernel(%arg0: i32, %arg1: i32, %arg2: memref<8x8x128xf32, #tpu.memory_space<vmem>>, %arg3: memref<8x8x32xf32, #tpu.memory_space<vmem>>, %arg4: memref<8x32xf32, #tpu.memory_space<vmem>>, %arg5: memref<8x32xf32, #tpu.memory_space<vmem>>, %arg6: memref<8x32xf32, #tpu.memory_space<vmem>>, %arg7: memref<8x32xf32, #tpu.memory_space<vmem>>, %arg8: memref<32x256xf32, #tpu.memory_space<vmem>>, %arg9: memref<32x128xf32, #tpu.memory_space<vmem>>, %arg10: memref<32x128xf32, #tpu.memory_space<vmem>>, %arg11: memref<1x128xf32, #tpu.memory_space<vmem>>, %arg12: memref<32x128xf32, #tpu.memory_space<vmem>>, %arg13: memref<1x128xf32, #tpu.memory_space<vmem>>, %arg14: memref<8x8x128xf32, #tpu.memory_space<vmem>>, %arg15: memref<8x32xf32, #tpu.memory_space<vmem>>, %arg16: memref<8x32xf32, #tpu.memory_space<vmem>>, %arg17: memref<8x32xf32, #tpu.memory_space<vmem>>, %arg18: memref<8x32xf32, #tpu.memory_space<vmem>>) attributes {dimension_semantics = [#tpu.dimension_semantics<parallel>, #tpu.dimension_semantics<arbitrary>], iteration_bounds = array<i64: 1, 1>, scalar_prefetch = 0 : i64, scratch_operands = 0 : i64, tpu.core_type = #tpu.core_type<tc>, window_params = [{transform_indices = @transform_0, window_bounds = array<i64: 8, 8, 128>}, {transform_indices = @transform_1, window_bounds = array<i64: 8, 8, 32>}, {transform_indices = @transform_2, window_bounds = array<i64: 8, 32>}, {transform_indices = @transform_3, window_bounds = array<i64: 8, 32>}, {transform_indices = @transform_4, window_bounds = array<i64: 8, 32>}, {transform_indices = @transform_5, window_bounds = array<i64: 8, 32>}, {pipeline_mode = #tpu.pipeline_mode<synchronous>, transform_indices = @transform_6, window_bounds = array<i64: 32, 256>}, {pipeline_mode = #tpu.pipeline_mode<synchronous>, transform_indices = @transform_7, window_bounds = array<i64: 32, 128>}, {pipeline_mode = #tpu.pipeline_mode<synchronous>, transform_indices = @transform_8, window_bounds = array<i64: 32, 128>}, {pipeline_mode = #tpu.pipeline_mode<synchronous>, transform_indices = @transform_9, window_bounds = array<i64: 1, 128>}, {pipeline_mode = #tpu.pipeline_mode<synchronous>, transform_indices = @transform_10, window_bounds = array<i64: 32, 128>}, {pipeline_mode = #tpu.pipeline_mode<synchronous>, transform_indices = @transform_11, window_bounds = array<i64: 1, 128>}, {transform_indices = @transform_12, window_bounds = array<i64: 8, 8, 128>}, {transform_indices = @transform_13, window_bounds = array<i64: 8, 32>}, {transform_indices = @transform_14, window_bounds = array<i64: 8, 32>}, {transform_indices = @transform_15, window_bounds = array<i64: 8, 32>}, {transform_indices = @transform_16, window_bounds = array<i64: 8, 32>}]} {
    %c0_i32 = arith.constant 0 : i32
    %0 = arith.cmpi eq, %arg1, %c0_i32 : i32
    %1 = arith.extui %0 : i1 to i32
    %c0_i32_0 = arith.constant 0 : i32
    %2 = arith.cmpi ne, %1, %c0_i32_0 : i32
    scf.if %2 {
      %c0_208 = arith.constant 0 : index
      %c0_209 = arith.constant 0 : index
      %547 = vector.load %arg4[%c0_208, %c0_209] : memref<8x32xf32, #tpu.memory_space<vmem>>, vector<8x32xf32>
      %c0_210 = arith.constant 0 : index
      %c0_211 = arith.constant 0 : index
      %548 = vector.load %arg15[%c0_210, %c0_211] : memref<8x32xf32, #tpu.memory_space<vmem>>, vector<8x32xf32>
      tpu.vector_store %arg15[%c0_210, %c0_211], %547 {strides = array<i32>} : memref<8x32xf32, #tpu.memory_space<vmem>>, vector<8x32xf32>,
      %c0_212 = arith.constant 0 : index
      %c0_213 = arith.constant 0 : index
      %549 = vector.load %arg5[%c0_212, %c0_213] : memref<8x32xf32, #tpu.memory_space<vmem>>, vector<8x32xf32>
      %c0_214 = arith.constant 0 : index
      %c0_215 = arith.constant 0 : index
      %550 = vector.load %arg16[%c0_214, %c0_215] : memref<8x32xf32, #tpu.memory_space<vmem>>, vector<8x32xf32>
      tpu.vector_store %arg16[%c0_214, %c0_215], %549 {strides = array<i32>} : memref<8x32xf32, #tpu.memory_space<vmem>>, vector<8x32xf32>,
      %c0_216 = arith.constant 0 : index
      %c0_217 = arith.constant 0 : index
      %551 = vector.load %arg6[%c0_216, %c0_217] : memref<8x32xf32, #tpu.memory_space<vmem>>, vector<8x32xf32>
      %c0_218 = arith.constant 0 : index
      %c0_219 = arith.constant 0 : index
      %552 = vector.load %arg17[%c0_218, %c0_219] : memref<8x32xf32, #tpu.memory_space<vmem>>, vector<8x32xf32>
      tpu.vector_store %arg17[%c0_218, %c0_219], %551 {strides = array<i32>} : memref<8x32xf32, #tpu.memory_space<vmem>>, vector<8x32xf32>,
      %c0_220 = arith.constant 0 : index
      %c0_221 = arith.constant 0 : index
      %553 = vector.load %arg7[%c0_220, %c0_221] : memref<8x32xf32, #tpu.memory_space<vmem>>, vector<8x32xf32>
      %c0_222 = arith.constant 0 : index
      %c0_223 = arith.constant 0 : index
      %554 = vector.load %arg18[%c0_222, %c0_223] : memref<8x32xf32, #tpu.memory_space<vmem>>, vector<8x32xf32>
      tpu.vector_store %arg18[%c0_222, %c0_223], %553 {strides = array<i32>} : memref<8x32xf32, #tpu.memory_space<vmem>>, vector<8x32xf32>,
    } else {
    }
    %c0 = arith.constant 0 : index
    %c0_1 = arith.constant 0 : index
    %3 = vector.load %arg15[%c0, %c0_1] : memref<8x32xf32, #tpu.memory_space<vmem>>, vector<8x32xf32>
    %c0_2 = arith.constant 0 : index
    %c0_3 = arith.constant 0 : index
    %4 = vector.load %arg16[%c0_2, %c0_3] : memref<8x32xf32, #tpu.memory_space<vmem>>, vector<8x32xf32>
    %c0_4 = arith.constant 0 : index
    %c0_5 = arith.constant 0 : index
    %5 = vector.load %arg17[%c0_4, %c0_5] : memref<8x32xf32, #tpu.memory_space<vmem>>, vector<8x32xf32>
    %c0_6 = arith.constant 0 : index
    %c0_7 = arith.constant 0 : index
    %6 = vector.load %arg18[%c0_6, %c0_7] : memref<8x32xf32, #tpu.memory_space<vmem>>, vector<8x32xf32>
    %c0_i32_8 = arith.constant 0 : i32
    %7 = arith.index_cast %c0_i32_8 : i32 to index
    %c0_9 = arith.constant 0 : index
    %c0_10 = arith.constant 0 : index
    %8 = vector.load %arg2[%7, %c0_9, %c0_10] : memref<8x8x128xf32, #tpu.memory_space<vmem>>, vector<1x8x128xf32>
    %9 = vector.shape_cast %8 : vector<1x8x128xf32> to vector<8x128xf32>
    %10 = arith.index_cast %c0_i32_8 : i32 to index
    %c0_11 = arith.constant 0 : index
    %c0_12 = arith.constant 0 : index
    %11 = vector.load %arg3[%10, %c0_11, %c0_12] : memref<8x8x32xf32, #tpu.memory_space<vmem>>, vector<1x8x32xf32>
    %12 = vector.shape_cast %11 : vector<1x8x32xf32> to vector<8x32xf32>
    %c0_13 = arith.constant 0 : index
    %c0_14 = arith.constant 0 : index
    %13 = vector.load %arg8[%c0_13, %c0_14] : memref<32x256xf32, #tpu.memory_space<vmem>>, vector<32x256xf32>
    %cst = arith.constant dense<0.000000e+00> : vector<8x256xf32>
    %14 = tpu.matmul %5, %13, %cst {dimension_numbers = #tpu.dot_dimension_numbers<[1], [0], [0], [1], [0, 0, 1, 1], [], []>} : vector<8x32xf32>, vector<32x256xf32>, vector<8x256xf32> -> vector<8x256xf32>
    %15 = vector.extract_strided_slice %14 {offsets = [0, 0], sizes = [8, 128], strides = [1, 1]} : vector<8x256xf32> to vector<8x128xf32>
    %16 = arith.addf %9, %15 : vector<8x128xf32>
    %c0_15 = arith.constant 0 : index
    %c0_16 = arith.constant 0 : index
    %17 = vector.load %arg9[%c0_15, %c0_16] : memref<32x128xf32, #tpu.memory_space<vmem>>, vector<32x128xf32>
    %cst_17 = arith.constant dense<0.000000e+00> : vector<8x128xf32>
    %18 = tpu.matmul %3, %17, %cst_17 {dimension_numbers = #tpu.dot_dimension_numbers<[1], [0], [0], [1], [0, 0, 1, 1], [], []>} : vector<8x32xf32>, vector<32x128xf32>, vector<8x128xf32> -> vector<8x128xf32>
    %19 = arith.addf %16, %18 : vector<8x128xf32>
    %20 = vector.extract_strided_slice %19 {offsets = [0, 0], sizes = [8, 96], strides = [1, 1]} : vector<8x128xf32> to vector<8x96xf32>
    %21 = arith.negf %20 : vector<8x96xf32>
    %22 = math.exp %21 : vector<8x96xf32>
    %cst_18 = arith.constant 1.000000e+00 : f32
    %23 = vector.broadcast %cst_18 : f32 to vector<8x96xf32>
    %24 = arith.addf %23, %22 : vector<8x96xf32>
    %25 = arith.divf %23, %24 : vector<8x96xf32>
    %26 = vector.extract_strided_slice %19 {offsets = [0, 96], sizes = [8, 32], strides = [1, 1]} : vector<8x128xf32> to vector<8x32xf32>
    %27 = math.tanh %26 : vector<8x32xf32>
    %28 = vector.extract_strided_slice %25 {offsets = [0, 32], sizes = [8, 32], strides = [1, 1]} : vector<8x96xf32> to vector<8x32xf32>
    %29 = arith.mulf %28, %4 : vector<8x32xf32>
    %30 = vector.extract_strided_slice %25 {offsets = [0, 0], sizes = [8, 32], strides = [1, 1]} : vector<8x96xf32> to vector<8x32xf32>
    %31 = arith.mulf %30, %27 : vector<8x32xf32>
    %32 = arith.addf %29, %31 : vector<8x32xf32>
    %33 = vector.extract_strided_slice %25 {offsets = [0, 64], sizes = [8, 32], strides = [1, 1]} : vector<8x96xf32> to vector<8x32xf32>
    %34 = math.tanh %32 : vector<8x32xf32>
    %35 = arith.mulf %33, %34 : vector<8x32xf32>
    %36 = vector.extract_strided_slice %14 {offsets = [0, 128], sizes = [8, 128], strides = [1, 1]} : vector<8x256xf32> to vector<8x128xf32>
    %c0_19 = arith.constant 0 : index
    %c0_20 = arith.constant 0 : index
    %37 = vector.load %arg11[%c0_19, %c0_20] : memref<1x128xf32, #tpu.memory_space<vmem>>, vector<1x128xf32>
    %38 = vector.broadcast %37 : vector<1x128xf32> to vector<8x128xf32>
    %39 = arith.addf %36, %38 : vector<8x128xf32>
    %c0_21 = arith.constant 0 : index
    %c0_22 = arith.constant 0 : index
    %40 = vector.load %arg10[%c0_21, %c0_22] : memref<32x128xf32, #tpu.memory_space<vmem>>, vector<32x128xf32>
    %cst_23 = arith.constant dense<0.000000e+00> : vector<8x128xf32>
    %41 = tpu.matmul %35, %40, %cst_23 {dimension_numbers = #tpu.dot_dimension_numbers<[1], [0], [0], [1], [0, 0, 1, 1], [], []>} : vector<8x32xf32>, vector<32x128xf32>, vector<8x128xf32> -> vector<8x128xf32>
    %42 = arith.addf %39, %41 : vector<8x128xf32>
    %43 = vector.extract_strided_slice %42 {offsets = [0, 0], sizes = [8, 96], strides = [1, 1]} : vector<8x128xf32> to vector<8x96xf32>
    %44 = arith.negf %43 : vector<8x96xf32>
    %45 = math.exp %44 : vector<8x96xf32>
    %cst_24 = arith.constant 1.000000e+00 : f32
    %46 = vector.broadcast %cst_24 : f32 to vector<8x96xf32>
    %47 = arith.addf %46, %45 : vector<8x96xf32>
    %48 = arith.divf %46, %47 : vector<8x96xf32>
    %49 = vector.extract_strided_slice %42 {offsets = [0, 96], sizes = [8, 32], strides = [1, 1]} : vector<8x128xf32> to vector<8x32xf32>
    %50 = math.tanh %49 : vector<8x32xf32>
    %51 = vector.extract_strided_slice %48 {offsets = [0, 32], sizes = [8, 32], strides = [1, 1]} : vector<8x96xf32> to vector<8x32xf32>
    %52 = arith.mulf %51, %6 : vector<8x32xf32>
    %53 = vector.extract_strided_slice %48 {offsets = [0, 0], sizes = [8, 32], strides = [1, 1]} : vector<8x96xf32> to vector<8x32xf32>
    %54 = arith.mulf %53, %50 : vector<8x32xf32>
    %55 = arith.addf %52, %54 : vector<8x32xf32>
    %56 = vector.extract_strided_slice %48 {offsets = [0, 64], sizes = [8, 32], strides = [1, 1]} : vector<8x96xf32> to vector<8x32xf32>
    %57 = math.tanh %55 : vector<8x32xf32>
    %58 = arith.mulf %56, %57 : vector<8x32xf32>
    %59 = arith.subf %58, %5 : vector<8x32xf32>
    %60 = arith.mulf %12, %59 : vector<8x32xf32>
    %61 = arith.addf %5, %60 : vector<8x32xf32>
    %62 = arith.subf %55, %6 : vector<8x32xf32>
    %63 = arith.mulf %12, %62 : vector<8x32xf32>
    %64 = arith.addf %6, %63 : vector<8x32xf32>
    %c0_25 = arith.constant 0 : index
    %c0_26 = arith.constant 0 : index
    %65 = vector.load %arg12[%c0_25, %c0_26] : memref<32x128xf32, #tpu.memory_space<vmem>>, vector<32x128xf32>
    %cst_27 = arith.constant dense<0.000000e+00> : vector<8x128xf32>
    %66 = tpu.matmul %35, %65, %cst_27 {dimension_numbers = #tpu.dot_dimension_numbers<[1], [0], [0], [1], [0, 0, 1, 1], [], []>} : vector<8x32xf32>, vector<32x128xf32>, vector<8x128xf32> -> vector<8x128xf32>
    %c0_28 = arith.constant 0 : index
    %c0_29 = arith.constant 0 : index
    %67 = vector.load %arg13[%c0_28, %c0_29] : memref<1x128xf32, #tpu.memory_space<vmem>>, vector<1x128xf32>
    %68 = vector.broadcast %67 : vector<1x128xf32> to vector<8x128xf32>
    %69 = arith.addf %66, %68 : vector<8x128xf32>
    %70 = arith.index_cast %c0_i32_8 : i32 to index
    %c0_30 = arith.constant 0 : index
    %c0_31 = arith.constant 0 : index
    %71 = vector.load %arg14[%70, %c0_30, %c0_31] : memref<8x8x128xf32, #tpu.memory_space<vmem>>, vector<1x8x128xf32>
    %72 = vector.shape_cast %71 : vector<1x8x128xf32> to vector<8x128xf32>
    %73 = vector.shape_cast %69 : vector<8x128xf32> to vector<1x8x128xf32>
    tpu.vector_store %arg14[%70, %c0_30, %c0_31], %73 {strides = array<i32>} : memref<8x8x128xf32, #tpu.memory_space<vmem>>, vector<1x8x128xf32>,
    %c1_i32 = arith.constant 1 : i32
    %74 = arith.index_cast %c1_i32 : i32 to index
    %c0_32 = arith.constant 0 : index
    %c0_33 = arith.constant 0 : index
    %75 = vector.load %arg2[%74, %c0_32, %c0_33] : memref<8x8x128xf32, #tpu.memory_space<vmem>>, vector<1x8x128xf32>
    %76 = vector.shape_cast %75 : vector<1x8x128xf32> to vector<8x128xf32>
    %77 = arith.index_cast %c1_i32 : i32 to index
    %c0_34 = arith.constant 0 : index
    %c0_35 = arith.constant 0 : index
    %78 = vector.load %arg3[%77, %c0_34, %c0_35] : memref<8x8x32xf32, #tpu.memory_space<vmem>>, vector<1x8x32xf32>
    %79 = vector.shape_cast %78 : vector<1x8x32xf32> to vector<8x32xf32>
    %c0_36 = arith.constant 0 : index
    %c0_37 = arith.constant 0 : index
    %80 = vector.load %arg8[%c0_36, %c0_37] : memref<32x256xf32, #tpu.memory_space<vmem>>, vector<32x256xf32>
    %cst_38 = arith.constant dense<0.000000e+00> : vector<8x256xf32>
    %81 = tpu.matmul %61, %80, %cst_38 {dimension_numbers = #tpu.dot_dimension_numbers<[1], [0], [0], [1], [0, 0, 1, 1], [], []>} : vector<8x32xf32>, vector<32x256xf32>, vector<8x256xf32> -> vector<8x256xf32>
    %82 = vector.extract_strided_slice %81 {offsets = [0, 0], sizes = [8, 128], strides = [1, 1]} : vector<8x256xf32> to vector<8x128xf32>
    %83 = arith.addf %76, %82 : vector<8x128xf32>
    %c0_39 = arith.constant 0 : index
    %c0_40 = arith.constant 0 : index
    %84 = vector.load %arg9[%c0_39, %c0_40] : memref<32x128xf32, #tpu.memory_space<vmem>>, vector<32x128xf32>
    %cst_41 = arith.constant dense<0.000000e+00> : vector<8x128xf32>
    %85 = tpu.matmul %35, %84, %cst_41 {dimension_numbers = #tpu.dot_dimension_numbers<[1], [0], [0], [1], [0, 0, 1, 1], [], []>} : vector<8x32xf32>, vector<32x128xf32>, vector<8x128xf32> -> vector<8x128xf32>
    %86 = arith.addf %83, %85 : vector<8x128xf32>
    %87 = vector.extract_strided_slice %86 {offsets = [0, 0], sizes = [8, 96], strides = [1, 1]} : vector<8x128xf32> to vector<8x96xf32>
    %88 = arith.negf %87 : vector<8x96xf32>
    %89 = math.exp %88 : vector<8x96xf32>
    %cst_42 = arith.constant 1.000000e+00 : f32
    %90 = vector.broadcast %cst_42 : f32 to vector<8x96xf32>
    %91 = arith.addf %90, %89 : vector<8x96xf32>
    %92 = arith.divf %90, %91 : vector<8x96xf32>
    %93 = vector.extract_strided_slice %86 {offsets = [0, 96], sizes = [8, 32], strides = [1, 1]} : vector<8x128xf32> to vector<8x32xf32>
    %94 = math.tanh %93 : vector<8x32xf32>
    %95 = vector.extract_strided_slice %92 {offsets = [0, 32], sizes = [8, 32], strides = [1, 1]} : vector<8x96xf32> to vector<8x32xf32>
    %96 = arith.mulf %95, %32 : vector<8x32xf32>
    %97 = vector.extract_strided_slice %92 {offsets = [0, 0], sizes = [8, 32], strides = [1, 1]} : vector<8x96xf32> to vector<8x32xf32>
    %98 = arith.mulf %97, %94 : vector<8x32xf32>
    %99 = arith.addf %96, %98 : vector<8x32xf32>
    %100 = vector.extract_strided_slice %92 {offsets = [0, 64], sizes = [8, 32], strides = [1, 1]} : vector<8x96xf32> to vector<8x32xf32>
    %101 = math.tanh %99 : vector<8x32xf32>
    %102 = arith.mulf %100, %101 : vector<8x32xf32>
    %103 = vector.extract_strided_slice %81 {offsets = [0, 128], sizes = [8, 128], strides = [1, 1]} : vector<8x256xf32> to vector<8x128xf32>
    %c0_43 = arith.constant 0 : index
    %c0_44 = arith.constant 0 : index
    %104 = vector.load %arg11[%c0_43, %c0_44] : memref<1x128xf32, #tpu.memory_space<vmem>>, vector<1x128xf32>
    %105 = vector.broadcast %104 : vector<1x128xf32> to vector<8x128xf32>
    %106 = arith.addf %103, %105 : vector<8x128xf32>
    %c0_45 = arith.constant 0 : index
    %c0_46 = arith.constant 0 : index
    %107 = vector.load %arg10[%c0_45, %c0_46] : memref<32x128xf32, #tpu.memory_space<vmem>>, vector<32x128xf32>
    %cst_47 = arith.constant dense<0.000000e+00> : vector<8x128xf32>
    %108 = tpu.matmul %102, %107, %cst_47 {dimension_numbers = #tpu.dot_dimension_numbers<[1], [0], [0], [1], [0, 0, 1, 1], [], []>} : vector<8x32xf32>, vector<32x128xf32>, vector<8x128xf32> -> vector<8x128xf32>
    %109 = arith.addf %106, %108 : vector<8x128xf32>
    %110 = vector.extract_strided_slice %109 {offsets = [0, 0], sizes = [8, 96], strides = [1, 1]} : vector<8x128xf32> to vector<8x96xf32>
    %111 = arith.negf %110 : vector<8x96xf32>
    %112 = math.exp %111 : vector<8x96xf32>
    %cst_48 = arith.constant 1.000000e+00 : f32
    %113 = vector.broadcast %cst_48 : f32 to vector<8x96xf32>
    %114 = arith.addf %113, %112 : vector<8x96xf32>
    %115 = arith.divf %113, %114 : vector<8x96xf32>
    %116 = vector.extract_strided_slice %109 {offsets = [0, 96], sizes = [8, 32], strides = [1, 1]} : vector<8x128xf32> to vector<8x32xf32>
    %117 = math.tanh %116 : vector<8x32xf32>
    %118 = vector.extract_strided_slice %115 {offsets = [0, 32], sizes = [8, 32], strides = [1, 1]} : vector<8x96xf32> to vector<8x32xf32>
    %119 = arith.mulf %118, %64 : vector<8x32xf32>
    %120 = vector.extract_strided_slice %115 {offsets = [0, 0], sizes = [8, 32], strides = [1, 1]} : vector<8x96xf32> to vector<8x32xf32>
    %121 = arith.mulf %120, %117 : vector<8x32xf32>
    %122 = arith.addf %119, %121 : vector<8x32xf32>
    %123 = vector.extract_strided_slice %115 {offsets = [0, 64], sizes = [8, 32], strides = [1, 1]} : vector<8x96xf32> to vector<8x32xf32>
    %124 = math.tanh %122 : vector<8x32xf32>
    %125 = arith.mulf %123, %124 : vector<8x32xf32>
    %126 = arith.subf %125, %61 : vector<8x32xf32>
    %127 = arith.mulf %79, %126 : vector<8x32xf32>
    %128 = arith.addf %61, %127 : vector<8x32xf32>
    %129 = arith.subf %122, %64 : vector<8x32xf32>
    %130 = arith.mulf %79, %129 : vector<8x32xf32>
    %131 = arith.addf %64, %130 : vector<8x32xf32>
    %c0_49 = arith.constant 0 : index
    %c0_50 = arith.constant 0 : index
    %132 = vector.load %arg12[%c0_49, %c0_50] : memref<32x128xf32, #tpu.memory_space<vmem>>, vector<32x128xf32>
    %cst_51 = arith.constant dense<0.000000e+00> : vector<8x128xf32>
    %133 = tpu.matmul %102, %132, %cst_51 {dimension_numbers = #tpu.dot_dimension_numbers<[1], [0], [0], [1], [0, 0, 1, 1], [], []>} : vector<8x32xf32>, vector<32x128xf32>, vector<8x128xf32> -> vector<8x128xf32>
    %c0_52 = arith.constant 0 : index
    %c0_53 = arith.constant 0 : index
    %134 = vector.load %arg13[%c0_52, %c0_53] : memref<1x128xf32, #tpu.memory_space<vmem>>, vector<1x128xf32>
    %135 = vector.broadcast %134 : vector<1x128xf32> to vector<8x128xf32>
    %136 = arith.addf %133, %135 : vector<8x128xf32>
    %137 = arith.index_cast %c1_i32 : i32 to index
    %c0_54 = arith.constant 0 : index
    %c0_55 = arith.constant 0 : index
    %138 = vector.load %arg14[%137, %c0_54, %c0_55] : memref<8x8x128xf32, #tpu.memory_space<vmem>>, vector<1x8x128xf32>
    %139 = vector.shape_cast %138 : vector<1x8x128xf32> to vector<8x128xf32>
    %140 = vector.shape_cast %136 : vector<8x128xf32> to vector<1x8x128xf32>
    tpu.vector_store %arg14[%137, %c0_54, %c0_55], %140 {strides = array<i32>} : memref<8x8x128xf32, #tpu.memory_space<vmem>>, vector<1x8x128xf32>,
    %c2_i32 = arith.constant 2 : i32
    %141 = arith.index_cast %c2_i32 : i32 to index
    %c0_56 = arith.constant 0 : index
    %c0_57 = arith.constant 0 : index
    %142 = vector.load %arg2[%141, %c0_56, %c0_57] : memref<8x8x128xf32, #tpu.memory_space<vmem>>, vector<1x8x128xf32>
    %143 = vector.shape_cast %142 : vector<1x8x128xf32> to vector<8x128xf32>
    %144 = arith.index_cast %c2_i32 : i32 to index
    %c0_58 = arith.constant 0 : index
    %c0_59 = arith.constant 0 : index
    %145 = vector.load %arg3[%144, %c0_58, %c0_59] : memref<8x8x32xf32, #tpu.memory_space<vmem>>, vector<1x8x32xf32>
    %146 = vector.shape_cast %145 : vector<1x8x32xf32> to vector<8x32xf32>
    %c0_60 = arith.constant 0 : index
    %c0_61 = arith.constant 0 : index
    %147 = vector.load %arg8[%c0_60, %c0_61] : memref<32x256xf32, #tpu.memory_space<vmem>>, vector<32x256xf32>
    %cst_62 = arith.constant dense<0.000000e+00> : vector<8x256xf32>
    %148 = tpu.matmul %128, %147, %cst_62 {dimension_numbers = #tpu.dot_dimension_numbers<[1], [0], [0], [1], [0, 0, 1, 1], [], []>} : vector<8x32xf32>, vector<32x256xf32>, vector<8x256xf32> -> vector<8x256xf32>
    %149 = vector.extract_strided_slice %148 {offsets = [0, 0], sizes = [8, 128], strides = [1, 1]} : vector<8x256xf32> to vector<8x128xf32>
    %150 = arith.addf %143, %149 : vector<8x128xf32>
    %c0_63 = arith.constant 0 : index
    %c0_64 = arith.constant 0 : index
    %151 = vector.load %arg9[%c0_63, %c0_64] : memref<32x128xf32, #tpu.memory_space<vmem>>, vector<32x128xf32>
    %cst_65 = arith.constant dense<0.000000e+00> : vector<8x128xf32>
    %152 = tpu.matmul %102, %151, %cst_65 {dimension_numbers = #tpu.dot_dimension_numbers<[1], [0], [0], [1], [0, 0, 1, 1], [], []>} : vector<8x32xf32>, vector<32x128xf32>, vector<8x128xf32> -> vector<8x128xf32>
    %153 = arith.addf %150, %152 : vector<8x128xf32>
    %154 = vector.extract_strided_slice %153 {offsets = [0, 0], sizes = [8, 96], strides = [1, 1]} : vector<8x128xf32> to vector<8x96xf32>
    %155 = arith.negf %154 : vector<8x96xf32>
    %156 = math.exp %155 : vector<8x96xf32>
    %cst_66 = arith.constant 1.000000e+00 : f32
    %157 = vector.broadcast %cst_66 : f32 to vector<8x96xf32>
    %158 = arith.addf %157, %156 : vector<8x96xf32>
    %159 = arith.divf %157, %158 : vector<8x96xf32>
    %160 = vector.extract_strided_slice %153 {offsets = [0, 96], sizes = [8, 32], strides = [1, 1]} : vector<8x128xf32> to vector<8x32xf32>
    %161 = math.tanh %160 : vector<8x32xf32>
    %162 = vector.extract_strided_slice %159 {offsets = [0, 32], sizes = [8, 32], strides = [1, 1]} : vector<8x96xf32> to vector<8x32xf32>
    %163 = arith.mulf %162, %99 : vector<8x32xf32>
    %164 = vector.extract_strided_slice %159 {offsets = [0, 0], sizes = [8, 32], strides = [1, 1]} : vector<8x96xf32> to vector<8x32xf32>
    %165 = arith.mulf %164, %161 : vector<8x32xf32>
    %166 = arith.addf %163, %165 : vector<8x32xf32>
    %167 = vector.extract_strided_slice %159 {offsets = [0, 64], sizes = [8, 32], strides = [1, 1]} : vector<8x96xf32> to vector<8x32xf32>
    %168 = math.tanh %166 : vector<8x32xf32>
    %169 = arith.mulf %167, %168 : vector<8x32xf32>
    %170 = vector.extract_strided_slice %148 {offsets = [0, 128], sizes = [8, 128], strides = [1, 1]} : vector<8x256xf32> to vector<8x128xf32>
    %c0_67 = arith.constant 0 : index
    %c0_68 = arith.constant 0 : index
    %171 = vector.load %arg11[%c0_67, %c0_68] : memref<1x128xf32, #tpu.memory_space<vmem>>, vector<1x128xf32>
    %172 = vector.broadcast %171 : vector<1x128xf32> to vector<8x128xf32>
    %173 = arith.addf %170, %172 : vector<8x128xf32>
    %c0_69 = arith.constant 0 : index
    %c0_70 = arith.constant 0 : index
    %174 = vector.load %arg10[%c0_69, %c0_70] : memref<32x128xf32, #tpu.memory_space<vmem>>, vector<32x128xf32>
    %cst_71 = arith.constant dense<0.000000e+00> : vector<8x128xf32>
    %175 = tpu.matmul %169, %174, %cst_71 {dimension_numbers = #tpu.dot_dimension_numbers<[1], [0], [0], [1], [0, 0, 1, 1], [], []>} : vector<8x32xf32>, vector<32x128xf32>, vector<8x128xf32> -> vector<8x128xf32>
    %176 = arith.addf %173, %175 : vector<8x128xf32>
    %177 = vector.extract_strided_slice %176 {offsets = [0, 0], sizes = [8, 96], strides = [1, 1]} : vector<8x128xf32> to vector<8x96xf32>
    %178 = arith.negf %177 : vector<8x96xf32>
    %179 = math.exp %178 : vector<8x96xf32>
    %cst_72 = arith.constant 1.000000e+00 : f32
    %180 = vector.broadcast %cst_72 : f32 to vector<8x96xf32>
    %181 = arith.addf %180, %179 : vector<8x96xf32>
    %182 = arith.divf %180, %181 : vector<8x96xf32>
    %183 = vector.extract_strided_slice %176 {offsets = [0, 96], sizes = [8, 32], strides = [1, 1]} : vector<8x128xf32> to vector<8x32xf32>
    %184 = math.tanh %183 : vector<8x32xf32>
    %185 = vector.extract_strided_slice %182 {offsets = [0, 32], sizes = [8, 32], strides = [1, 1]} : vector<8x96xf32> to vector<8x32xf32>
    %186 = arith.mulf %185, %131 : vector<8x32xf32>
    %187 = vector.extract_strided_slice %182 {offsets = [0, 0], sizes = [8, 32], strides = [1, 1]} : vector<8x96xf32> to vector<8x32xf32>
    %188 = arith.mulf %187, %184 : vector<8x32xf32>
    %189 = arith.addf %186, %188 : vector<8x32xf32>
    %190 = vector.extract_strided_slice %182 {offsets = [0, 64], sizes = [8, 32], strides = [1, 1]} : vector<8x96xf32> to vector<8x32xf32>
    %191 = math.tanh %189 : vector<8x32xf32>
    %192 = arith.mulf %190, %191 : vector<8x32xf32>
    %193 = arith.subf %192, %128 : vector<8x32xf32>
    %194 = arith.mulf %146, %193 : vector<8x32xf32>
    %195 = arith.addf %128, %194 : vector<8x32xf32>
    %196 = arith.subf %189, %131 : vector<8x32xf32>
    %197 = arith.mulf %146, %196 : vector<8x32xf32>
    %198 = arith.addf %131, %197 : vector<8x32xf32>
    %c0_73 = arith.constant 0 : index
    %c0_74 = arith.constant 0 : index
    %199 = vector.load %arg12[%c0_73, %c0_74] : memref<32x128xf32, #tpu.memory_space<vmem>>, vector<32x128xf32>
    %cst_75 = arith.constant dense<0.000000e+00> : vector<8x128xf32>
    %200 = tpu.matmul %169, %199, %cst_75 {dimension_numbers = #tpu.dot_dimension_numbers<[1], [0], [0], [1], [0, 0, 1, 1], [], []>} : vector<8x32xf32>, vector<32x128xf32>, vector<8x128xf32> -> vector<8x128xf32>
    %c0_76 = arith.constant 0 : index
    %c0_77 = arith.constant 0 : index
    %201 = vector.load %arg13[%c0_76, %c0_77] : memref<1x128xf32, #tpu.memory_space<vmem>>, vector<1x128xf32>
    %202 = vector.broadcast %201 : vector<1x128xf32> to vector<8x128xf32>
    %203 = arith.addf %200, %202 : vector<8x128xf32>
    %204 = arith.index_cast %c2_i32 : i32 to index
    %c0_78 = arith.constant 0 : index
    %c0_79 = arith.constant 0 : index
    %205 = vector.load %arg14[%204, %c0_78, %c0_79] : memref<8x8x128xf32, #tpu.memory_space<vmem>>, vector<1x8x128xf32>
    %206 = vector.shape_cast %205 : vector<1x8x128xf32> to vector<8x128xf32>
    %207 = vector.shape_cast %203 : vector<8x128xf32> to vector<1x8x128xf32>
    tpu.vector_store %arg14[%204, %c0_78, %c0_79], %207 {strides = array<i32>} : memref<8x8x128xf32, #tpu.memory_space<vmem>>, vector<1x8x128xf32>,
    %c3_i32 = arith.constant 3 : i32
    %208 = arith.index_cast %c3_i32 : i32 to index
    %c0_80 = arith.constant 0 : index
    %c0_81 = arith.constant 0 : index
    %209 = vector.load %arg2[%208, %c0_80, %c0_81] : memref<8x8x128xf32, #tpu.memory_space<vmem>>, vector<1x8x128xf32>
    %210 = vector.shape_cast %209 : vector<1x8x128xf32> to vector<8x128xf32>
    %211 = arith.index_cast %c3_i32 : i32 to index
    %c0_82 = arith.constant 0 : index
    %c0_83 = arith.constant 0 : index
    %212 = vector.load %arg3[%211, %c0_82, %c0_83] : memref<8x8x32xf32, #tpu.memory_space<vmem>>, vector<1x8x32xf32>
    %213 = vector.shape_cast %212 : vector<1x8x32xf32> to vector<8x32xf32>
    %c0_84 = arith.constant 0 : index
    %c0_85 = arith.constant 0 : index
    %214 = vector.load %arg8[%c0_84, %c0_85] : memref<32x256xf32, #tpu.memory_space<vmem>>, vector<32x256xf32>
    %cst_86 = arith.constant dense<0.000000e+00> : vector<8x256xf32>
    %215 = tpu.matmul %195, %214, %cst_86 {dimension_numbers = #tpu.dot_dimension_numbers<[1], [0], [0], [1], [0, 0, 1, 1], [], []>} : vector<8x32xf32>, vector<32x256xf32>, vector<8x256xf32> -> vector<8x256xf32>
    %216 = vector.extract_strided_slice %215 {offsets = [0, 0], sizes = [8, 128], strides = [1, 1]} : vector<8x256xf32> to vector<8x128xf32>
    %217 = arith.addf %210, %216 : vector<8x128xf32>
    %c0_87 = arith.constant 0 : index
    %c0_88 = arith.constant 0 : index
    %218 = vector.load %arg9[%c0_87, %c0_88] : memref<32x128xf32, #tpu.memory_space<vmem>>, vector<32x128xf32>
    %cst_89 = arith.constant dense<0.000000e+00> : vector<8x128xf32>
    %219 = tpu.matmul %169, %218, %cst_89 {dimension_numbers = #tpu.dot_dimension_numbers<[1], [0], [0], [1], [0, 0, 1, 1], [], []>} : vector<8x32xf32>, vector<32x128xf32>, vector<8x128xf32> -> vector<8x128xf32>
    %220 = arith.addf %217, %219 : vector<8x128xf32>
    %221 = vector.extract_strided_slice %220 {offsets = [0, 0], sizes = [8, 96], strides = [1, 1]} : vector<8x128xf32> to vector<8x96xf32>
    %222 = arith.negf %221 : vector<8x96xf32>
    %223 = math.exp %222 : vector<8x96xf32>
    %cst_90 = arith.constant 1.000000e+00 : f32
    %224 = vector.broadcast %cst_90 : f32 to vector<8x96xf32>
    %225 = arith.addf %224, %223 : vector<8x96xf32>
    %226 = arith.divf %224, %225 : vector<8x96xf32>
    %227 = vector.extract_strided_slice %220 {offsets = [0, 96], sizes = [8, 32], strides = [1, 1]} : vector<8x128xf32> to vector<8x32xf32>
    %228 = math.tanh %227 : vector<8x32xf32>
    %229 = vector.extract_strided_slice %226 {offsets = [0, 32], sizes = [8, 32], strides = [1, 1]} : vector<8x96xf32> to vector<8x32xf32>
    %230 = arith.mulf %229, %166 : vector<8x32xf32>
    %231 = vector.extract_strided_slice %226 {offsets = [0, 0], sizes = [8, 32], strides = [1, 1]} : vector<8x96xf32> to vector<8x32xf32>
    %232 = arith.mulf %231, %228 : vector<8x32xf32>
    %233 = arith.addf %230, %232 : vector<8x32xf32>
    %234 = vector.extract_strided_slice %226 {offsets = [0, 64], sizes = [8, 32], strides = [1, 1]} : vector<8x96xf32> to vector<8x32xf32>
    %235 = math.tanh %233 : vector<8x32xf32>
    %236 = arith.mulf %234, %235 : vector<8x32xf32>
    %237 = vector.extract_strided_slice %215 {offsets = [0, 128], sizes = [8, 128], strides = [1, 1]} : vector<8x256xf32> to vector<8x128xf32>
    %c0_91 = arith.constant 0 : index
    %c0_92 = arith.constant 0 : index
    %238 = vector.load %arg11[%c0_91, %c0_92] : memref<1x128xf32, #tpu.memory_space<vmem>>, vector<1x128xf32>
    %239 = vector.broadcast %238 : vector<1x128xf32> to vector<8x128xf32>
    %240 = arith.addf %237, %239 : vector<8x128xf32>
    %c0_93 = arith.constant 0 : index
    %c0_94 = arith.constant 0 : index
    %241 = vector.load %arg10[%c0_93, %c0_94] : memref<32x128xf32, #tpu.memory_space<vmem>>, vector<32x128xf32>
    %cst_95 = arith.constant dense<0.000000e+00> : vector<8x128xf32>
    %242 = tpu.matmul %236, %241, %cst_95 {dimension_numbers = #tpu.dot_dimension_numbers<[1], [0], [0], [1], [0, 0, 1, 1], [], []>} : vector<8x32xf32>, vector<32x128xf32>, vector<8x128xf32> -> vector<8x128xf32>
    %243 = arith.addf %240, %242 : vector<8x128xf32>
    %244 = vector.extract_strided_slice %243 {offsets = [0, 0], sizes = [8, 96], strides = [1, 1]} : vector<8x128xf32> to vector<8x96xf32>
    %245 = arith.negf %244 : vector<8x96xf32>
    %246 = math.exp %245 : vector<8x96xf32>
    %cst_96 = arith.constant 1.000000e+00 : f32
    %247 = vector.broadcast %cst_96 : f32 to vector<8x96xf32>
    %248 = arith.addf %247, %246 : vector<8x96xf32>
    %249 = arith.divf %247, %248 : vector<8x96xf32>
    %250 = vector.extract_strided_slice %243 {offsets = [0, 96], sizes = [8, 32], strides = [1, 1]} : vector<8x128xf32> to vector<8x32xf32>
    %251 = math.tanh %250 : vector<8x32xf32>
    %252 = vector.extract_strided_slice %249 {offsets = [0, 32], sizes = [8, 32], strides = [1, 1]} : vector<8x96xf32> to vector<8x32xf32>
    %253 = arith.mulf %252, %198 : vector<8x32xf32>
    %254 = vector.extract_strided_slice %249 {offsets = [0, 0], sizes = [8, 32], strides = [1, 1]} : vector<8x96xf32> to vector<8x32xf32>
    %255 = arith.mulf %254, %251 : vector<8x32xf32>
    %256 = arith.addf %253, %255 : vector<8x32xf32>
    %257 = vector.extract_strided_slice %249 {offsets = [0, 64], sizes = [8, 32], strides = [1, 1]} : vector<8x96xf32> to vector<8x32xf32>
    %258 = math.tanh %256 : vector<8x32xf32>
    %259 = arith.mulf %257, %258 : vector<8x32xf32>
    %260 = arith.subf %259, %195 : vector<8x32xf32>
    %261 = arith.mulf %213, %260 : vector<8x32xf32>
    %262 = arith.addf %195, %261 : vector<8x32xf32>
    %263 = arith.subf %256, %198 : vector<8x32xf32>
    %264 = arith.mulf %213, %263 : vector<8x32xf32>
    %265 = arith.addf %198, %264 : vector<8x32xf32>
    %c0_97 = arith.constant 0 : index
    %c0_98 = arith.constant 0 : index
    %266 = vector.load %arg12[%c0_97, %c0_98] : memref<32x128xf32, #tpu.memory_space<vmem>>, vector<32x128xf32>
    %cst_99 = arith.constant dense<0.000000e+00> : vector<8x128xf32>
    %267 = tpu.matmul %236, %266, %cst_99 {dimension_numbers = #tpu.dot_dimension_numbers<[1], [0], [0], [1], [0, 0, 1, 1], [], []>} : vector<8x32xf32>, vector<32x128xf32>, vector<8x128xf32> -> vector<8x128xf32>
    %c0_100 = arith.constant 0 : index
    %c0_101 = arith.constant 0 : index
    %268 = vector.load %arg13[%c0_100, %c0_101] : memref<1x128xf32, #tpu.memory_space<vmem>>, vector<1x128xf32>
    %269 = vector.broadcast %268 : vector<1x128xf32> to vector<8x128xf32>
    %270 = arith.addf %267, %269 : vector<8x128xf32>
    %271 = arith.index_cast %c3_i32 : i32 to index
    %c0_102 = arith.constant 0 : index
    %c0_103 = arith.constant 0 : index
    %272 = vector.load %arg14[%271, %c0_102, %c0_103] : memref<8x8x128xf32, #tpu.memory_space<vmem>>, vector<1x8x128xf32>
    %273 = vector.shape_cast %272 : vector<1x8x128xf32> to vector<8x128xf32>
    %274 = vector.shape_cast %270 : vector<8x128xf32> to vector<1x8x128xf32>
    tpu.vector_store %arg14[%271, %c0_102, %c0_103], %274 {strides = array<i32>} : memref<8x8x128xf32, #tpu.memory_space<vmem>>, vector<1x8x128xf32>,
    %c4_i32 = arith.constant 4 : i32
    %275 = arith.index_cast %c4_i32 : i32 to index
    %c0_104 = arith.constant 0 : index
    %c0_105 = arith.constant 0 : index
    %276 = vector.load %arg2[%275, %c0_104, %c0_105] : memref<8x8x128xf32, #tpu.memory_space<vmem>>, vector<1x8x128xf32>
    %277 = vector.shape_cast %276 : vector<1x8x128xf32> to vector<8x128xf32>
    %278 = arith.index_cast %c4_i32 : i32 to index
    %c0_106 = arith.constant 0 : index
    %c0_107 = arith.constant 0 : index
    %279 = vector.load %arg3[%278, %c0_106, %c0_107] : memref<8x8x32xf32, #tpu.memory_space<vmem>>, vector<1x8x32xf32>
    %280 = vector.shape_cast %279 : vector<1x8x32xf32> to vector<8x32xf32>
    %c0_108 = arith.constant 0 : index
    %c0_109 = arith.constant 0 : index
    %281 = vector.load %arg8[%c0_108, %c0_109] : memref<32x256xf32, #tpu.memory_space<vmem>>, vector<32x256xf32>
    %cst_110 = arith.constant dense<0.000000e+00> : vector<8x256xf32>
    %282 = tpu.matmul %262, %281, %cst_110 {dimension_numbers = #tpu.dot_dimension_numbers<[1], [0], [0], [1], [0, 0, 1, 1], [], []>} : vector<8x32xf32>, vector<32x256xf32>, vector<8x256xf32> -> vector<8x256xf32>
    %283 = vector.extract_strided_slice %282 {offsets = [0, 0], sizes = [8, 128], strides = [1, 1]} : vector<8x256xf32> to vector<8x128xf32>
    %284 = arith.addf %277, %283 : vector<8x128xf32>
    %c0_111 = arith.constant 0 : index
    %c0_112 = arith.constant 0 : index
    %285 = vector.load %arg9[%c0_111, %c0_112] : memref<32x128xf32, #tpu.memory_space<vmem>>, vector<32x128xf32>
    %cst_113 = arith.constant dense<0.000000e+00> : vector<8x128xf32>
    %286 = tpu.matmul %236, %285, %cst_113 {dimension_numbers = #tpu.dot_dimension_numbers<[1], [0], [0], [1], [0, 0, 1, 1], [], []>} : vector<8x32xf32>, vector<32x128xf32>, vector<8x128xf32> -> vector<8x128xf32>
    %287 = arith.addf %284, %286 : vector<8x128xf32>
    %288 = vector.extract_strided_slice %287 {offsets = [0, 0], sizes = [8, 96], strides = [1, 1]} : vector<8x128xf32> to vector<8x96xf32>
    %289 = arith.negf %288 : vector<8x96xf32>
    %290 = math.exp %289 : vector<8x96xf32>
    %cst_114 = arith.constant 1.000000e+00 : f32
    %291 = vector.broadcast %cst_114 : f32 to vector<8x96xf32>
    %292 = arith.addf %291, %290 : vector<8x96xf32>
    %293 = arith.divf %291, %292 : vector<8x96xf32>
    %294 = vector.extract_strided_slice %287 {offsets = [0, 96], sizes = [8, 32], strides = [1, 1]} : vector<8x128xf32> to vector<8x32xf32>
    %295 = math.tanh %294 : vector<8x32xf32>
    %296 = vector.extract_strided_slice %293 {offsets = [0, 32], sizes = [8, 32], strides = [1, 1]} : vector<8x96xf32> to vector<8x32xf32>
    %297 = arith.mulf %296, %233 : vector<8x32xf32>
    %298 = vector.extract_strided_slice %293 {offsets = [0, 0], sizes = [8, 32], strides = [1, 1]} : vector<8x96xf32> to vector<8x32xf32>
    %299 = arith.mulf %298, %295 : vector<8x32xf32>
    %300 = arith.addf %297, %299 : vector<8x32xf32>
    %301 = vector.extract_strided_slice %293 {offsets = [0, 64], sizes = [8, 32], strides = [1, 1]} : vector<8x96xf32> to vector<8x32xf32>
    %302 = math.tanh %300 : vector<8x32xf32>
    %303 = arith.mulf %301, %302 : vector<8x32xf32>
    %304 = vector.extract_strided_slice %282 {offsets = [0, 128], sizes = [8, 128], strides = [1, 1]} : vector<8x256xf32> to vector<8x128xf32>
    %c0_115 = arith.constant 0 : index
    %c0_116 = arith.constant 0 : index
    %305 = vector.load %arg11[%c0_115, %c0_116] : memref<1x128xf32, #tpu.memory_space<vmem>>, vector<1x128xf32>
    %306 = vector.broadcast %305 : vector<1x128xf32> to vector<8x128xf32>
    %307 = arith.addf %304, %306 : vector<8x128xf32>
    %c0_117 = arith.constant 0 : index
    %c0_118 = arith.constant 0 : index
    %308 = vector.load %arg10[%c0_117, %c0_118] : memref<32x128xf32, #tpu.memory_space<vmem>>, vector<32x128xf32>
    %cst_119 = arith.constant dense<0.000000e+00> : vector<8x128xf32>
    %309 = tpu.matmul %303, %308, %cst_119 {dimension_numbers = #tpu.dot_dimension_numbers<[1], [0], [0], [1], [0, 0, 1, 1], [], []>} : vector<8x32xf32>, vector<32x128xf32>, vector<8x128xf32> -> vector<8x128xf32>
    %310 = arith.addf %307, %309 : vector<8x128xf32>
    %311 = vector.extract_strided_slice %310 {offsets = [0, 0], sizes = [8, 96], strides = [1, 1]} : vector<8x128xf32> to vector<8x96xf32>
    %312 = arith.negf %311 : vector<8x96xf32>
    %313 = math.exp %312 : vector<8x96xf32>
    %cst_120 = arith.constant 1.000000e+00 : f32
    %314 = vector.broadcast %cst_120 : f32 to vector<8x96xf32>
    %315 = arith.addf %314, %313 : vector<8x96xf32>
    %316 = arith.divf %314, %315 : vector<8x96xf32>
    %317 = vector.extract_strided_slice %310 {offsets = [0, 96], sizes = [8, 32], strides = [1, 1]} : vector<8x128xf32> to vector<8x32xf32>
    %318 = math.tanh %317 : vector<8x32xf32>
    %319 = vector.extract_strided_slice %316 {offsets = [0, 32], sizes = [8, 32], strides = [1, 1]} : vector<8x96xf32> to vector<8x32xf32>
    %320 = arith.mulf %319, %265 : vector<8x32xf32>
    %321 = vector.extract_strided_slice %316 {offsets = [0, 0], sizes = [8, 32], strides = [1, 1]} : vector<8x96xf32> to vector<8x32xf32>
    %322 = arith.mulf %321, %318 : vector<8x32xf32>
    %323 = arith.addf %320, %322 : vector<8x32xf32>
    %324 = vector.extract_strided_slice %316 {offsets = [0, 64], sizes = [8, 32], strides = [1, 1]} : vector<8x96xf32> to vector<8x32xf32>
    %325 = math.tanh %323 : vector<8x32xf32>
    %326 = arith.mulf %324, %325 : vector<8x32xf32>
    %327 = arith.subf %326, %262 : vector<8x32xf32>
    %328 = arith.mulf %280, %327 : vector<8x32xf32>
    %329 = arith.addf %262, %328 : vector<8x32xf32>
    %330 = arith.subf %323, %265 : vector<8x32xf32>
    %331 = arith.mulf %280, %330 : vector<8x32xf32>
    %332 = arith.addf %265, %331 : vector<8x32xf32>
    %c0_121 = arith.constant 0 : index
    %c0_122 = arith.constant 0 : index
    %333 = vector.load %arg12[%c0_121, %c0_122] : memref<32x128xf32, #tpu.memory_space<vmem>>, vector<32x128xf32>
    %cst_123 = arith.constant dense<0.000000e+00> : vector<8x128xf32>
    %334 = tpu.matmul %303, %333, %cst_123 {dimension_numbers = #tpu.dot_dimension_numbers<[1], [0], [0], [1], [0, 0, 1, 1], [], []>} : vector<8x32xf32>, vector<32x128xf32>, vector<8x128xf32> -> vector<8x128xf32>
    %c0_124 = arith.constant 0 : index
    %c0_125 = arith.constant 0 : index
    %335 = vector.load %arg13[%c0_124, %c0_125] : memref<1x128xf32, #tpu.memory_space<vmem>>, vector<1x128xf32>
    %336 = vector.broadcast %335 : vector<1x128xf32> to vector<8x128xf32>
    %337 = arith.addf %334, %336 : vector<8x128xf32>
    %338 = arith.index_cast %c4_i32 : i32 to index
    %c0_126 = arith.constant 0 : index
    %c0_127 = arith.constant 0 : index
    %339 = vector.load %arg14[%338, %c0_126, %c0_127] : memref<8x8x128xf32, #tpu.memory_space<vmem>>, vector<1x8x128xf32>
    %340 = vector.shape_cast %339 : vector<1x8x128xf32> to vector<8x128xf32>
    %341 = vector.shape_cast %337 : vector<8x128xf32> to vector<1x8x128xf32>
    tpu.vector_store %arg14[%338, %c0_126, %c0_127], %341 {strides = array<i32>} : memref<8x8x128xf32, #tpu.memory_space<vmem>>, vector<1x8x128xf32>,
    %c5_i32 = arith.constant 5 : i32
    %342 = arith.index_cast %c5_i32 : i32 to index
    %c0_128 = arith.constant 0 : index
    %c0_129 = arith.constant 0 : index
    %343 = vector.load %arg2[%342, %c0_128, %c0_129] : memref<8x8x128xf32, #tpu.memory_space<vmem>>, vector<1x8x128xf32>
    %344 = vector.shape_cast %343 : vector<1x8x128xf32> to vector<8x128xf32>
    %345 = arith.index_cast %c5_i32 : i32 to index
    %c0_130 = arith.constant 0 : index
    %c0_131 = arith.constant 0 : index
    %346 = vector.load %arg3[%345, %c0_130, %c0_131] : memref<8x8x32xf32, #tpu.memory_space<vmem>>, vector<1x8x32xf32>
    %347 = vector.shape_cast %346 : vector<1x8x32xf32> to vector<8x32xf32>
    %c0_132 = arith.constant 0 : index
    %c0_133 = arith.constant 0 : index
    %348 = vector.load %arg8[%c0_132, %c0_133] : memref<32x256xf32, #tpu.memory_space<vmem>>, vector<32x256xf32>
    %cst_134 = arith.constant dense<0.000000e+00> : vector<8x256xf32>
    %349 = tpu.matmul %329, %348, %cst_134 {dimension_numbers = #tpu.dot_dimension_numbers<[1], [0], [0], [1], [0, 0, 1, 1], [], []>} : vector<8x32xf32>, vector<32x256xf32>, vector<8x256xf32> -> vector<8x256xf32>
    %350 = vector.extract_strided_slice %349 {offsets = [0, 0], sizes = [8, 128], strides = [1, 1]} : vector<8x256xf32> to vector<8x128xf32>
    %351 = arith.addf %344, %350 : vector<8x128xf32>
    %c0_135 = arith.constant 0 : index
    %c0_136 = arith.constant 0 : index
    %352 = vector.load %arg9[%c0_135, %c0_136] : memref<32x128xf32, #tpu.memory_space<vmem>>, vector<32x128xf32>
    %cst_137 = arith.constant dense<0.000000e+00> : vector<8x128xf32>
    %353 = tpu.matmul %303, %352, %cst_137 {dimension_numbers = #tpu.dot_dimension_numbers<[1], [0], [0], [1], [0, 0, 1, 1], [], []>} : vector<8x32xf32>, vector<32x128xf32>, vector<8x128xf32> -> vector<8x128xf32>
    %354 = arith.addf %351, %353 : vector<8x128xf32>
    %355 = vector.extract_strided_slice %354 {offsets = [0, 0], sizes = [8, 96], strides = [1, 1]} : vector<8x128xf32> to vector<8x96xf32>
    %356 = arith.negf %355 : vector<8x96xf32>
    %357 = math.exp %356 : vector<8x96xf32>
    %cst_138 = arith.constant 1.000000e+00 : f32
    %358 = vector.broadcast %cst_138 : f32 to vector<8x96xf32>
    %359 = arith.addf %358, %357 : vector<8x96xf32>
    %360 = arith.divf %358, %359 : vector<8x96xf32>
    %361 = vector.extract_strided_slice %354 {offsets = [0, 96], sizes = [8, 32], strides = [1, 1]} : vector<8x128xf32> to vector<8x32xf32>
    %362 = math.tanh %361 : vector<8x32xf32>
    %363 = vector.extract_strided_slice %360 {offsets = [0, 32], sizes = [8, 32], strides = [1, 1]} : vector<8x96xf32> to vector<8x32xf32>
    %364 = arith.mulf %363, %300 : vector<8x32xf32>
    %365 = vector.extract_strided_slice %360 {offsets = [0, 0], sizes = [8, 32], strides = [1, 1]} : vector<8x96xf32> to vector<8x32xf32>
    %366 = arith.mulf %365, %362 : vector<8x32xf32>
    %367 = arith.addf %364, %366 : vector<8x32xf32>
    %368 = vector.extract_strided_slice %360 {offsets = [0, 64], sizes = [8, 32], strides = [1, 1]} : vector<8x96xf32> to vector<8x32xf32>
    %369 = math.tanh %367 : vector<8x32xf32>
    %370 = arith.mulf %368, %369 : vector<8x32xf32>
    %371 = vector.extract_strided_slice %349 {offsets = [0, 128], sizes = [8, 128], strides = [1, 1]} : vector<8x256xf32> to vector<8x128xf32>
    %c0_139 = arith.constant 0 : index
    %c0_140 = arith.constant 0 : index
    %372 = vector.load %arg11[%c0_139, %c0_140] : memref<1x128xf32, #tpu.memory_space<vmem>>, vector<1x128xf32>
    %373 = vector.broadcast %372 : vector<1x128xf32> to vector<8x128xf32>
    %374 = arith.addf %371, %373 : vector<8x128xf32>
    %c0_141 = arith.constant 0 : index
    %c0_142 = arith.constant 0 : index
    %375 = vector.load %arg10[%c0_141, %c0_142] : memref<32x128xf32, #tpu.memory_space<vmem>>, vector<32x128xf32>
    %cst_143 = arith.constant dense<0.000000e+00> : vector<8x128xf32>
    %376 = tpu.matmul %370, %375, %cst_143 {dimension_numbers = #tpu.dot_dimension_numbers<[1], [0], [0], [1], [0, 0, 1, 1], [], []>} : vector<8x32xf32>, vector<32x128xf32>, vector<8x128xf32> -> vector<8x128xf32>
    %377 = arith.addf %374, %376 : vector<8x128xf32>
    %378 = vector.extract_strided_slice %377 {offsets = [0, 0], sizes = [8, 96], strides = [1, 1]} : vector<8x128xf32> to vector<8x96xf32>
    %379 = arith.negf %378 : vector<8x96xf32>
    %380 = math.exp %379 : vector<8x96xf32>
    %cst_144 = arith.constant 1.000000e+00 : f32
    %381 = vector.broadcast %cst_144 : f32 to vector<8x96xf32>
    %382 = arith.addf %381, %380 : vector<8x96xf32>
    %383 = arith.divf %381, %382 : vector<8x96xf32>
    %384 = vector.extract_strided_slice %377 {offsets = [0, 96], sizes = [8, 32], strides = [1, 1]} : vector<8x128xf32> to vector<8x32xf32>
    %385 = math.tanh %384 : vector<8x32xf32>
    %386 = vector.extract_strided_slice %383 {offsets = [0, 32], sizes = [8, 32], strides = [1, 1]} : vector<8x96xf32> to vector<8x32xf32>
    %387 = arith.mulf %386, %332 : vector<8x32xf32>
    %388 = vector.extract_strided_slice %383 {offsets = [0, 0], sizes = [8, 32], strides = [1, 1]} : vector<8x96xf32> to vector<8x32xf32>
    %389 = arith.mulf %388, %385 : vector<8x32xf32>
    %390 = arith.addf %387, %389 : vector<8x32xf32>
    %391 = vector.extract_strided_slice %383 {offsets = [0, 64], sizes = [8, 32], strides = [1, 1]} : vector<8x96xf32> to vector<8x32xf32>
    %392 = math.tanh %390 : vector<8x32xf32>
    %393 = arith.mulf %391, %392 : vector<8x32xf32>
    %394 = arith.subf %393, %329 : vector<8x32xf32>
    %395 = arith.mulf %347, %394 : vector<8x32xf32>
    %396 = arith.addf %329, %395 : vector<8x32xf32>
    %397 = arith.subf %390, %332 : vector<8x32xf32>
    %398 = arith.mulf %347, %397 : vector<8x32xf32>
    %399 = arith.addf %332, %398 : vector<8x32xf32>
    %c0_145 = arith.constant 0 : index
    %c0_146 = arith.constant 0 : index
    %400 = vector.load %arg12[%c0_145, %c0_146] : memref<32x128xf32, #tpu.memory_space<vmem>>, vector<32x128xf32>
    %cst_147 = arith.constant dense<0.000000e+00> : vector<8x128xf32>
    %401 = tpu.matmul %370, %400, %cst_147 {dimension_numbers = #tpu.dot_dimension_numbers<[1], [0], [0], [1], [0, 0, 1, 1], [], []>} : vector<8x32xf32>, vector<32x128xf32>, vector<8x128xf32> -> vector<8x128xf32>
    %c0_148 = arith.constant 0 : index
    %c0_149 = arith.constant 0 : index
    %402 = vector.load %arg13[%c0_148, %c0_149] : memref<1x128xf32, #tpu.memory_space<vmem>>, vector<1x128xf32>
    %403 = vector.broadcast %402 : vector<1x128xf32> to vector<8x128xf32>
    %404 = arith.addf %401, %403 : vector<8x128xf32>
    %405 = arith.index_cast %c5_i32 : i32 to index
    %c0_150 = arith.constant 0 : index
    %c0_151 = arith.constant 0 : index
    %406 = vector.load %arg14[%405, %c0_150, %c0_151] : memref<8x8x128xf32, #tpu.memory_space<vmem>>, vector<1x8x128xf32>
    %407 = vector.shape_cast %406 : vector<1x8x128xf32> to vector<8x128xf32>
    %408 = vector.shape_cast %404 : vector<8x128xf32> to vector<1x8x128xf32>
    tpu.vector_store %arg14[%405, %c0_150, %c0_151], %408 {strides = array<i32>} : memref<8x8x128xf32, #tpu.memory_space<vmem>>, vector<1x8x128xf32>,
    %c6_i32 = arith.constant 6 : i32
    %409 = arith.index_cast %c6_i32 : i32 to index
    %c0_152 = arith.constant 0 : index
    %c0_153 = arith.constant 0 : index
    %410 = vector.load %arg2[%409, %c0_152, %c0_153] : memref<8x8x128xf32, #tpu.memory_space<vmem>>, vector<1x8x128xf32>
    %411 = vector.shape_cast %410 : vector<1x8x128xf32> to vector<8x128xf32>
    %412 = arith.index_cast %c6_i32 : i32 to index
    %c0_154 = arith.constant 0 : index
    %c0_155 = arith.constant 0 : index
    %413 = vector.load %arg3[%412, %c0_154, %c0_155] : memref<8x8x32xf32, #tpu.memory_space<vmem>>, vector<1x8x32xf32>
    %414 = vector.shape_cast %413 : vector<1x8x32xf32> to vector<8x32xf32>
    %c0_156 = arith.constant 0 : index
    %c0_157 = arith.constant 0 : index
    %415 = vector.load %arg8[%c0_156, %c0_157] : memref<32x256xf32, #tpu.memory_space<vmem>>, vector<32x256xf32>
    %cst_158 = arith.constant dense<0.000000e+00> : vector<8x256xf32>
    %416 = tpu.matmul %396, %415, %cst_158 {dimension_numbers = #tpu.dot_dimension_numbers<[1], [0], [0], [1], [0, 0, 1, 1], [], []>} : vector<8x32xf32>, vector<32x256xf32>, vector<8x256xf32> -> vector<8x256xf32>
    %417 = vector.extract_strided_slice %416 {offsets = [0, 0], sizes = [8, 128], strides = [1, 1]} : vector<8x256xf32> to vector<8x128xf32>
    %418 = arith.addf %411, %417 : vector<8x128xf32>
    %c0_159 = arith.constant 0 : index
    %c0_160 = arith.constant 0 : index
    %419 = vector.load %arg9[%c0_159, %c0_160] : memref<32x128xf32, #tpu.memory_space<vmem>>, vector<32x128xf32>
    %cst_161 = arith.constant dense<0.000000e+00> : vector<8x128xf32>
    %420 = tpu.matmul %370, %419, %cst_161 {dimension_numbers = #tpu.dot_dimension_numbers<[1], [0], [0], [1], [0, 0, 1, 1], [], []>} : vector<8x32xf32>, vector<32x128xf32>, vector<8x128xf32> -> vector<8x128xf32>
    %421 = arith.addf %418, %420 : vector<8x128xf32>
    %422 = vector.extract_strided_slice %421 {offsets = [0, 0], sizes = [8, 96], strides = [1, 1]} : vector<8x128xf32> to vector<8x96xf32>
    %423 = arith.negf %422 : vector<8x96xf32>
    %424 = math.exp %423 : vector<8x96xf32>
    %cst_162 = arith.constant 1.000000e+00 : f32
    %425 = vector.broadcast %cst_162 : f32 to vector<8x96xf32>
    %426 = arith.addf %425, %424 : vector<8x96xf32>
    %427 = arith.divf %425, %426 : vector<8x96xf32>
    %428 = vector.extract_strided_slice %421 {offsets = [0, 96], sizes = [8, 32], strides = [1, 1]} : vector<8x128xf32> to vector<8x32xf32>
    %429 = math.tanh %428 : vector<8x32xf32>
    %430 = vector.extract_strided_slice %427 {offsets = [0, 32], sizes = [8, 32], strides = [1, 1]} : vector<8x96xf32> to vector<8x32xf32>
    %431 = arith.mulf %430, %367 : vector<8x32xf32>
    %432 = vector.extract_strided_slice %427 {offsets = [0, 0], sizes = [8, 32], strides = [1, 1]} : vector<8x96xf32> to vector<8x32xf32>
    %433 = arith.mulf %432, %429 : vector<8x32xf32>
    %434 = arith.addf %431, %433 : vector<8x32xf32>
    %435 = vector.extract_strided_slice %427 {offsets = [0, 64], sizes = [8, 32], strides = [1, 1]} : vector<8x96xf32> to vector<8x32xf32>
    %436 = math.tanh %434 : vector<8x32xf32>
    %437 = arith.mulf %435, %436 : vector<8x32xf32>
    %438 = vector.extract_strided_slice %416 {offsets = [0, 128], sizes = [8, 128], strides = [1, 1]} : vector<8x256xf32> to vector<8x128xf32>
    %c0_163 = arith.constant 0 : index
    %c0_164 = arith.constant 0 : index
    %439 = vector.load %arg11[%c0_163, %c0_164] : memref<1x128xf32, #tpu.memory_space<vmem>>, vector<1x128xf32>
    %440 = vector.broadcast %439 : vector<1x128xf32> to vector<8x128xf32>
    %441 = arith.addf %438, %440 : vector<8x128xf32>
    %c0_165 = arith.constant 0 : index
    %c0_166 = arith.constant 0 : index
    %442 = vector.load %arg10[%c0_165, %c0_166] : memref<32x128xf32, #tpu.memory_space<vmem>>, vector<32x128xf32>
    %cst_167 = arith.constant dense<0.000000e+00> : vector<8x128xf32>
    %443 = tpu.matmul %437, %442, %cst_167 {dimension_numbers = #tpu.dot_dimension_numbers<[1], [0], [0], [1], [0, 0, 1, 1], [], []>} : vector<8x32xf32>, vector<32x128xf32>, vector<8x128xf32> -> vector<8x128xf32>
    %444 = arith.addf %441, %443 : vector<8x128xf32>
    %445 = vector.extract_strided_slice %444 {offsets = [0, 0], sizes = [8, 96], strides = [1, 1]} : vector<8x128xf32> to vector<8x96xf32>
    %446 = arith.negf %445 : vector<8x96xf32>
    %447 = math.exp %446 : vector<8x96xf32>
    %cst_168 = arith.constant 1.000000e+00 : f32
    %448 = vector.broadcast %cst_168 : f32 to vector<8x96xf32>
    %449 = arith.addf %448, %447 : vector<8x96xf32>
    %450 = arith.divf %448, %449 : vector<8x96xf32>
    %451 = vector.extract_strided_slice %444 {offsets = [0, 96], sizes = [8, 32], strides = [1, 1]} : vector<8x128xf32> to vector<8x32xf32>
    %452 = math.tanh %451 : vector<8x32xf32>
    %453 = vector.extract_strided_slice %450 {offsets = [0, 32], sizes = [8, 32], strides = [1, 1]} : vector<8x96xf32> to vector<8x32xf32>
    %454 = arith.mulf %453, %399 : vector<8x32xf32>
    %455 = vector.extract_strided_slice %450 {offsets = [0, 0], sizes = [8, 32], strides = [1, 1]} : vector<8x96xf32> to vector<8x32xf32>
    %456 = arith.mulf %455, %452 : vector<8x32xf32>
    %457 = arith.addf %454, %456 : vector<8x32xf32>
    %458 = vector.extract_strided_slice %450 {offsets = [0, 64], sizes = [8, 32], strides = [1, 1]} : vector<8x96xf32> to vector<8x32xf32>
    %459 = math.tanh %457 : vector<8x32xf32>
    %460 = arith.mulf %458, %459 : vector<8x32xf32>
    %461 = arith.subf %460, %396 : vector<8x32xf32>
    %462 = arith.mulf %414, %461 : vector<8x32xf32>
    %463 = arith.addf %396, %462 : vector<8x32xf32>
    %464 = arith.subf %457, %399 : vector<8x32xf32>
    %465 = arith.mulf %414, %464 : vector<8x32xf32>
    %466 = arith.addf %399, %465 : vector<8x32xf32>
    %c0_169 = arith.constant 0 : index
    %c0_170 = arith.constant 0 : index
    %467 = vector.load %arg12[%c0_169, %c0_170] : memref<32x128xf32, #tpu.memory_space<vmem>>, vector<32x128xf32>
    %cst_171 = arith.constant dense<0.000000e+00> : vector<8x128xf32>
    %468 = tpu.matmul %437, %467, %cst_171 {dimension_numbers = #tpu.dot_dimension_numbers<[1], [0], [0], [1], [0, 0, 1, 1], [], []>} : vector<8x32xf32>, vector<32x128xf32>, vector<8x128xf32> -> vector<8x128xf32>
    %c0_172 = arith.constant 0 : index
    %c0_173 = arith.constant 0 : index
    %469 = vector.load %arg13[%c0_172, %c0_173] : memref<1x128xf32, #tpu.memory_space<vmem>>, vector<1x128xf32>
    %470 = vector.broadcast %469 : vector<1x128xf32> to vector<8x128xf32>
    %471 = arith.addf %468, %470 : vector<8x128xf32>
    %472 = arith.index_cast %c6_i32 : i32 to index
    %c0_174 = arith.constant 0 : index
    %c0_175 = arith.constant 0 : index
    %473 = vector.load %arg14[%472, %c0_174, %c0_175] : memref<8x8x128xf32, #tpu.memory_space<vmem>>, vector<1x8x128xf32>
    %474 = vector.shape_cast %473 : vector<1x8x128xf32> to vector<8x128xf32>
    %475 = vector.shape_cast %471 : vector<8x128xf32> to vector<1x8x128xf32>
    tpu.vector_store %arg14[%472, %c0_174, %c0_175], %475 {strides = array<i32>} : memref<8x8x128xf32, #tpu.memory_space<vmem>>, vector<1x8x128xf32>,
    %c7_i32 = arith.constant 7 : i32
    %476 = arith.index_cast %c7_i32 : i32 to index
    %c0_176 = arith.constant 0 : index
    %c0_177 = arith.constant 0 : index
    %477 = vector.load %arg2[%476, %c0_176, %c0_177] : memref<8x8x128xf32, #tpu.memory_space<vmem>>, vector<1x8x128xf32>
    %478 = vector.shape_cast %477 : vector<1x8x128xf32> to vector<8x128xf32>
    %479 = arith.index_cast %c7_i32 : i32 to index
    %c0_178 = arith.constant 0 : index
    %c0_179 = arith.constant 0 : index
    %480 = vector.load %arg3[%479, %c0_178, %c0_179] : memref<8x8x32xf32, #tpu.memory_space<vmem>>, vector<1x8x32xf32>
    %481 = vector.shape_cast %480 : vector<1x8x32xf32> to vector<8x32xf32>
    %c0_180 = arith.constant 0 : index
    %c0_181 = arith.constant 0 : index
    %482 = vector.load %arg8[%c0_180, %c0_181] : memref<32x256xf32, #tpu.memory_space<vmem>>, vector<32x256xf32>
    %cst_182 = arith.constant dense<0.000000e+00> : vector<8x256xf32>
    %483 = tpu.matmul %463, %482, %cst_182 {dimension_numbers = #tpu.dot_dimension_numbers<[1], [0], [0], [1], [0, 0, 1, 1], [], []>} : vector<8x32xf32>, vector<32x256xf32>, vector<8x256xf32> -> vector<8x256xf32>
    %484 = vector.extract_strided_slice %483 {offsets = [0, 0], sizes = [8, 128], strides = [1, 1]} : vector<8x256xf32> to vector<8x128xf32>
    %485 = arith.addf %478, %484 : vector<8x128xf32>
    %c0_183 = arith.constant 0 : index
    %c0_184 = arith.constant 0 : index
    %486 = vector.load %arg9[%c0_183, %c0_184] : memref<32x128xf32, #tpu.memory_space<vmem>>, vector<32x128xf32>
    %cst_185 = arith.constant dense<0.000000e+00> : vector<8x128xf32>
    %487 = tpu.matmul %437, %486, %cst_185 {dimension_numbers = #tpu.dot_dimension_numbers<[1], [0], [0], [1], [0, 0, 1, 1], [], []>} : vector<8x32xf32>, vector<32x128xf32>, vector<8x128xf32> -> vector<8x128xf32>
    %488 = arith.addf %485, %487 : vector<8x128xf32>
    %489 = vector.extract_strided_slice %488 {offsets = [0, 0], sizes = [8, 96], strides = [1, 1]} : vector<8x128xf32> to vector<8x96xf32>
    %490 = arith.negf %489 : vector<8x96xf32>
    %491 = math.exp %490 : vector<8x96xf32>
    %cst_186 = arith.constant 1.000000e+00 : f32
    %492 = vector.broadcast %cst_186 : f32 to vector<8x96xf32>
    %493 = arith.addf %492, %491 : vector<8x96xf32>
    %494 = arith.divf %492, %493 : vector<8x96xf32>
    %495 = vector.extract_strided_slice %488 {offsets = [0, 96], sizes = [8, 32], strides = [1, 1]} : vector<8x128xf32> to vector<8x32xf32>
    %496 = math.tanh %495 : vector<8x32xf32>
    %497 = vector.extract_strided_slice %494 {offsets = [0, 32], sizes = [8, 32], strides = [1, 1]} : vector<8x96xf32> to vector<8x32xf32>
    %498 = arith.mulf %497, %434 : vector<8x32xf32>
    %499 = vector.extract_strided_slice %494 {offsets = [0, 0], sizes = [8, 32], strides = [1, 1]} : vector<8x96xf32> to vector<8x32xf32>
    %500 = arith.mulf %499, %496 : vector<8x32xf32>
    %501 = arith.addf %498, %500 : vector<8x32xf32>
    %502 = vector.extract_strided_slice %494 {offsets = [0, 64], sizes = [8, 32], strides = [1, 1]} : vector<8x96xf32> to vector<8x32xf32>
    %503 = math.tanh %501 : vector<8x32xf32>
    %504 = arith.mulf %502, %503 : vector<8x32xf32>
    %505 = vector.extract_strided_slice %483 {offsets = [0, 128], sizes = [8, 128], strides = [1, 1]} : vector<8x256xf32> to vector<8x128xf32>
    %c0_187 = arith.constant 0 : index
    %c0_188 = arith.constant 0 : index
    %506 = vector.load %arg11[%c0_187, %c0_188] : memref<1x128xf32, #tpu.memory_space<vmem>>, vector<1x128xf32>
    %507 = vector.broadcast %506 : vector<1x128xf32> to vector<8x128xf32>
    %508 = arith.addf %505, %507 : vector<8x128xf32>
    %c0_189 = arith.constant 0 : index
    %c0_190 = arith.constant 0 : index
    %509 = vector.load %arg10[%c0_189, %c0_190] : memref<32x128xf32, #tpu.memory_space<vmem>>, vector<32x128xf32>
    %cst_191 = arith.constant dense<0.000000e+00> : vector<8x128xf32>
    %510 = tpu.matmul %504, %509, %cst_191 {dimension_numbers = #tpu.dot_dimension_numbers<[1], [0], [0], [1], [0, 0, 1, 1], [], []>} : vector<8x32xf32>, vector<32x128xf32>, vector<8x128xf32> -> vector<8x128xf32>
    %511 = arith.addf %508, %510 : vector<8x128xf32>
    %512 = vector.extract_strided_slice %511 {offsets = [0, 0], sizes = [8, 96], strides = [1, 1]} : vector<8x128xf32> to vector<8x96xf32>
    %513 = arith.negf %512 : vector<8x96xf32>
    %514 = math.exp %513 : vector<8x96xf32>
    %cst_192 = arith.constant 1.000000e+00 : f32
    %515 = vector.broadcast %cst_192 : f32 to vector<8x96xf32>
    %516 = arith.addf %515, %514 : vector<8x96xf32>
    %517 = arith.divf %515, %516 : vector<8x96xf32>
    %518 = vector.extract_strided_slice %511 {offsets = [0, 96], sizes = [8, 32], strides = [1, 1]} : vector<8x128xf32> to vector<8x32xf32>
    %519 = math.tanh %518 : vector<8x32xf32>
    %520 = vector.extract_strided_slice %517 {offsets = [0, 32], sizes = [8, 32], strides = [1, 1]} : vector<8x96xf32> to vector<8x32xf32>
    %521 = arith.mulf %520, %466 : vector<8x32xf32>
    %522 = vector.extract_strided_slice %517 {offsets = [0, 0], sizes = [8, 32], strides = [1, 1]} : vector<8x96xf32> to vector<8x32xf32>
    %523 = arith.mulf %522, %519 : vector<8x32xf32>
    %524 = arith.addf %521, %523 : vector<8x32xf32>
    %525 = vector.extract_strided_slice %517 {offsets = [0, 64], sizes = [8, 32], strides = [1, 1]} : vector<8x96xf32> to vector<8x32xf32>
    %526 = math.tanh %524 : vector<8x32xf32>
    %527 = arith.mulf %525, %526 : vector<8x32xf32>
    %528 = arith.subf %527, %463 : vector<8x32xf32>
    %529 = arith.mulf %481, %528 : vector<8x32xf32>
    %530 = arith.addf %463, %529 : vector<8x32xf32>
    %531 = arith.subf %524, %466 : vector<8x32xf32>
    %532 = arith.mulf %481, %531 : vector<8x32xf32>
    %533 = arith.addf %466, %532 : vector<8x32xf32>
    %c0_193 = arith.constant 0 : index
    %c0_194 = arith.constant 0 : index
    %534 = vector.load %arg12[%c0_193, %c0_194] : memref<32x128xf32, #tpu.memory_space<vmem>>, vector<32x128xf32>
    %cst_195 = arith.constant dense<0.000000e+00> : vector<8x128xf32>
    %535 = tpu.matmul %504, %534, %cst_195 {dimension_numbers = #tpu.dot_dimension_numbers<[1], [0], [0], [1], [0, 0, 1, 1], [], []>} : vector<8x32xf32>, vector<32x128xf32>, vector<8x128xf32> -> vector<8x128xf32>
    %c0_196 = arith.constant 0 : index
    %c0_197 = arith.constant 0 : index
    %536 = vector.load %arg13[%c0_196, %c0_197] : memref<1x128xf32, #tpu.memory_space<vmem>>, vector<1x128xf32>
    %537 = vector.broadcast %536 : vector<1x128xf32> to vector<8x128xf32>
    %538 = arith.addf %535, %537 : vector<8x128xf32>
    %539 = arith.index_cast %c7_i32 : i32 to index
    %c0_198 = arith.constant 0 : index
    %c0_199 = arith.constant 0 : index
    %540 = vector.load %arg14[%539, %c0_198, %c0_199] : memref<8x8x128xf32, #tpu.memory_space<vmem>>, vector<1x8x128xf32>
    %541 = vector.shape_cast %540 : vector<1x8x128xf32> to vector<8x128xf32>
    %542 = vector.shape_cast %538 : vector<8x128xf32> to vector<1x8x128xf32>
    tpu.vector_store %arg14[%539, %c0_198, %c0_199], %542 {strides = array<i32>} : memref<8x8x128xf32, #tpu.memory_space<vmem>>, vector<1x8x128xf32>,
    %c8_i32 = arith.constant 8 : i32
    %c0_200 = arith.constant 0 : index
    %c0_201 = arith.constant 0 : index
    %543 = vector.load %arg15[%c0_200, %c0_201] : memref<8x32xf32, #tpu.memory_space<vmem>>, vector<8x32xf32>
    tpu.vector_store %arg15[%c0_200, %c0_201], %504 {strides = array<i32>} : memref<8x32xf32, #tpu.memory_space<vmem>>, vector<8x32xf32>,
    %c0_202 = arith.constant 0 : index
    %c0_203 = arith.constant 0 : index
    %544 = vector.load %arg16[%c0_202, %c0_203] : memref<8x32xf32, #tpu.memory_space<vmem>>, vector<8x32xf32>
    tpu.vector_store %arg16[%c0_202, %c0_203], %501 {strides = array<i32>} : memref<8x32xf32, #tpu.memory_space<vmem>>, vector<8x32xf32>,
    %c0_204 = arith.constant 0 : index
    %c0_205 = arith.constant 0 : index
    %545 = vector.load %arg17[%c0_204, %c0_205] : memref<8x32xf32, #tpu.memory_space<vmem>>, vector<8x32xf32>
    tpu.vector_store %arg17[%c0_204, %c0_205], %530 {strides = array<i32>} : memref<8x32xf32, #tpu.memory_space<vmem>>, vector<8x32xf32>,
    %c0_206 = arith.constant 0 : index
    %c0_207 = arith.constant 0 : index
    %546 = vector.load %arg18[%c0_206, %c0_207] : memref<8x32xf32, #tpu.memory_space<vmem>>, vector<8x32xf32>
    tpu.vector_store %arg18[%c0_206, %c0_207], %533 {strides = array<i32>} : memref<8x32xf32, #tpu.memory_space<vmem>>, vector<8x32xf32>,
    return
  }
  func.func @transform_0(%arg0: i32, %arg1: i32) -> (i32, i32, i32) {
    %c0_i32 = arith.constant 0 : i32
    %c0_i32_0 = arith.constant 0 : i32
    return %arg1, %arg0, %c0_i32 : i32, i32, i32
  }
  func.func @transform_1(%arg0: i32, %arg1: i32) -> (i32, i32, i32) {
    %c0_i32 = arith.constant 0 : i32
    %c0_i32_0 = arith.constant 0 : i32
    return %arg1, %arg0, %c0_i32 : i32, i32, i32
  }
  func.func @transform_2(%arg0: i32, %arg1: i32) -> (i32, i32) {
    %c0_i32 = arith.constant 0 : i32
    %c0_i32_0 = arith.constant 0 : i32
    return %arg0, %c0_i32 : i32, i32
  }
  func.func @transform_3(%arg0: i32, %arg1: i32) -> (i32, i32) {
    %c0_i32 = arith.constant 0 : i32
    %c0_i32_0 = arith.constant 0 : i32
    return %arg0, %c0_i32 : i32, i32
  }
  func.func @transform_4(%arg0: i32, %arg1: i32) -> (i32, i32) {
    %c0_i32 = arith.constant 0 : i32
    %c0_i32_0 = arith.constant 0 : i32
    return %arg0, %c0_i32 : i32, i32
  }
  func.func @transform_5(%arg0: i32, %arg1: i32) -> (i32, i32) {
    %c0_i32 = arith.constant 0 : i32
    %c0_i32_0 = arith.constant 0 : i32
    return %arg0, %c0_i32 : i32, i32
  }
  func.func @transform_6(%arg0: i32, %arg1: i32) -> (i32, i32) {
    %c0_i32 = arith.constant 0 : i32
    %c0_i32_0 = arith.constant 0 : i32
    %c0_i32_1 = arith.constant 0 : i32
    return %c0_i32, %c0_i32_0 : i32, i32
  }
  func.func @transform_7(%arg0: i32, %arg1: i32) -> (i32, i32) {
    %c0_i32 = arith.constant 0 : i32
    %c0_i32_0 = arith.constant 0 : i32
    %c0_i32_1 = arith.constant 0 : i32
    return %c0_i32, %c0_i32_0 : i32, i32
  }
  func.func @transform_8(%arg0: i32, %arg1: i32) -> (i32, i32) {
    %c0_i32 = arith.constant 0 : i32
    %c0_i32_0 = arith.constant 0 : i32
    %c0_i32_1 = arith.constant 0 : i32
    return %c0_i32, %c0_i32_0 : i32, i32
  }
  func.func @transform_9(%arg0: i32, %arg1: i32) -> (i32, i32) {
    %c0_i32 = arith.constant 0 : i32
    %c0_i32_0 = arith.constant 0 : i32
    %c0_i32_1 = arith.constant 0 : i32
    return %c0_i32, %c0_i32_0 : i32, i32
  }
  func.func @transform_10(%arg0: i32, %arg1: i32) -> (i32, i32) {
    %c0_i32 = arith.constant 0 : i32
    %c0_i32_0 = arith.constant 0 : i32
    %c0_i32_1 = arith.constant 0 : i32
    return %c0_i32, %c0_i32_0 : i32, i32
  }
  func.func @transform_11(%arg0: i32, %arg1: i32) -> (i32, i32) {
    %c0_i32 = arith.constant 0 : i32
    %c0_i32_0 = arith.constant 0 : i32
    %c0_i32_1 = arith.constant 0 : i32
    return %c0_i32, %c0_i32_0 : i32, i32
  }
  func.func @transform_12(%arg0: i32, %arg1: i32) -> (i32, i32, i32) {
    %c0_i32 = arith.constant 0 : i32
    %c0_i32_0 = arith.constant 0 : i32
    return %arg1, %arg0, %c0_i32 : i32, i32, i32
  }
  func.func @transform_13(%arg0: i32, %arg1: i32) -> (i32, i32) {
    %c0_i32 = arith.constant 0 : i32
    %c0_i32_0 = arith.constant 0 : i32
    return %arg0, %c0_i32 : i32, i32
  }
  func.func @transform_14(%arg0: i32, %arg1: i32) -> (i32, i32) {
    %c0_i32 = arith.constant 0 : i32
    %c0_i32_0 = arith.constant 0 : i32
    return %arg0, %c0_i32 : i32, i32
  }
  func.func @transform_15(%arg0: i32, %arg1: i32) -> (i32, i32) {
    %c0_i32 = arith.constant 0 : i32
    %c0_i32_0 = arith.constant 0 : i32
    return %arg0, %c0_i32 : i32, i32
  }
  func.func @transform_16(%arg0: i32, %arg1: i32) -> (i32, i32) {
    %c0_i32 = arith.constant 0 : i32
    %c0_i32_0 = arith.constant 0 : i32
    return %arg0, %c0_i32 : i32, i32
  }
}

</mosaic_0001>

<bundles_post_ra>
// kernel: factor_hrnn_forward.2
= control target key start
LH: loop header
LB: loop body
LE: loop exit
PB: predicated region body
PF: predicated region fallthrough
CT: control target
= control target key end

     0   :  { %vm33_vm0 = vcmask 261120   ;;  %s315_s1 = inlined_call_operand.vmem [shape: f32[32,128], index: 1, kind: input, shape index: {}]   ;;  %s316_s0 = inlined_call_operand.vmem [shape: f32[64,32], index: 0, kind: input, shape index: {}]   ;;  %s317_s2 = inlined_call_operand.vmem [shape: f32[1,128], index: 2, kind: input, shape index: {}]   ;;  %s318_s3 = inlined_call_operand.vmem [shape: f32[64,128], index: 3, kind: output, shape index: {}]  }
   0x1   :  { %v25_v0 = vld [vmem:[%s315_s1 + $0x18] sm:$0xff]  ;;  %v24_v1 = vld [vmem:[%s315_s1 + $0x10] sm:$0xff]  ;;  %v23_v2 = vld [vmem:[%s315_s1 + $0x8] sm:$0xff] }
   0x2   :  { %196 = vmatprep.subr.mxu0 %v25_v0  ;;  %216 = vmatprep.subr.mxu1 %v25_v0  ;;  %v22_v3 = vld [vmem:[%s315_s1] sm:$0xff]  ;;  %v15_v6 = vld [vmem:[%s316_s0 + $0x8] sm:$0xff]  ;;  %v16_v8 = vld [vmem:[%s316_s0 + $0x10] sm:$0xff] }
   0x3   :  { %197 = vmatpush3.msra.mxu0 %v25_v0  ;;  %220 = vmatpush3.msra.mxu1 %v25_v0  ;;  %v14_v4 = vld [vmem:[%s316_s0] sm:$0xff]  ;;  %v19_v7 = vld [vmem:[%s316_s0 + $0x28] sm:$0xff]  ;;  %v20_v9 = vld [vmem:[%s316_s0 + $0x30] sm:$0xff] }
   0x4   :  { %198 = vmatprep.subr.mxu0 %v24_v1  ;;  %217 = vmatprep.subr.mxu1 %v24_v1  ;;  %v18_v5 = vld [vmem:[%s316_s0 + $0x20] sm:$0xff]  ;;  %v17_v10 = vld [vmem:[%s316_s0 + $0x18] sm:$0xff] }
   0x5   :  { %199 = vmatpush3.msra.mxu0 %v24_v1  ;;  %221 = vmatpush3.msra.mxu1 %v24_v1  ;;  %v21_v11 = vld [vmem:[%s316_s0 + $0x38] sm:$0xff]  ;;  %v175_v12 = vld [vmem:[%s317_s2] ss:$0 sm:$0xff] }
   0x6   :  { %200 = vmatprep.subr.mxu0 %v23_v2  ;;  %218 = vmatprep.subr.mxu1 %v23_v2 }
   0x7   :  { %201 = vmatpush3.msra.mxu0 %v23_v2  ;;  %222 = vmatpush3.msra.mxu1 %v23_v2 }
   0x8   :  { %202 = vmatprep.subr.mxu0 %v22_v3  ;;  %219 = vmatprep.subr.mxu1 %v22_v3 }
   0x9   :  { %203 = vmatpush3.msra.mxu0 %v22_v3  ;;  %223 = vmatpush3.msra.mxu1 %v22_v3 }
   0xa   :  { %204 = vmatprep.mubr.msk.f32.mxu0 %vm33_vm0, %v14_v4  ;;  %210 = vmatprep.mubr.msk.f32.mxu1 %vm33_vm0, %v18_v5 }
   0xb   :  { %205 = vmatmul.mubr.msk.f32.vlgmr.msra.gmra.mxu0 %vm33_vm0, %v15_v6  ;;  %211 = vmatmul.mubr.msk.f32.vlgmr.msra.gmra.mxu1 %vm33_vm0, %v19_v7 }
   0xc   :  { %207 = vmatprep.mubr.msk.f32.mxu0 %vm33_vm0, %v16_v8  ;;  %213 = vmatprep.mubr.msk.f32.mxu1 %vm33_vm0, %v20_v9 }
   0xf   :  { %208 = vmatmul.mubr.msk.f32.gmra.mxu0 %vm33_vm0, %v17_v10  ;;  %214 = vmatmul.mubr.msk.f32.gmra.mxu1 %vm33_vm0, %v21_v11 }
  0xcb   :  { %v206_v13 = vpop.f32.mrf.mxu0  ;;  %v212_v14 = vpop.f32.mrf.mxu1 }
  0xcc   :  { %v130_v15 = vadd.f32 %v206_v13, %v175_v12  ;;  %v150_v16 = vadd.f32 %v212_v14, %v175_v12 }
  0xcd   :  { %v124_v17 = vpop.f32.mrf.mxu0  ;;  %v144_v18 = vpop.f32.mrf.mxu1 }
  0xce   :  { %164 = vst [vmem:[%s318_s3 + $0x8] sm:$0xff] %v130_v15  ;;  %168 = vst [vmem:[%s318_s3 + $0x28] sm:$0xff] %v150_v16  ;;  %v125_v19 = vadd.f32 %v175_v12, %v124_v17  ;;  %v145_v20 = vadd.f32 %v175_v12, %v144_v18 }
  0xcf   :  { %v209_v21 = vpop.f32.mrf.mxu0  ;;  %v215_v22 = vpop.f32.mrf.mxu1 }
  0xd0   :  { %163 = vst [vmem:[%s318_s3] sm:$0xff] %v125_v19  ;;  %167 = vst [vmem:[%s318_s3 + $0x20] sm:$0xff] %v145_v20  ;;  %v140_v23 = vadd.f32 %v209_v21, %v175_v12  ;;  %v160_v24 = vadd.f32 %v215_v22, %v175_v12 }
  0xd1   :  { %v134_v25 = vpop.f32.mrf.mxu0  ;;  %v154_v26 = vpop.f32.mrf.mxu1 }
  0xd2   :  { %166 = vst [vmem:[%s318_s3 + $0x18] sm:$0xff] %v140_v23  ;;  %170 = vst [vmem:[%s318_s3 + $0x38] sm:$0xff] %v160_v24  ;;  %v135_v27 = vadd.f32 %v175_v12, %v134_v25  ;;  %v155_v28 = vadd.f32 %v175_v12, %v154_v26 }
  0xd4   :  { %165 = vst [vmem:[%s318_s3 + $0x10] sm:$0xff] %v135_v27  ;;  %169 = vst [vmem:[%s318_s3 + $0x30] sm:$0xff] %v155_v28 }

// kernel: factor_hrnn_forward.3
= control target key start
LH: loop header
LB: loop body
LE: loop exit
PB: predicated region body
PF: predicated region fallthrough
CT: control target
= control target key end

     0   :  { %v3915_v1 = vmov 0.0   ;;  %vm51_vm0 = vcmask 261120   ;;  %vm3916_vm1 = vmmov 0   ;;  %s3917_s19 = smov 32   ;;  %s3919_s21 = smov 96   ;;  %s4907_s6 = inlined_call_operand.vmem [shape: f32[32,256], index: 6, kind: input, shape index: {}]   ;;  %s4908_s7 = inlined_call_operand.vmem [shape: f32[32,128], index: 7, kind: input, shape index: {}]   ;;  %s4909_s4 = inlined_call_operand.vmem [shape: f32[8,32], index: 4, kind: input, shape index: {}]   ;;  %s4910_s2 = inlined_call_operand.vmem [shape: f32[8,32], index: 2, kind: input, shape index: {}]   ;;  %s4911_s15 = inlined_call_operand.vmem [shape: f32[8,32], index: 15, kind: output, shape index: {3}]   ;;  %s4912_s13 = inlined_call_operand.vmem [shape: f32[8,32], index: 13, kind: output, shape index: {1}]   ;;  %s4913_s3 = inlined_call_operand.vmem [shape: f32[8,32], index: 3, kind: input, shape index: {}]   ;;  %s4914_s14 = inlined_call_operand.vmem [shape: f32[8,32], index: 14, kind: output, shape index: {2}]   ;;  %s4915_s0 = inlined_call_operand.vmem [shape: f32[8,8,128], index: 0, kind: input, shape index: {}]   ;;  %s4916_s10 = inlined_call_operand.vmem [shape: f32[32,128], index: 10, kind: input, shape index: {}]   ;;  %s4917_s8 = inlined_call_operand.vmem [shape: f32[32,128], index: 8, kind: input, shape index: {}]   ;;  %s4918_s5 = inlined_call_operand.vmem [shape: f32[8,32], index: 5, kind: input, shape index: {}]   ;;  %s4919_s16 = inlined_call_operand.vmem [shape: f32[8,32], index: 16, kind: output, shape index: {4}]   ;;  %s4920_s9 = inlined_call_operand.vmem [shape: f32[1,128], index: 9, kind: input, shape index: {}]   ;;  %s4921_s11 = inlined_call_operand.vmem [shape: f32[1,128], index: 11, kind: input, shape index: {}]   ;;  %s4922_s12 = inlined_call_operand.vmem [shape: f32[8,8,128], index: 12, kind: output, shape index: {0}]   ;;  %s4923_s1 = inlined_call_operand.vmem [shape: f32[8,8,32], index: 1, kind: input, shape index: {}]  }
   0x1   :  { %4925 = sst [smem:[#allocation2_spill]] %s4907_s6  ;;  %3518 = vmatprep.subr.mxu1 %v3915_v1  ;;  %v4019_v3 = vld [vmem:[%s4908_s7 + $0x18] sm:$0xff]  ;;  %141 = vmatprep.mubr.f32.mxu0 %v3915_v1  ;;  %v4037_v6 = vld [vmem:[%s4908_s7 + $0x10] sm:$0xff]  ;;  %v4049_v8 = vld [vmem:[%s4908_s7 + $0x8] sm:$0xff] }
   0x2   :  { %s4926_s23 = sld [smem:[#allocation2_spill]]  ;;  %3519 = vmatpush3.msra.mxu1 %v4019_v3  ;;  %v4068_v11 = vld [vmem:[%s4908_s7] sm:$0xff]  ;;  %3526 = vmatprep.mubr.msk.f32.mxu1 %vm3916_vm1, %v3915_v1  ;;  %v4137_v36 = vld [vmem:[%s4916_s10 + $0x18] sm:$0xff]  ;;  %v4147_v38 = vld [vmem:[%s4916_s10 + $0x10] sm:$0xff] }
   0x3   :  { %3520 = vmatprep.subr.mxu1 %v3915_v1  ;;  %v55_v12 = vld [vmem:[%s4909_s4] sm:$0xff]  ;;  %v4142_v37 = vld [vmem:[%s4917_s8 + $0x18] sm:$0xff]  ;;  %v4154_v39 = vld [vmem:[%s4917_s8 + $0x10] sm:$0xff] }
   0x4   :  { %3521 = vmatpush3.msra.mxu1 %v4037_v6  ;;  %v50_v13 = vld [vmem:[%s4910_s2] sm:$0xff]  ;;  %56 = vst.msk [vmem:[%s4911_s15] sm:$0xff] %vm51_vm0, %v55_v12  ;;  %v4161_v40 = vld [vmem:[%s4916_s10 + $0x8] sm:$0xff]  ;;  %s3918_s2 = smov 64  }
   0x5   :  { %3522 = vmatprep.subr.mxu1 %v3915_v1  ;;  %52 = vst.msk [vmem:[%s4912_s13] sm:$0xff] %vm51_vm0, %v50_v13  ;;  %v53_v17 = vld [vmem:[%s4913_s3] sm:$0xff]  ;;  %v4166_v41 = vld [vmem:[%s4917_s8 + $0x8] sm:$0xff] }
   0x6   :  { %3523 = vmatpush3.msra.mxu1 %v4049_v8  ;;  %54 = vst.msk [vmem:[%s4914_s14] sm:$0xff] %vm51_vm0, %v53_v17  ;;  %v63_v18 = vld [vmem:[%s4915_s0] sm:$0xff] }
   0x7   :  { %3524 = vmatprep.subr.mxu1 %v3915_v1  ;;  %v4175_v42 = vld [vmem:[%s4916_s10] sm:$0xff] }
   0x8   :  { %v4008_v0 = vld [vmem:[%s4926_s23 + $0x38] sm:$0xff]  ;;  %v4014_v2 = vld [vmem:[%s4926_s23 + $0x30] sm:$0xff]  ;;  %v4027_v4 = vld [vmem:[%s4926_s23 + $0x28] sm:$0xff]  ;;  %3525 = vmatpush3.msra.mxu1 %v4068_v11 }
   0x9   :  { %101 = vmatprep.subr.mxu0 %v4008_v0  ;;  %v4032_v5 = vld [vmem:[%s4926_s23 + $0x20] sm:$0xff]  ;;  %v4044_v7 = vld [vmem:[%s4926_s23 + $0x18] sm:$0xff]  ;;  %v4056_v9 = vld [vmem:[%s4926_s23 + $0x10] sm:$0xff]  ;;  %3540 = vmatprep.subr.mxu1 %v3915_v1 }
   0xa   :  { %102 = vmatpush1.msra.mxu0 %v4014_v2  ;;  %v4061_v10 = vld [vmem:[%s4926_s23 + $0x8] sm:$0xff]  ;;  %v4081_v14 = vld [vmem:[%s4926_s23] sm:$0xff] }
   0xb   :  { %103 = vmatprep.subr.mxu0 %v4027_v4  ;;  %v4103_v15 = vld [vmem:[%s4911_s15] sm:$0xff] }
   0xc   :  { %104 = vmatpush1.msra.mxu0 %v4032_v5  ;;  %v59_v16 = vld [vmem:[%s4912_s13] sm:$0xff] }
   0xd   :  { %105 = vmatprep.subr.mxu0 %v4044_v7  ;;  %3527 = vmatmul.mubr.msk.f32.vlgmr.msra.gmra.mxu1 %vm51_vm0, %v59_v16  ;;  %v60_v25 = vld [vmem:[%s4914_s14] sm:$0xff] }
   0xe   :  { %106 = vmatpush1.msra.mxu0 %v4056_v9  ;;  %3548 = vmatprep.mubr.msk.f32.mxu1 %vm3916_vm1, %v3915_v1  ;;  %v4180_v43 = vld [vmem:[%s4917_s8] sm:$0xff] }
   0xf   :  { %107 = vmatprep.subr.mxu0 %v4061_v10  ;;  %3541 = vmatpush3.msra.mxu1 %v4137_v36  ;;  %v57_v45 = vld [vmem:[%s4918_s5] sm:$0xff] }
  0x10   :  { %108 = vmatpush1.msra.mxu0 %v4081_v14  ;;  %3542 = vmatprep.subr.mxu1 %v3915_v1  ;;  %58 = vst.msk [vmem:[%s4919_s16] sm:$0xff] %vm51_vm0, %v57_v45  ;;  %v4241_v51 = vld [vmem:[%s4920_s9] ss:$0 sm:$0xff] }
  0x11   :  { %3529 = vmatprep.subr.mxu0 %v3915_v1  ;;  %3313 = vmatmul.mubr.msk.f32.vlgmr.msra.gmra.mxu0 %vm51_vm0, %v4103_v15  ;;  %v4246_v52 = vld [vmem:[%s4921_s11] ss:$0 sm:$0xff] }
  0x12   :  { %3537 = vmatprep.mubr.msk.f32.mxu0 %vm3916_vm1, %v3915_v1  ;;  %3530 = vmatpush3.msra.mxu0 %v4142_v37 }
  0x13   :  { %3531 = vmatprep.subr.mxu0 %v3915_v1  ;;  %3543 = vmatpush3.msra.mxu1 %v4147_v38 }
  0x14   :  { %3532 = vmatpush3.msra.mxu0 %v4154_v39  ;;  %3544 = vmatprep.subr.mxu1 %v3915_v1 }
  0x15   :  { %3533 = vmatprep.subr.mxu0 %v3915_v1  ;;  %3545 = vmatpush3.msra.mxu1 %v4161_v40 }
  0x16   :  { %3534 = vmatpush3.msra.mxu0 %v4166_v41  ;;  %3546 = vmatprep.subr.mxu1 %v3915_v1 }
  0x17   :  { %3535 = vmatprep.subr.mxu0 %v3915_v1  ;;  %3547 = vmatpush3.msra.mxu1 %v4175_v42  ;;  %v4202_v48 = vld [vmem:[%s4919_s16] sm:$0xff] }
  0x18   :  { %3536 = vmatpush3.msra.mxu0 %v4180_v43  ;;  %3551 = vmatprep.subr.mxu1 %v3915_v1 }
  0x19   :  { %509 = vmatprep.subr.mxu0 %v4008_v0 }
  0xcd   :  { %v222_v20 = vpop.f32.mrf.mxu1 }
  0xcf   :  { %v3528_v22 = vpop.f32.mrf.mxu1 }
  0xd1   :  { %v143_v19 = vpop.f32.mrf.mxu0 }
  0xd2   :  { %v148_v21 = vadd.f32 %v143_v19, %v63_v18 }
  0xd3   :  { %v145_v50 = vpop.f32.mrf.mxu0 }
  0xd4   :  { %v226_v23 = vadd.f32 %v222_v20, %v148_v21  ;;  %v262_v53 = vadd.f32 %v4241_v51, %v145_v50 }
  0xd6   :  { %3787 = vtanh.f32 %v226_v23  ;;  %v3315_v26 = vmul.f32 -1.442695, %v226_v23 }
  0xd8   :  { %3789 = vpow2.f32 %v3315_v26 }
  0xe3   :  { %v3788_v24 = vpop.eup %3787 }
  0xe4   :  { %240 = vrot.lane.b32.xlu0 %v3788_v24, %s3917_s19 }
  0xe5   :  { %v3790_v27 = vpop.eup %3789 }
  0xe6   :  { %v230_v28 = vadd.f32 1.0, %v3790_v27 }
  0xe8   :  { %235 = vrot.lane.b32.xlu0 %v60_v25, %s3917_s19  ;;  %3791 = vrcp.f32 %v230_v28  ;;  %v64_v28 = vld [vmem:[%s4923_s1] sm:$0xff] }
  0xf5   :  { %v3792_v29 = vpop.eup %3791 }
 0x156   :  { %v241_v30 = vpop.permute.xlu0 %240 }
 0x157   :  { %v243_v31 = vmul.f32 %v3792_v29, %v241_v30 }
 0x159   :  { %245 = vrot.lane.b32.xlu1 %v243_v31, %s3917_s19 }
 0x15a   :  { %v236_v32 = vpop.permute.xlu0 %235 }
 0x15b   :  { %v238_v33 = vmul.f32 %v3792_v29, %v236_v32 }
 0x1cb   :  { %v246_v34 = vpop.permute.xlu1 %245 }
 0x1cc   :  { %v4131_v35 = vadd.f32 %v246_v34, %v238_v33 }
 0x1ce   :  { %3793 = vtanh.f32 %v4131_v35 }
 0x1db   :  { %v3794_v44 = vpop.eup %3793 }
 0x1dc   :  { %251 = vrot.lane.b32.xlu1 %v3794_v44, %s3917_s19 }
 0x24e   :  { %v252_v46 = vpop.permute.xlu1 %251 }
 0x24f   :  { %v254_v47 = vmul.f32 %v3792_v29, %v252_v46 }
 0x251   :  { %268 = vrot.lane.b32.xlu0 %v254_v47, %s3918_s2 }
 0x255   :  { %351 = vrot.lane.b32.xlu0 %v4202_v48, %s3917_s19 }
 0x2c3   :  { %v269_v49 = vpop.permute.xlu0 %268 }
 0x2c4   :  { %3538 = vmatmul.mubr.msk.f32.vlgmr.msra.gmra.mxu0 %vm51_vm0, %v269_v49  ;;  %3549 = vmatmul.mubr.msk.f32.vlgmr.msra.gmra.mxu1 %vm51_vm0, %v269_v49 }
 0x2c5   :  { %3552 = vmatpush3.msra.mxu1 %v4019_v3  ;;  %3559 = vmatprep.mubr.msk.f32.mxu1 %vm3916_vm1, %v3915_v1 }
 0x2c6   :  { %3553 = vmatprep.subr.mxu1 %v3915_v1  ;;  %510 = vmatpush1.msra.mxu0 %v4014_v2 }
 0x2c7   :  { %3554 = vmatpush3.msra.mxu1 %v4037_v6  ;;  %511 = vmatprep.subr.mxu0 %v4027_v4  ;;  %v352_v19 = vpop.permute.xlu0 %351 }
 0x2c8   :  { %3555 = vmatprep.subr.mxu1 %v3915_v1  ;;  %512 = vmatpush1.msra.mxu0 %v4032_v5 }
 0x2c9   :  { %3556 = vmatpush3.msra.mxu1 %v4049_v8  ;;  %513 = vmatprep.subr.mxu0 %v4044_v7 }
 0x2ca   :  { %3557 = vmatprep.subr.mxu1 %v3915_v1  ;;  %514 = vmatpush1.msra.mxu0 %v4056_v9 }
 0x2cb   :  { %3558 = vmatpush3.msra.mxu1 %v4068_v11  ;;  %515 = vmatprep.subr.mxu0 %v4061_v10 }
 0x2cc   :  { %3560 = vmatmul.mubr.msk.f32.vlgmr.msra.gmra.mxu1 %vm51_vm0, %v269_v49  ;;  %516 = vmatpush1.msra.mxu0 %v4081_v14 }
 0x2cd   :  { %549 = vmatprep.mubr.f32.mxu0 %v3915_v1  ;;  %3573 = vmatprep.subr.mxu1 %v3915_v1 }
 0x2ce   :  { %3562 = vmatprep.subr.mxu0 %v3915_v1  ;;  %3574 = vmatpush3.msra.mxu1 %v4137_v36 }
 0x2cf   :  { %3575 = vmatprep.subr.mxu1 %v3915_v1  ;;  %3581 = vmatprep.mubr.msk.f32.mxu1 %vm3916_vm1, %v3915_v1 }
 0x2d0   :  { %3576 = vmatpush3.msra.mxu1 %v4147_v38 }
 0x2d1   :  { %3577 = vmatprep.subr.mxu1 %v3915_v1 }
 0x2d2   :  { %3578 = vmatpush3.msra.mxu1 %v4161_v40 }
 0x2d3   :  { %3579 = vmatprep.subr.mxu1 %v3915_v1 }
 0x2d4   :  { %3580 = vmatpush3.msra.mxu1 %v4175_v42 }
 0x2d5   :  { %3584 = vmatprep.subr.mxu1 %v3915_v1 }
 0x384   :  { %v338_v54 = vpop.f32.mrf.mxu0  ;;  %v465_v55 = vpop.f32.mrf.mxu1 }
 0x385   :  { %v342_v56 = vadd.f32 %v338_v54, %v262_v53  ;;  %v466_v57 = vadd.f32 %v4246_v52, %v465_v55 }
 0x386   :  { %v3539_v58 = vpop.f32.mrf.mxu0  ;;  %v3550_v59 = vpop.f32.mrf.mxu1 }
 0x387   :  { %3795 = vtanh.f32 %v342_v56  ;;  %469 = vst [vmem:[%s4922_s12] sm:$0xff] %v466_v57  ;;  %v3318_v63 = vmul.f32 -1.442695, %v342_v56 }
 0x389   :  { %3797 = vpow2.f32 %v3318_v63 }
 0x38c   :  { %v627_v60 = vpop.f32.mrf.mxu1 }
 0x38e   :  { %v3561_v61 = vpop.f32.mrf.mxu1 }
 0x394   :  { %v3796_v62 = vpop.eup %3795 }
 0x395   :  { %356 = vrot.lane.b32.xlu1 %v3796_v62, %s3917_s19 }
 0x396   :  { %v3798_v12 = vpop.eup %3797 }
 0x397   :  { %v346_v13 = vadd.f32 1.0, %v3798_v12 }
 0x399   :  { %3799 = vrcp.f32 %v346_v13 }
 0x3a6   :  { %v3800_v16 = vpop.eup %3799 }
 0x3a7   :  { %v354_v20 = vmul.f32 %v3800_v16, %v352_v19 }
 0x407   :  { %v357_v17 = vpop.permute.xlu1 %356 }
 0x408   :  { %v359_v18 = vmul.f32 %v3800_v16, %v357_v17 }
 0x40a   :  { %361 = vrot.lane.b32.xlu1 %v359_v18, %s3917_s19 }
 0x40e   :  { %371 = vrot.lane.b32.xlu1 %v4103_v15, %s3918_s2 }
 0x47c   :  { %v362_v21 = vpop.permute.xlu1 %361 }
 0x47d   :  { %v364_v22 = vadd.f32 %v362_v21, %v354_v20 }
 0x47f   :  { %3801 = vtanh.f32 %v364_v22  ;;  %v381_v58 = vsub.f32 %v364_v22, %v352_v19 }
 0x480   :  { %v372_v25 = vpop.permute.xlu1 %371 }
 0x48c   :  { %v3802_v23 = vpop.eup %3801 }
 0x48d   :  { %367 = vrot.lane.b32.xlu0 %v3802_v23, %s3917_s19 }
 0x4ff   :  { %v368_v24 = vpop.permute.xlu0 %367 }
 0x500   :  { %v370_v26 = vmul.f32 %v3800_v16, %v368_v24 }
 0x502   :  { %v374_v27 = vsub.f32 %v370_v26, %v372_v25 }
 0x504   :  { %376 = vrot.lane.b32.xlu0 %v374_v27, %s3918_s2 }
 0x576   :  { %v377_v29 = vpop.permute.xlu0 %376 }
 0x577   :  { %v379_v30 = vmul.f32 %v377_v29, %v64_v28 }
 0x579   :  { %v4263_v31 = vadd.f32 %v379_v30, %v4103_v15  ;;  %v3321_v15 = vld [vmem:[%s4915_s0 + $0x8] sm:$0xff] }
 0x57b   :  { %3323 = vmatmul.mubr.msk.f32.vlgmr.msra.gmra.mxu0 %vm51_vm0, %v4263_v31 }
 0x57c   :  { %3563 = vmatpush3.msra.mxu0 %v4142_v37  ;;  %3570 = vmatprep.mubr.msk.f32.mxu0 %vm3916_vm1, %v3915_v1 }
 0x57d   :  { %3564 = vmatprep.subr.mxu0 %v3915_v1 }
 0x57e   :  { %3565 = vmatpush3.msra.mxu0 %v4154_v39 }
 0x57f   :  { %3566 = vmatprep.subr.mxu0 %v3915_v1 }
 0x580   :  { %3567 = vmatpush3.msra.mxu0 %v4166_v41 }
 0x581   :  { %3568 = vmatprep.subr.mxu0 %v3915_v1 }
 0x582   :  { %3569 = vmatpush3.msra.mxu0 %v4180_v43 }
 0x583   :  { %911 = vmatprep.subr.mxu0 %v4008_v0 }
 0x63b   :  { %v551_v32 = vpop.f32.mrf.mxu0 }
 0x63c   :  { %v556_v33 = vadd.f32 %v3321_v15, %v551_v32 }
 0x63e   :  { %v631_v34 = vadd.f32 %v627_v60, %v556_v33 }
 0x640   :  { %3803 = vtanh.f32 %v631_v34  ;;  %v3325_v45 = vmul.f32 -1.442695, %v631_v34 }
 0x642   :  { %3805 = vpow2.f32 %v3325_v45 }
 0x64d   :  { %v3804_v44 = vpop.eup %3803 }
 0x64e   :  { %641 = vrot.lane.b32.xlu1 %v3804_v44, %s3917_s19 }
 0x64f   :  { %v3806_v46 = vpop.eup %3805 }
 0x650   :  { %v635_v47 = vadd.f32 1.0, %v3806_v46 }
 0x652   :  { %3807 = vrcp.f32 %v635_v47 }
 0x65f   :  { %v3808_v49 = vpop.eup %3807 }
 0x660   :  { %v639_v54 = vmul.f32 %v3808_v49, %v4131_v35 }
 0x6c0   :  { %v642_v50 = vpop.permute.xlu1 %641 }
 0x6c1   :  { %v644_v53 = vmul.f32 %v3808_v49, %v642_v50 }
 0x6c3   :  { %646 = vrot.lane.b32.xlu0 %v644_v53, %s3917_s19 }
 0x735   :  { %v647_v55 = vpop.permute.xlu0 %646 }
 0x736   :  { %v4283_v56 = vadd.f32 %v647_v55, %v639_v54 }
 0x738   :  { %3809 = vtanh.f32 %v4283_v56 }
 0x745   :  { %v3810_v57 = vpop.eup %3809 }
 0x746   :  { %652 = vrot.lane.b32.xlu1 %v3810_v57, %s3917_s19 }
 0x74a   :  { %383 = vrot.lane.b32.xlu1 %v381_v58, %s3919_s21 }
 0x7b8   :  { %v653_v59 = vpop.permute.xlu1 %652 }
 0x7b9   :  { %v655_v60 = vmul.f32 %v3808_v49, %v653_v59  ;;  %v3322_v49 = vld [vmem:[%s4923_s1 + $0x8] sm:$0xff] }
 0x7bb   :  { %669 = vrot.lane.b32.xlu0 %v655_v60, %s3918_s2 }
 0x7bc   :  { %v384_v61 = vpop.permute.xlu1 %383 }
 0x7bd   :  { %v386_v62 = vmul.f32 %v384_v61, %v64_v28 }
 0x7bf   :  { %v4290_v35 = vadd.f32 %v386_v62, %v4202_v48  ;;  %v553_v48 = vpop.f32.mrf.mxu0 }
 0x7c0   :  { %v663_v12 = vadd.f32 %v4241_v51, %v553_v48 }
 0x7c1   :  { %752 = vrot.lane.b32.xlu1 %v4290_v35, %s3917_s19 }
 0x82d   :  { %v670_v63 = vpop.permute.xlu0 %669 }
 0x82e   :  { %3571 = vmatmul.mubr.msk.f32.vlgmr.msra.gmra.mxu0 %vm51_vm0, %v670_v63  ;;  %3582 = vmatmul.mubr.msk.f32.vlgmr.msra.gmra.mxu1 %vm51_vm0, %v670_v63 }
 0x82f   :  { %3585 = vmatpush3.msra.mxu1 %v4019_v3  ;;  %3592 = vmatprep.mubr.msk.f32.mxu1 %vm3916_vm1, %v3915_v1 }
 0x830   :  { %3586 = vmatprep.subr.mxu1 %v3915_v1  ;;  %912 = vmatpush1.msra.mxu0 %v4014_v2 }
 0x831   :  { %3587 = vmatpush3.msra.mxu1 %v4037_v6  ;;  %913 = vmatprep.subr.mxu0 %v4027_v4 }
 0x832   :  { %3588 = vmatprep.subr.mxu1 %v3915_v1  ;;  %914 = vmatpush1.msra.mxu0 %v4032_v5 }
 0x833   :  { %3589 = vmatpush3.msra.mxu1 %v4049_v8  ;;  %915 = vmatprep.subr.mxu0 %v4044_v7  ;;  %v753_v30 = vpop.permute.xlu1 %752 }
 0x834   :  { %3590 = vmatprep.subr.mxu1 %v3915_v1  ;;  %916 = vmatpush1.msra.mxu0 %v4056_v9 }
 0x835   :  { %3591 = vmatpush3.msra.mxu1 %v4068_v11  ;;  %917 = vmatprep.subr.mxu0 %v4061_v10 }
 0x836   :  { %3593 = vmatmul.mubr.msk.f32.vlgmr.msra.gmra.mxu1 %vm51_vm0, %v670_v63  ;;  %918 = vmatpush1.msra.mxu0 %v4081_v14 }
 0x837   :  { %951 = vmatprep.mubr.f32.mxu0 %v3915_v1  ;;  %3606 = vmatprep.subr.mxu1 %v3915_v1 }
 0x838   :  { %3595 = vmatprep.subr.mxu0 %v3915_v1  ;;  %3607 = vmatpush3.msra.mxu1 %v4137_v36 }
 0x839   :  { %3608 = vmatprep.subr.mxu1 %v3915_v1  ;;  %3614 = vmatprep.mubr.msk.f32.mxu1 %vm3916_vm1, %v3915_v1 }
 0x83a   :  { %3609 = vmatpush3.msra.mxu1 %v4147_v38 }
 0x83b   :  { %3610 = vmatprep.subr.mxu1 %v3915_v1 }
 0x83c   :  { %3611 = vmatpush3.msra.mxu1 %v4161_v40 }
 0x83d   :  { %3612 = vmatprep.subr.mxu1 %v3915_v1 }
 0x83e   :  { %3613 = vmatpush3.msra.mxu1 %v4175_v42 }
 0x83f   :  { %3617 = vmatprep.subr.mxu1 %v3915_v1 }
 0x8ee   :  { %v739_v13 = vpop.f32.mrf.mxu0  ;;  %v866_v16 = vpop.f32.mrf.mxu1 }
 0x8ef   :  { %v743_v17 = vadd.f32 %v739_v13, %v663_v12  ;;  %v867_v18 = vadd.f32 %v4246_v52, %v866_v16 }
 0x8f0   :  { %v3572_v19 = vpop.f32.mrf.mxu0  ;;  %v3583_v20 = vpop.f32.mrf.mxu1 }
 0x8f1   :  { %3811 = vtanh.f32 %v743_v17  ;;  %3331 = vst [vmem:[%s4922_s12 + $0x8] sm:$0xff] %v867_v18  ;;  %v3328_v24 = vmul.f32 -1.442695, %v743_v17 }
 0x8f3   :  { %3813 = vpow2.f32 %v3328_v24 }
 0x8f6   :  { %v1029_v21 = vpop.f32.mrf.mxu1 }
 0x8f8   :  { %v3594_v22 = vpop.f32.mrf.mxu1 }
 0x8fe   :  { %v3812_v23 = vpop.eup %3811 }
 0x8ff   :  { %757 = vrot.lane.b32.xlu0 %v3812_v23, %s3917_s19 }
 0x900   :  { %v3814_v25 = vpop.eup %3813 }
 0x901   :  { %v747_v26 = vadd.f32 1.0, %v3814_v25 }
 0x903   :  { %3815 = vrcp.f32 %v747_v26 }
 0x910   :  { %v3816_v27 = vpop.eup %3815 }
 0x911   :  { %v755_v15 = vmul.f32 %v3816_v27, %v753_v30 }
 0x971   :  { %v758_v28 = vpop.permute.xlu0 %757 }
 0x972   :  { %v760_v29 = vmul.f32 %v3816_v27, %v758_v28 }
 0x974   :  { %762 = vrot.lane.b32.xlu0 %v760_v29, %s3917_s19 }
 0x978   :  { %772 = vrot.lane.b32.xlu0 %v4263_v31, %s3918_s2 }
 0x9e6   :  { %v763_v32 = vpop.permute.xlu0 %762 }
 0x9e7   :  { %v765_v33 = vadd.f32 %v763_v32, %v755_v15 }
 0x9e9   :  { %3817 = vtanh.f32 %v765_v33  ;;  %v782_v18 = vsub.f32 %v765_v33, %v753_v30 }
 0x9ea   :  { %v773_v46 = vpop.permute.xlu0 %772 }
 0x9f6   :  { %v3818_v34 = vpop.eup %3817 }
 0x9f7   :  { %768 = vrot.lane.b32.xlu1 %v3818_v34, %s3917_s19 }
 0xa69   :  { %v769_v44 = vpop.permute.xlu1 %768 }
 0xa6a   :  { %v771_v45 = vmul.f32 %v3816_v27, %v769_v44 }
 0xa6c   :  { %v775_v47 = vsub.f32 %v771_v45, %v773_v46 }
 0xa6e   :  { %777 = vrot.lane.b32.xlu1 %v775_v47, %s3918_s2  ;;  %v3333_v47 = vld [vmem:[%s4923_s1 + $0x10] sm:$0xff] }
 0xae0   :  { %v778_v50 = vpop.permute.xlu1 %777 }
 0xae1   :  { %v780_v53 = vmul.f32 %v3322_v49, %v778_v50 }
 0xae3   :  { %v4341_v54 = vadd.f32 %v780_v53, %v4263_v31  ;;  %v3332_v31 = vld [vmem:[%s4915_s0 + $0x10] sm:$0xff] }
 0xae5   :  { %3334 = vmatmul.mubr.msk.f32.vlgmr.msra.gmra.mxu0 %vm51_vm0, %v4341_v54 }
 0xae6   :  { %3596 = vmatpush3.msra.mxu0 %v4142_v37  ;;  %3603 = vmatprep.mubr.msk.f32.mxu0 %vm3916_vm1, %v3915_v1 }
 0xae7   :  { %3597 = vmatprep.subr.mxu0 %v3915_v1 }
 0xae8   :  { %3598 = vmatpush3.msra.mxu0 %v4154_v39 }
 0xae9   :  { %3599 = vmatprep.subr.mxu0 %v3915_v1 }
 0xaea   :  { %3600 = vmatpush3.msra.mxu0 %v4166_v41 }
 0xaeb   :  { %3601 = vmatprep.subr.mxu0 %v3915_v1 }
 0xaec   :  { %3602 = vmatpush3.msra.mxu0 %v4180_v43 }
 0xaed   :  { %1313 = vmatprep.subr.mxu0 %v4008_v0 }
 0xba5   :  { %v953_v55 = vpop.f32.mrf.mxu0 }
 0xba6   :  { %v958_v57 = vadd.f32 %v3332_v31, %v953_v55 }
 0xba8   :  { %v1033_v58 = vadd.f32 %v1029_v21, %v958_v57 }
 0xbaa   :  { %3819 = vtanh.f32 %v1033_v58  ;;  %v3336_v60 = vmul.f32 -1.442695, %v1033_v58 }
 0xbac   :  { %3821 = vpow2.f32 %v3336_v60 }
 0xbb7   :  { %v3820_v59 = vpop.eup %3819 }
 0xbb8   :  { %1043 = vrot.lane.b32.xlu0 %v3820_v59, %s3917_s19 }
 0xbb9   :  { %v3822_v61 = vpop.eup %3821 }
 0xbba   :  { %v1037_v62 = vadd.f32 1.0, %v3822_v61 }
 0xbbc   :  { %3823 = vrcp.f32 %v1037_v62 }
 0xbc9   :  { %v3824_v63 = vpop.eup %3823 }
 0xbca   :  { %v1041_v0 = vmul.f32 %v3824_v63, %v4283_v56 }
 0xc2a   :  { %v1044_v48 = vpop.permute.xlu0 %1043 }
 0xc2b   :  { %v1046_v12 = vmul.f32 %v3824_v63, %v1044_v48 }
 0xc2d   :  { %1048 = vrot.lane.b32.xlu1 %v1046_v12, %s3917_s19 }
 0xc9f   :  { %v1049_v13 = vpop.permute.xlu1 %1048 }
 0xca0   :  { %v4361_v16 = vadd.f32 %v1049_v13, %v1041_v0 }
 0xca2   :  { %3825 = vtanh.f32 %v4361_v16 }
 0xcaf   :  { %v3826_v17 = vpop.eup %3825 }
 0xcb0   :  { %1054 = vrot.lane.b32.xlu0 %v3826_v17, %s3917_s19 }
 0xcb4   :  { %784 = vrot.lane.b32.xlu0 %v782_v18, %s3919_s21 }
 0xd22   :  { %v1055_v19 = vpop.permute.xlu0 %1054 }
 0xd23   :  { %v1057_v20 = vmul.f32 %v3824_v63, %v1055_v19 }
 0xd25   :  { %1071 = vrot.lane.b32.xlu1 %v1057_v20, %s3918_s2 }
 0xd26   :  { %v785_v21 = vpop.permute.xlu0 %784 }
 0xd27   :  { %v787_v22 = vmul.f32 %v3322_v49, %v785_v21 }
 0xd29   :  { %v4368_v23 = vadd.f32 %v787_v22, %v4290_v35 }
 0xd2b   :  { %1154 = vrot.lane.b32.xlu0 %v4368_v23, %s3917_s19 }
 0xd97   :  { %v1072_v56 = vpop.permute.xlu1 %1071 }
 0xd98   :  { %3604 = vmatmul.mubr.msk.f32.vlgmr.msra.gmra.mxu0 %vm51_vm0, %v1072_v56  ;;  %3615 = vmatmul.mubr.msk.f32.vlgmr.msra.gmra.mxu1 %vm51_vm0, %v1072_v56 }
 0xd99   :  { %3618 = vmatpush3.msra.mxu1 %v4019_v3  ;;  %3625 = vmatprep.mubr.msk.f32.mxu1 %vm3916_vm1, %v3915_v1 }
 0xd9a   :  { %3619 = vmatprep.subr.mxu1 %v3915_v1  ;;  %1314 = vmatpush1.msra.mxu0 %v4014_v2  ;;  %v955_v2 = vpop.f32.mrf.mxu0 }
 0xd9b   :  { %3620 = vmatpush3.msra.mxu1 %v4037_v6  ;;  %1315 = vmatprep.subr.mxu0 %v4027_v4  ;;  %v1065_v4 = vadd.f32 %v4241_v51, %v955_v2 }
 0xd9c   :  { %3621 = vmatprep.subr.mxu1 %v3915_v1  ;;  %1316 = vmatpush1.msra.mxu0 %v4032_v5 }
 0xd9d   :  { %3622 = vmatpush3.msra.mxu1 %v4049_v8  ;;  %1317 = vmatprep.subr.mxu0 %v4044_v7  ;;  %v1155_v29 = vpop.permute.xlu0 %1154 }
 0xd9e   :  { %3623 = vmatprep.subr.mxu1 %v3915_v1  ;;  %1318 = vmatpush1.msra.mxu0 %v4056_v9 }
 0xd9f   :  { %3624 = vmatpush3.msra.mxu1 %v4068_v11  ;;  %1319 = vmatprep.subr.mxu0 %v4061_v10 }
 0xda0   :  { %3626 = vmatmul.mubr.msk.f32.vlgmr.msra.gmra.mxu1 %vm51_vm0, %v1072_v56  ;;  %1320 = vmatpush1.msra.mxu0 %v4081_v14 }
 0xda1   :  { %1353 = vmatprep.mubr.f32.mxu0 %v3915_v1  ;;  %3639 = vmatprep.subr.mxu1 %v3915_v1 }
 0xda2   :  { %3628 = vmatprep.subr.mxu0 %v3915_v1  ;;  %3640 = vmatpush3.msra.mxu1 %v4137_v36 }
 0xda3   :  { %3641 = vmatprep.subr.mxu1 %v3915_v1  ;;  %3647 = vmatprep.mubr.msk.f32.mxu1 %vm3916_vm1, %v3915_v1 }
 0xda4   :  { %3642 = vmatpush3.msra.mxu1 %v4147_v38 }
 0xda5   :  { %3643 = vmatprep.subr.mxu1 %v3915_v1 }
 0xda6   :  { %3644 = vmatpush3.msra.mxu1 %v4161_v40 }
 0xda7   :  { %3645 = vmatprep.subr.mxu1 %v3915_v1 }
 0xda8   :  { %3646 = vmatpush3.msra.mxu1 %v4175_v42 }
 0xda9   :  { %3650 = vmatprep.subr.mxu1 %v3915_v1 }
 0xe58   :  { %v1141_v5 = vpop.f32.mrf.mxu0  ;;  %v1268_v7 = vpop.f32.mrf.mxu1 }
 0xe59   :  { %v1145_v9 = vadd.f32 %v1141_v5, %v1065_v4  ;;  %v1269_v10 = vadd.f32 %v4246_v52, %v1268_v7 }
 0xe5a   :  { %v3605_v14 = vpop.f32.mrf.mxu0  ;;  %v3616_v36 = vpop.f32.mrf.mxu1 }
 0xe5b   :  { %3827 = vtanh.f32 %v1145_v9  ;;  %3342 = vst [vmem:[%s4922_s12 + $0x10] sm:$0xff] %v1269_v10  ;;  %v3339_v35 = vmul.f32 -1.442695, %v1145_v9 }
 0xe5d   :  { %3829 = vpow2.f32 %v3339_v35  ;;  %v4483_v35 = vld [vmem:[%s4926_s23 + $0x38] sm:$0xff] }
 0xe60   :  { %v1431_v38 = vpop.f32.mrf.mxu1 }
 0xe62   :  { %v3627_v40 = vpop.f32.mrf.mxu1 }
 0xe68   :  { %v3828_v42 = vpop.eup %3827 }
 0xe69   :  { %1159 = vrot.lane.b32.xlu1 %v3828_v42, %s3917_s19 }
 0xe6a   :  { %v3830_v24 = vpop.eup %3829 }
 0xe6b   :  { %v1149_v25 = vadd.f32 1.0, %v3830_v24  ;;  %v4488_v24 = vld [vmem:[%s4926_s23 + $0x30] sm:$0xff] }
 0xe6d   :  { %3831 = vrcp.f32 %v1149_v25  ;;  %v4493_v25 = vld [vmem:[%s4926_s23 + $0x28] sm:$0xff] }
 0xe7a   :  { %v3832_v26 = vpop.eup %3831 }
 0xe7b   :  { %v1157_v30 = vmul.f32 %v3832_v26, %v1155_v29 }
 0xedb   :  { %v1160_v27 = vpop.permute.xlu1 %1159 }
 0xedc   :  { %v1162_v28 = vmul.f32 %v3832_v26, %v1160_v27 }
 0xede   :  { %1164 = vrot.lane.b32.xlu1 %v1162_v28, %s3917_s19  ;;  %v4508_v28 = vld [vmem:[%s4926_s23 + $0x18] sm:$0xff] }
 0xee2   :  { %1174 = vrot.lane.b32.xlu1 %v4341_v54, %s3918_s2 }
 0xf50   :  { %v1165_v15 = vpop.permute.xlu1 %1164 }
 0xf51   :  { %v1167_v32 = vadd.f32 %v1165_v15, %v1157_v30  ;;  %v4520_v30 = vld [vmem:[%s4926_s23 + $0x8] sm:$0xff]  ;;  %v4525_v15 = vld [vmem:[%s4926_s23] sm:$0xff] }
 0xf53   :  { %3833 = vtanh.f32 %v1167_v32  ;;  %v1184_v12 = vsub.f32 %v1167_v32, %v1155_v29  ;;  %v4514_v29 = vld [vmem:[%s4926_s23 + $0x10] sm:$0xff] }
 0xf54   :  { %v1175_v45 = vpop.permute.xlu1 %1174 }
 0xf60   :  { %v3834_v33 = vpop.eup %3833 }
 0xf61   :  { %1170 = vrot.lane.b32.xlu0 %v3834_v33, %s3917_s19 }
 0xfd3   :  { %v1171_v34 = vpop.permute.xlu0 %1170 }
 0xfd4   :  { %v1173_v44 = vmul.f32 %v3832_v26, %v1171_v34  ;;  %v4499_v26 = vld [vmem:[%s4926_s23 + $0x20] sm:$0xff] }
 0xfd6   :  { %v1177_v46 = vsub.f32 %v1173_v44, %v1175_v45  ;;  %v3344_v45 = vld [vmem:[%s4923_s1 + $0x18] sm:$0xff] }
 0xfd8   :  { %1179 = vrot.lane.b32.xlu0 %v1177_v46, %s3918_s2 }
0x104a   :  { %v1180_v49 = vpop.permute.xlu0 %1179 }
0x104b   :  { %v1182_v50 = vmul.f32 %v3333_v47, %v1180_v49 }
0x104d   :  { %v4419_v53 = vadd.f32 %v1182_v50, %v4341_v54  ;;  %v3343_v54 = vld [vmem:[%s4915_s0 + $0x18] sm:$0xff]  ;;  %v3354_v50 = vld [vmem:[%s4915_s0 + $0x20] sm:$0xff] }
0x104f   :  { %3345 = vmatmul.mubr.msk.f32.vlgmr.msra.gmra.mxu0 %vm51_vm0, %v4419_v53 }
0x1050   :  { %3629 = vmatpush3.msra.mxu0 %v4142_v37  ;;  %3636 = vmatprep.mubr.msk.f32.mxu0 %vm3916_vm1, %v3915_v1 }
0x1051   :  { %3630 = vmatprep.subr.mxu0 %v3915_v1 }
0x1052   :  { %3631 = vmatpush3.msra.mxu0 %v4154_v39 }
0x1053   :  { %3632 = vmatprep.subr.mxu0 %v3915_v1 }
0x1054   :  { %3633 = vmatpush3.msra.mxu0 %v4166_v41 }
0x1055   :  { %3634 = vmatprep.subr.mxu0 %v3915_v1 }
0x1056   :  { %3635 = vmatpush3.msra.mxu0 %v4180_v43 }
0x1057   :  { %1715 = vmatprep.subr.mxu0 %v4483_v35 }
0x110f   :  { %v1355_v37 = vpop.f32.mrf.mxu0 }
0x1110   :  { %v1360_v31 = vadd.f32 %v3343_v54, %v1355_v37 }
0x1112   :  { %v1435_v55 = vadd.f32 %v1431_v38, %v1360_v31 }
0x1114   :  { %3835 = vtanh.f32 %v1435_v55  ;;  %v3347_v39 = vmul.f32 -1.442695, %v1435_v55 }
0x1116   :  { %3837 = vpow2.f32 %v3347_v39 }
0x1121   :  { %v3836_v57 = vpop.eup %3835 }
0x1122   :  { %1445 = vrot.lane.b32.xlu1 %v3836_v57, %s3917_s19 }
0x1123   :  { %v3838_v58 = vpop.eup %3837 }
0x1124   :  { %v1439_v59 = vadd.f32 1.0, %v3838_v58 }
0x1126   :  { %3839 = vrcp.f32 %v1439_v59 }
0x1133   :  { %v3840_v41 = vpop.eup %3839 }
0x1134   :  { %v1443_v43 = vmul.f32 %v3840_v41, %v4361_v16 }
0x1194   :  { %v1446_v60 = vpop.permute.xlu1 %1445 }
0x1195   :  { %v1448_v61 = vmul.f32 %v3840_v41, %v1446_v60 }
0x1197   :  { %1450 = vrot.lane.b32.xlu0 %v1448_v61, %s3917_s19 }
0x1209   :  { %v1451_v62 = vpop.permute.xlu0 %1450 }
0x120a   :  { %v4438_v63 = vadd.f32 %v1451_v62, %v1443_v43  ;;  %v4553_v62 = vld [vmem:[%s4916_s10 + $0x18] sm:$0xff] }
0x120c   :  { %3841 = vtanh.f32 %v4438_v63 }
0x1219   :  { %v3842_v48 = vpop.eup %3841 }
0x121a   :  { %1456 = vrot.lane.b32.xlu1 %v3842_v48, %s3917_s19  ;;  %v4558_v48 = vld [vmem:[%s4917_s8 + $0x18] sm:$0xff] }
0x121e   :  { %1186 = vrot.lane.b32.xlu1 %v1184_v12, %s3919_s21  ;;  %v4563_v12 = vld [vmem:[%s4916_s10 + $0x10] sm:$0xff] }
0x128c   :  { %v1457_v0 = vpop.permute.xlu1 %1456 }
0x128d   :  { %v1459_v13 = vmul.f32 %v3840_v41, %v1457_v0  ;;  %v4577_v0 = vld [vmem:[%s4916_s10 + $0x8] sm:$0xff] }
0x128f   :  { %1473 = vrot.lane.b32.xlu0 %v1459_v13, %s3918_s2  ;;  %v4584_v13 = vld [vmem:[%s4917_s8 + $0x8] sm:$0xff] }
0x1290   :  { %v1187_v17 = vpop.permute.xlu1 %1186 }
0x1291   :  { %v1189_v18 = vmul.f32 %v3333_v47, %v1187_v17 }
0x1293   :  { %v4445_v19 = vadd.f32 %v1189_v18, %v4368_v23  ;;  %v4591_v18 = vld [vmem:[%s4916_s10] sm:$0xff] }
0x1295   :  { %1556 = vrot.lane.b32.xlu1 %v4445_v19, %s3917_s19 }
0x1301   :  { %v1474_v16 = vpop.permute.xlu0 %1473 }
0x1302   :  { %3637 = vmatmul.mubr.msk.f32.vlgmr.msra.gmra.mxu0 %vm51_vm0, %v1474_v16  ;;  %3648 = vmatmul.mubr.msk.f32.vlgmr.msra.gmra.mxu1 %vm51_vm0, %v1474_v16 }
0x1303   :  { %3651 = vmatpush3.msra.mxu1 %v4019_v3  ;;  %3658 = vmatprep.mubr.msk.f32.mxu1 %vm3916_vm1, %v3915_v1  ;;  %v1357_v3 = vpop.f32.mrf.mxu0 }
0x1304   :  { %3652 = vmatprep.subr.mxu1 %v3915_v1  ;;  %1755 = vmatprep.mubr.f32.mxu0 %v3915_v1  ;;  %v1467_v20 = vadd.f32 %v4241_v51, %v1357_v3 }
0x1305   :  { %3653 = vmatpush3.msra.mxu1 %v4037_v6  ;;  %1716 = vmatpush1.msra.mxu0 %v4488_v24 }
0x1306   :  { %3654 = vmatprep.subr.mxu1 %v3915_v1  ;;  %1717 = vmatprep.subr.mxu0 %v4493_v25 }
0x1307   :  { %3655 = vmatpush3.msra.mxu1 %v4049_v8  ;;  %v4474_v36 = vpop.permute.xlu1 %1556  ;;  %1718 = vmatpush1.msra.mxu0 %v4499_v26 }
0x1308   :  { %3656 = vmatprep.subr.mxu1 %v3915_v1  ;;  %1719 = vmatprep.subr.mxu0 %v4508_v28 }
0x1309   :  { %3657 = vmatpush3.msra.mxu1 %v4068_v11  ;;  %1720 = vmatpush1.msra.mxu0 %v4514_v29 }
0x130a   :  { %3659 = vmatmul.mubr.msk.f32.vlgmr.msra.gmra.mxu1 %vm51_vm0, %v1474_v16  ;;  %3672 = vmatprep.subr.mxu1 %v3915_v1  ;;  %v4598_v16 = vld [vmem:[%s4917_s8] sm:$0xff] }
0x130b   :  { %3680 = vmatprep.mubr.msk.f32.mxu1 %vm3916_vm1, %v3915_v1  ;;  %1721 = vmatprep.subr.mxu0 %v4520_v30 }
0x130c   :  { %1722 = vmatpush1.msra.mxu0 %v4525_v15  ;;  %3673 = vmatpush3.msra.mxu1 %v4553_v62 }
0x130d   :  { %3661 = vmatprep.subr.mxu0 %v3915_v1  ;;  %3674 = vmatprep.subr.mxu1 %v3915_v1 }
0x130e   :  { %3675 = vmatpush3.msra.mxu1 %v4563_v12 }
0x130f   :  { %3676 = vmatprep.subr.mxu1 %v3915_v1 }
0x1310   :  { %3677 = vmatpush3.msra.mxu1 %v4577_v0 }
0x1311   :  { %3678 = vmatprep.subr.mxu1 %v3915_v1 }
0x1312   :  { %3679 = vmatpush3.msra.mxu1 %v4591_v18 }
0x1313   :  { %3683 = vmatprep.subr.mxu1 %v3915_v1 }
0x13c2   :  { %v1543_v21 = vpop.f32.mrf.mxu0  ;;  %v1670_v6 = vpop.f32.mrf.mxu1 }
0x13c3   :  { %v1547_v22 = vadd.f32 %v1543_v21, %v1467_v20  ;;  %v1671_v23 = vadd.f32 %v4246_v52, %v1670_v6 }
0x13c4   :  { %v3638_v8 = vpop.f32.mrf.mxu0  ;;  %v3649_v56 = vpop.f32.mrf.mxu1 }
0x13c5   :  { %3843 = vtanh.f32 %v1547_v22  ;;  %3353 = vst [vmem:[%s4922_s12 + $0x18] sm:$0xff] %v1671_v23  ;;  %v3350_v5 = vmul.f32 -1.442695, %v1547_v22  ;;  %v4619_v8 = vld [vmem:[%s4908_s7 + $0x18] sm:$0xff] }
0x13c7   :  { %3845 = vpow2.f32 %v3350_v5  ;;  %v4671_v5 = vld [vmem:[%s4920_s9] ss:$0 sm:$0xff] }
0x13ca   :  { %v1833_v11 = vpop.f32.mrf.mxu1 }
0x13cc   :  { %v3660_v2 = vpop.f32.mrf.mxu1 }
0x13cd   :  { %v4644_v2 = vld [vmem:[%s4908_s7] sm:$0xff] }
0x13d2   :  { %v3844_v4 = vpop.eup %3843 }
0x13d3   :  { %1561 = vrot.lane.b32.xlu0 %v3844_v4, %s3917_s19 }
0x13d4   :  { %v3846_v51 = vpop.eup %3845 }
0x13d5   :  { %v1551_v7 = vadd.f32 1.0, %v3846_v51 }
0x13d7   :  { %3847 = vrcp.f32 %v1551_v7 }
0x13e4   :  { %v3848_v9 = vpop.eup %3847 }
0x13e5   :  { %v1559_v38 = vmul.f32 %v3848_v9, %v4474_v36 }
0x1445   :  { %v1562_v10 = vpop.permute.xlu0 %1561 }
0x1446   :  { %v1564_v14 = vmul.f32 %v3848_v9, %v1562_v10 }
0x1448   :  { %1566 = vrot.lane.b32.xlu0 %v1564_v14, %s3917_s19 }
0x144c   :  { %1576 = vrot.lane.b32.xlu0 %v4419_v53, %s3918_s2 }
0x14ba   :  { %v1567_v40 = vpop.permute.xlu0 %1566 }
0x14bb   :  { %v4477_v42 = vadd.f32 %v1567_v40, %v1559_v38 }
0x14bd   :  { %3849 = vtanh.f32 %v4477_v42  ;;  %v1586_v3 = vsub.f32 %v4477_v42, %v4474_v36 }
0x14be   :  { %v1577_v34 = vpop.permute.xlu0 %1576 }
0x14ca   :  { %v3850_v27 = vpop.eup %3849 }
0x14cb   :  { %1572 = vrot.lane.b32.xlu1 %v3850_v27, %s3917_s19 }
0x153d   :  { %v1573_v32 = vpop.permute.xlu1 %1572 }
0x153e   :  { %v1575_v33 = vmul.f32 %v3848_v9, %v1573_v32 }
0x1540   :  { %v1579_v44 = vsub.f32 %v1575_v33, %v1577_v34 }
0x1542   :  { %1581 = vrot.lane.b32.xlu1 %v1579_v44, %s3918_s2 }
0x15b4   :  { %v1582_v46 = vpop.permute.xlu1 %1581 }
0x15b5   :  { %v1584_v47 = vmul.f32 %v3344_v45, %v1582_v46 }
0x15b7   :  { %v4535_v49 = vadd.f32 %v1584_v47, %v4419_v53 }
0x15b9   :  { %3356 = vmatmul.mubr.msk.f32.vlgmr.msra.gmra.mxu0 %vm51_vm0, %v4535_v49 }
0x15ba   :  { %3669 = vmatprep.mubr.msk.f32.mxu0 %vm3916_vm1, %v3915_v1  ;;  %3662 = vmatpush3.msra.mxu0 %v4558_v48 }
0x15bb   :  { %3663 = vmatprep.subr.mxu0 %v3915_v1 }
0x1679   :  { %v1757_v54 = vpop.f32.mrf.mxu0 }
0x167a   :  { %v1762_v37 = vadd.f32 %v3354_v50, %v1757_v54 }
0x167b   :  { %v1759_v4 = vpop.f32.mrf.mxu0 }
0x167c   :  { %v1837_v31 = vadd.f32 %v1833_v11, %v1762_v37  ;;  %v4626_v11 = vld [vmem:[%s4908_s7 + $0x10] sm:$0xff]  ;;  %v1869_v51 = vadd.f32 %v4671_v5, %v1759_v4 }
0x167e   :  { %3851 = vtanh.f32 %v1837_v31  ;;  %v3358_v57 = vmul.f32 -1.442695, %v1837_v31 }
0x1680   :  { %3853 = vpow2.f32 %v3358_v57 }
0x168b   :  { %v3852_v55 = vpop.eup %3851 }
0x168c   :  { %1847 = vrot.lane.b32.xlu0 %v3852_v55, %s3917_s19 }
0x168d   :  { %v3854_v53 = vpop.eup %3853 }
0x168e   :  { %v1841_v39 = vadd.f32 1.0, %v3854_v53 }
0x1690   :  { %3855 = vrcp.f32 %v1841_v39  ;;  %v3355_v39 = vld [vmem:[%s4923_s1 + $0x20] sm:$0xff] }
0x169d   :  { %v3856_v58 = vpop.eup %3855 }
0x169e   :  { %v1845_v60 = vmul.f32 %v3856_v58, %v4438_v63  ;;  %v4570_v63 = vld [vmem:[%s4917_s8 + $0x10] sm:$0xff] }
0x169f   :  { %3664 = vmatpush3.msra.mxu0 %v4570_v63 }
0x16a0   :  { %3665 = vmatprep.subr.mxu0 %v3915_v1 }
0x16a1   :  { %3666 = vmatpush3.msra.mxu0 %v4584_v13 }
0x16a2   :  { %3667 = vmatprep.subr.mxu0 %v3915_v1 }
0x16a3   :  { %3668 = vmatpush3.msra.mxu0 %v4598_v16 }
0x16a4   :  { %2117 = vmatprep.subr.mxu0 %v4483_v35 }
0x16fe   :  { %v1848_v59 = vpop.permute.xlu0 %1847 }
0x16ff   :  { %v1850_v41 = vmul.f32 %v3856_v58, %v1848_v59 }
0x1701   :  { %1852 = vrot.lane.b32.xlu1 %v1850_v41, %s3917_s19 }
0x1773   :  { %v1853_v61 = vpop.permute.xlu1 %1852 }
0x1774   :  { %v4547_v43 = vadd.f32 %v1853_v61, %v1845_v60 }
0x1776   :  { %3857 = vtanh.f32 %v4547_v43 }
0x1783   :  { %v3858_v17 = vpop.eup %3857 }
0x1784   :  { %1858 = vrot.lane.b32.xlu0 %v3858_v17, %s3917_s19 }
0x1788   :  { %1588 = vrot.lane.b32.xlu0 %v1586_v3, %s3919_s21 }
0x17f6   :  { %v1859_v20 = vpop.permute.xlu0 %1858 }
0x17f7   :  { %v1861_v21 = vmul.f32 %v3856_v58, %v1859_v20 }
0x17f9   :  { %1875 = vrot.lane.b32.xlu1 %v1861_v21, %s3918_s2 }
0x17fa   :  { %v1589_v6 = vpop.permute.xlu0 %1588 }
0x17fb   :  { %v1591_v22 = vmul.f32 %v3344_v45, %v1589_v6 }
0x17fd   :  { %v4612_v23 = vadd.f32 %v1591_v22, %v4445_v19  ;;  %v4635_v19 = vld [vmem:[%s4908_s7 + $0x8] sm:$0xff] }
0x17ff   :  { %1958 = vrot.lane.b32.xlu0 %v4612_v23, %s3917_s19 }
0x186b   :  { %v1876_v56 = vpop.permute.xlu1 %1875 }
0x186c   :  { %3670 = vmatmul.mubr.msk.f32.vlgmr.msra.gmra.mxu0 %vm51_vm0, %v1876_v56  ;;  %3681 = vmatmul.mubr.msk.f32.vlgmr.msra.gmra.mxu1 %vm51_vm0, %v1876_v56 }
0x186d   :  { %3684 = vmatpush3.msra.mxu1 %v4619_v8  ;;  %3691 = vmatprep.mubr.msk.f32.mxu1 %vm3916_vm1, %v3915_v1 }
0x186e   :  { %3685 = vmatprep.subr.mxu1 %v3915_v1  ;;  %2118 = vmatpush1.msra.mxu0 %v4488_v24 }
0x186f   :  { %3686 = vmatpush3.msra.mxu1 %v4626_v11  ;;  %2119 = vmatprep.subr.mxu0 %v4493_v25 }
0x1870   :  { %3687 = vmatprep.subr.mxu1 %v3915_v1  ;;  %2120 = vmatpush1.msra.mxu0 %v4499_v26 }
0x1871   :  { %3688 = vmatpush3.msra.mxu1 %v4635_v19  ;;  %2121 = vmatprep.subr.mxu0 %v4508_v28  ;;  %v1959_v46 = vpop.permute.xlu0 %1958 }
0x1872   :  { %3689 = vmatprep.subr.mxu1 %v3915_v1  ;;  %2122 = vmatpush1.msra.mxu0 %v4514_v29 }
0x1873   :  { %3690 = vmatpush3.msra.mxu1 %v4644_v2  ;;  %2123 = vmatprep.subr.mxu0 %v4520_v30 }
0x1874   :  { %3692 = vmatmul.mubr.msk.f32.vlgmr.msra.gmra.mxu1 %vm51_vm0, %v1876_v56  ;;  %2124 = vmatpush1.msra.mxu0 %v4525_v15 }
0x1875   :  { %2157 = vmatprep.mubr.f32.mxu0 %v3915_v1  ;;  %3705 = vmatprep.subr.mxu1 %v3915_v1 }
0x1876   :  { %3694 = vmatprep.subr.mxu0 %v3915_v1  ;;  %3706 = vmatpush3.msra.mxu1 %v4553_v62 }
0x1877   :  { %3707 = vmatprep.subr.mxu1 %v3915_v1  ;;  %3713 = vmatprep.mubr.msk.f32.mxu1 %vm3916_vm1, %v3915_v1 }
0x1878   :  { %3708 = vmatpush3.msra.mxu1 %v4563_v12 }
0x1879   :  { %3709 = vmatprep.subr.mxu1 %v3915_v1 }
0x187a   :  { %3710 = vmatpush3.msra.mxu1 %v4577_v0 }
0x187b   :  { %3711 = vmatprep.subr.mxu1 %v3915_v1 }
0x187c   :  { %3712 = vmatpush3.msra.mxu1 %v4591_v18 }
0x187d   :  { %3716 = vmatprep.subr.mxu1 %v3915_v1 }
0x192c   :  { %v1945_v7 = vpop.f32.mrf.mxu0  ;;  %v2072_v9 = vpop.f32.mrf.mxu1 }
0x192d   :  { %v1949_v10 = vadd.f32 %v1945_v7, %v1869_v51  ;;  %v2073_v14 = vadd.f32 %v4246_v52, %v2072_v9 }
0x192e   :  { %v3671_v36 = vpop.f32.mrf.mxu0  ;;  %v3682_v38 = vpop.f32.mrf.mxu1 }
0x192f   :  { %3859 = vtanh.f32 %v1949_v10  ;;  %3364 = vst [vmem:[%s4922_s12 + $0x20] sm:$0xff] %v2073_v14  ;;  %v3361_v32 = vmul.f32 -1.442695, %v1949_v10 }
0x1931   :  { %3861 = vpow2.f32 %v3361_v32  ;;  %v4754_v32 = vld [vmem:[%s4921_s11] ss:$0 sm:$0xff] }
0x1934   :  { %v2235_v40 = vpop.f32.mrf.mxu1 }
0x1936   :  { %v3693_v42 = vpop.f32.mrf.mxu1 }
0x193c   :  { %v3860_v27 = vpop.eup %3859 }
0x193d   :  { %1963 = vrot.lane.b32.xlu1 %v3860_v27, %s3917_s19 }
0x193e   :  { %v3862_v33 = vpop.eup %3861 }
0x193f   :  { %v1953_v34 = vadd.f32 1.0, %v3862_v33 }
0x1941   :  { %3863 = vrcp.f32 %v1953_v34 }
0x194e   :  { %v3864_v44 = vpop.eup %3863 }
0x194f   :  { %v1961_v47 = vmul.f32 %v3864_v44, %v1959_v46 }
0x19af   :  { %v1964_v45 = vpop.permute.xlu1 %1963 }
0x19b0   :  { %v1966_v52 = vmul.f32 %v3864_v44, %v1964_v45 }
0x19b2   :  { %1968 = vrot.lane.b32.xlu1 %v1966_v52, %s3917_s19 }
0x19b6   :  { %1978 = vrot.lane.b32.xlu1 %v4535_v49, %s3918_s2 }
0x1a24   :  { %v1969_v50 = vpop.permute.xlu1 %1968 }
0x1a25   :  { %v1971_v54 = vadd.f32 %v1969_v50, %v1961_v47 }
0x1a27   :  { %3865 = vtanh.f32 %v1971_v54  ;;  %v1988_v14 = vsub.f32 %v1971_v54, %v1959_v46 }
0x1a28   :  { %v1979_v57 = vpop.permute.xlu1 %1978 }
0x1a34   :  { %v3866_v37 = vpop.eup %3865 }
0x1a35   :  { %1974 = vrot.lane.b32.xlu0 %v3866_v37, %s3917_s19 }
0x1aa7   :  { %v1975_v31 = vpop.permute.xlu0 %1974 }
0x1aa8   :  { %v1977_v55 = vmul.f32 %v3864_v44, %v1975_v31 }
0x1aaa   :  { %v1981_v53 = vsub.f32 %v1977_v55, %v1979_v57 }
0x1aac   :  { %1983 = vrot.lane.b32.xlu0 %v1981_v53, %s3918_s2 }
0x1b1e   :  { %v1984_v58 = vpop.permute.xlu0 %1983 }
0x1b1f   :  { %v1986_v59 = vmul.f32 %v3355_v39, %v1984_v58 }
0x1b21   :  { %v4688_v41 = vadd.f32 %v1986_v59, %v4535_v49  ;;  %v3365_v49 = vld [vmem:[%s4915_s0 + $0x28] sm:$0xff] }
0x1b23   :  { %3367 = vmatmul.mubr.msk.f32.vlgmr.msra.gmra.mxu0 %vm51_vm0, %v4688_v41 }
0x1b24   :  { %3695 = vmatpush3.msra.mxu0 %v4558_v48  ;;  %3702 = vmatprep.mubr.msk.f32.mxu0 %vm3916_vm1, %v3915_v1 }
0x1b25   :  { %3696 = vmatprep.subr.mxu0 %v3915_v1 }
0x1b26   :  { %3697 = vmatpush3.msra.mxu0 %v4570_v63 }
0x1b27   :  { %3698 = vmatprep.subr.mxu0 %v3915_v1 }
0x1b28   :  { %3699 = vmatpush3.msra.mxu0 %v4584_v13 }
0x1b29   :  { %3700 = vmatprep.subr.mxu0 %v3915_v1 }
0x1b2a   :  { %3701 = vmatpush3.msra.mxu0 %v4598_v16 }
0x1b2b   :  { %2519 = vmatprep.subr.mxu0 %v4483_v35 }
0x1be3   :  { %v2159_v60 = vpop.f32.mrf.mxu0 }
0x1be4   :  { %v2164_v61 = vadd.f32 %v3365_v49, %v2159_v60 }
0x1be6   :  { %v2239_v17 = vadd.f32 %v2235_v40, %v2164_v61 }
0x1be8   :  { %3867 = vtanh.f32 %v2239_v17  ;;  %v3369_v20 = vmul.f32 -1.442695, %v2239_v17 }
0x1bea   :  { %3869 = vpow2.f32 %v3369_v20 }
0x1bf5   :  { %v3868_v3 = vpop.eup %3867 }
0x1bf6   :  { %2249 = vrot.lane.b32.xlu1 %v3868_v3, %s3917_s19 }
0x1bf7   :  { %v3870_v21 = vpop.eup %3869 }
0x1bf8   :  { %v2243_v6 = vadd.f32 1.0, %v3870_v21 }
0x1bfa   :  { %3871 = vrcp.f32 %v2243_v6 }
0x1c07   :  { %v3872_v22 = vpop.eup %3871 }
0x1c08   :  { %v2247_v51 = vmul.f32 %v3872_v22, %v4547_v43 }
0x1c68   :  { %v2250_v56 = vpop.permute.xlu1 %2249 }
0x1c69   :  { %v2252_v4 = vmul.f32 %v3872_v22, %v2250_v56 }
0x1c6b   :  { %2254 = vrot.lane.b32.xlu0 %v2252_v4, %s3917_s19 }
0x1cdd   :  { %v2255_v7 = vpop.permute.xlu0 %2254 }
0x1cde   :  { %v4708_v9 = vadd.f32 %v2255_v7, %v2247_v51 }
0x1ce0   :  { %3873 = vtanh.f32 %v4708_v9 }
0x1ced   :  { %v3874_v10 = vpop.eup %3873 }
0x1cee   :  { %2260 = vrot.lane.b32.xlu1 %v3874_v10, %s3917_s19 }
0x1cf2   :  { %1990 = vrot.lane.b32.xlu1 %v1988_v14, %s3919_s21 }
0x1d60   :  { %v2261_v36 = vpop.permute.xlu1 %2260 }
0x1d61   :  { %v2263_v38 = vmul.f32 %v3872_v22, %v2261_v36  ;;  %v3366_v22 = vld [vmem:[%s4923_s1 + $0x28] sm:$0xff] }
0x1d63   :  { %2277 = vrot.lane.b32.xlu0 %v2263_v38, %s3918_s2 }
0x1d64   :  { %v1991_v40 = vpop.permute.xlu1 %1990 }
0x1d65   :  { %v1993_v42 = vmul.f32 %v3355_v39, %v1991_v40 }
0x1d67   :  { %v4715_v27 = vadd.f32 %v1993_v42, %v4612_v23  ;;  %v2161_v23 = vpop.f32.mrf.mxu0 }
0x1d68   :  { %v2271_v33 = vadd.f32 %v4671_v5, %v2161_v23 }
0x1d69   :  { %2360 = vrot.lane.b32.xlu1 %v4715_v27, %s3917_s19 }
0x1dd5   :  { %v2278_v43 = vpop.permute.xlu0 %2277 }
0x1dd6   :  { %3703 = vmatmul.mubr.msk.f32.vlgmr.msra.gmra.mxu0 %vm51_vm0, %v2278_v43  ;;  %3714 = vmatmul.mubr.msk.f32.vlgmr.msra.gmra.mxu1 %vm51_vm0, %v2278_v43 }
0x1dd7   :  { %3717 = vmatpush3.msra.mxu1 %v4619_v8  ;;  %3724 = vmatprep.mubr.msk.f32.mxu1 %vm3916_vm1, %v3915_v1 }
0x1dd8   :  { %3718 = vmatprep.subr.mxu1 %v3915_v1  ;;  %2520 = vmatpush1.msra.mxu0 %v4488_v24 }
0x1dd9   :  { %3719 = vmatpush3.msra.mxu1 %v4626_v11  ;;  %2521 = vmatprep.subr.mxu0 %v4493_v25 }
0x1dda   :  { %3720 = vmatprep.subr.mxu1 %v3915_v1  ;;  %2522 = vmatpush1.msra.mxu0 %v4499_v26 }
0x1ddb   :  { %3721 = vmatpush3.msra.mxu1 %v4635_v19  ;;  %2523 = vmatprep.subr.mxu0 %v4508_v28  ;;  %v2361_v59 = vpop.permute.xlu1 %2360 }
0x1ddc   :  { %3722 = vmatprep.subr.mxu1 %v3915_v1  ;;  %2524 = vmatpush1.msra.mxu0 %v4514_v29 }
0x1ddd   :  { %3723 = vmatpush3.msra.mxu1 %v4644_v2  ;;  %2525 = vmatprep.subr.mxu0 %v4520_v30 }
0x1dde   :  { %3725 = vmatmul.mubr.msk.f32.vlgmr.msra.gmra.mxu1 %vm51_vm0, %v2278_v43  ;;  %2526 = vmatpush1.msra.mxu0 %v4525_v15 }
0x1ddf   :  { %2559 = vmatprep.mubr.f32.mxu0 %v3915_v1  ;;  %3738 = vmatprep.subr.mxu1 %v3915_v1 }
0x1de0   :  { %3727 = vmatprep.subr.mxu0 %v3915_v1  ;;  %3739 = vmatpush3.msra.mxu1 %v4553_v62 }
0x1de1   :  { %3740 = vmatprep.subr.mxu1 %v3915_v1  ;;  %3746 = vmatprep.mubr.msk.f32.mxu1 %vm3916_vm1, %v3915_v1 }
0x1de2   :  { %3741 = vmatpush3.msra.mxu1 %v4563_v12 }
0x1de3   :  { %3742 = vmatprep.subr.mxu1 %v3915_v1 }
0x1de4   :  { %3743 = vmatpush3.msra.mxu1 %v4577_v0 }
0x1de5   :  { %3744 = vmatprep.subr.mxu1 %v3915_v1 }
0x1de6   :  { %3745 = vmatpush3.msra.mxu1 %v4591_v18 }
0x1de7   :  { %3749 = vmatprep.subr.mxu1 %v3915_v1 }
0x1e96   :  { %v2347_v34 = vpop.f32.mrf.mxu0  ;;  %v2474_v44 = vpop.f32.mrf.mxu1 }
0x1e97   :  { %v2351_v45 = vadd.f32 %v2347_v34, %v2271_v33  ;;  %v2475_v52 = vadd.f32 %v4754_v32, %v2474_v44 }
0x1e98   :  { %v3704_v46 = vpop.f32.mrf.mxu0  ;;  %v3715_v47 = vpop.f32.mrf.mxu1 }
0x1e99   :  { %3875 = vtanh.f32 %v2351_v45  ;;  %3375 = vst [vmem:[%s4922_s12 + $0x28] sm:$0xff] %v2475_v52  ;;  %v3372_v31 = vmul.f32 -1.442695, %v2351_v45 }
0x1e9b   :  { %3877 = vpow2.f32 %v3372_v31 }
0x1e9e   :  { %v2637_v50 = vpop.f32.mrf.mxu1 }
0x1ea0   :  { %v3726_v54 = vpop.f32.mrf.mxu1 }
0x1ea6   :  { %v3876_v37 = vpop.eup %3875 }
0x1ea7   :  { %2365 = vrot.lane.b32.xlu0 %v3876_v37, %s3917_s19 }
0x1ea8   :  { %v3878_v55 = vpop.eup %3877 }
0x1ea9   :  { %v2355_v57 = vadd.f32 1.0, %v3878_v55 }
0x1eab   :  { %3879 = vrcp.f32 %v2355_v57 }
0x1eb8   :  { %v3880_v53 = vpop.eup %3879 }
0x1eb9   :  { %v2363_v49 = vmul.f32 %v3880_v53, %v2361_v59 }
0x1f19   :  { %v2366_v39 = vpop.permute.xlu0 %2365 }
0x1f1a   :  { %v2368_v58 = vmul.f32 %v3880_v53, %v2366_v39 }
0x1f1c   :  { %2370 = vrot.lane.b32.xlu0 %v2368_v58, %s3917_s19 }
0x1f20   :  { %2380 = vrot.lane.b32.xlu0 %v4688_v41, %s3918_s2 }
0x1f8e   :  { %v2371_v60 = vpop.permute.xlu0 %2370 }
0x1f8f   :  { %v2373_v61 = vadd.f32 %v2371_v60, %v2363_v49 }
0x1f91   :  { %3881 = vtanh.f32 %v2373_v61  ;;  %v2390_v52 = vsub.f32 %v2373_v61, %v2361_v59 }
0x1f92   :  { %v2381_v21 = vpop.permute.xlu0 %2380 }
0x1f9e   :  { %v3882_v17 = vpop.eup %3881 }
0x1f9f   :  { %2376 = vrot.lane.b32.xlu1 %v3882_v17, %s3917_s19  ;;  %v3377_v17 = vld [vmem:[%s4923_s1 + $0x30] sm:$0xff] }
0x2011   :  { %v2377_v3 = vpop.permute.xlu1 %2376 }
0x2012   :  { %v2379_v20 = vmul.f32 %v3880_v53, %v2377_v3 }
0x2014   :  { %v2383_v6 = vsub.f32 %v2379_v20, %v2381_v21 }
0x2016   :  { %2385 = vrot.lane.b32.xlu1 %v2383_v6, %s3918_s2  ;;  %v3387_v6 = vld [vmem:[%s4915_s0 + $0x38] sm:$0xff] }
0x2088   :  { %v2386_v56 = vpop.permute.xlu1 %2385 }
0x2089   :  { %v2388_v4 = vmul.f32 %v3366_v22, %v2386_v56 }
0x208b   :  { %v4771_v51 = vadd.f32 %v2388_v4, %v4688_v41  ;;  %v3376_v41 = vld [vmem:[%s4915_s0 + $0x30] sm:$0xff] }
0x208d   :  { %3378 = vmatmul.mubr.msk.f32.vlgmr.msra.gmra.mxu0 %vm51_vm0, %v4771_v51 }
0x208e   :  { %3728 = vmatpush3.msra.mxu0 %v4558_v48  ;;  %3735 = vmatprep.mubr.msk.f32.mxu0 %vm3916_vm1, %v3915_v1 }
0x208f   :  { %3729 = vmatprep.subr.mxu0 %v3915_v1 }
0x2090   :  { %3730 = vmatpush3.msra.mxu0 %v4570_v63 }
0x2091   :  { %3731 = vmatprep.subr.mxu0 %v3915_v1 }
0x2092   :  { %3732 = vmatpush3.msra.mxu0 %v4584_v13 }
0x2093   :  { %3733 = vmatprep.subr.mxu0 %v3915_v1 }
0x2094   :  { %3734 = vmatpush3.msra.mxu0 %v4598_v16 }
0x2095   :  { %2921 = vmatprep.subr.mxu0 %v4483_v35 }
0x214d   :  { %v2561_v7 = vpop.f32.mrf.mxu0 }
0x214e   :  { %v2566_v10 = vadd.f32 %v3376_v41, %v2561_v7 }
0x2150   :  { %v2641_v14 = vadd.f32 %v2637_v50, %v2566_v10 }
0x2152   :  { %3883 = vtanh.f32 %v2641_v14  ;;  %v3380_v38 = vmul.f32 -1.442695, %v2641_v14 }
0x2154   :  { %3885 = vpow2.f32 %v3380_v38 }
0x215f   :  { %v3884_v36 = vpop.eup %3883 }
0x2160   :  { %2651 = vrot.lane.b32.xlu0 %v3884_v36, %s3917_s19 }
0x2161   :  { %v3886_v40 = vpop.eup %3885 }
0x2162   :  { %v2645_v42 = vadd.f32 1.0, %v3886_v40 }
0x2164   :  { %3887 = vrcp.f32 %v2645_v42 }
0x2171   :  { %v3888_v43 = vpop.eup %3887 }
0x2172   :  { %v2649_v35 = vmul.f32 %v3888_v43, %v4708_v9 }
0x21d2   :  { %v2652_v23 = vpop.permute.xlu0 %2651 }
0x21d3   :  { %v2654_v33 = vmul.f32 %v3888_v43, %v2652_v23 }
0x21d5   :  { %2656 = vrot.lane.b32.xlu1 %v2654_v33, %s3917_s19 }
0x2247   :  { %v2657_v34 = vpop.permute.xlu1 %2656 }
0x2248   :  { %v4791_v44 = vadd.f32 %v2657_v34, %v2649_v35 }
0x224a   :  { %3889 = vtanh.f32 %v4791_v44 }
0x2257   :  { %v3890_v45 = vpop.eup %3889 }
0x2258   :  { %2662 = vrot.lane.b32.xlu0 %v3890_v45, %s3917_s19 }
0x225c   :  { %2392 = vrot.lane.b32.xlu0 %v2390_v52, %s3919_s21 }
0x22ca   :  { %v2663_v46 = vpop.permute.xlu0 %2662 }
0x22cb   :  { %v2665_v47 = vmul.f32 %v3888_v43, %v2663_v46 }
0x22cd   :  { %2679 = vrot.lane.b32.xlu1 %v2665_v47, %s3918_s2 }
0x22ce   :  { %v2393_v50 = vpop.permute.xlu0 %2392 }
0x22cf   :  { %v2395_v54 = vmul.f32 %v3366_v22, %v2393_v50 }
0x22d1   :  { %v4798_v37 = vadd.f32 %v2395_v54, %v4715_v27 }
0x22d3   :  { %2762 = vrot.lane.b32.xlu0 %v4798_v37, %s3917_s19 }
0x233f   :  { %v2680_v9 = vpop.permute.xlu1 %2679 }
0x2340   :  { %3736 = vmatmul.mubr.msk.f32.vlgmr.msra.gmra.mxu0 %vm51_vm0, %v2680_v9  ;;  %3747 = vmatmul.mubr.msk.f32.vlgmr.msra.gmra.mxu1 %vm51_vm0, %v2680_v9 }
0x2341   :  { %3750 = vmatpush3.msra.mxu1 %v4619_v8  ;;  %3757 = vmatprep.mubr.msk.f32.mxu1 %vm3916_vm1, %v3915_v1 }
0x2342   :  { %3751 = vmatprep.subr.mxu1 %v3915_v1  ;;  %2922 = vmatpush1.msra.mxu0 %v4488_v24  ;;  %v2563_v24 = vpop.f32.mrf.mxu0 }
0x2343   :  { %3752 = vmatpush3.msra.mxu1 %v4626_v11  ;;  %2923 = vmatprep.subr.mxu0 %v4493_v25  ;;  %v2673_v25 = vadd.f32 %v4671_v5, %v2563_v24 }
0x2344   :  { %3753 = vmatprep.subr.mxu1 %v3915_v1  ;;  %2924 = vmatpush1.msra.mxu0 %v4499_v26 }
0x2345   :  { %3754 = vmatpush3.msra.mxu1 %v4635_v19  ;;  %2925 = vmatprep.subr.mxu0 %v4508_v28  ;;  %v2763_v55 = vpop.permute.xlu0 %2762 }
0x2346   :  { %3755 = vmatprep.subr.mxu1 %v3915_v1  ;;  %2926 = vmatpush1.msra.mxu0 %v4514_v29 }
0x2347   :  { %3756 = vmatpush3.msra.mxu1 %v4644_v2  ;;  %2927 = vmatprep.subr.mxu0 %v4520_v30 }
0x2348   :  { %3758 = vmatmul.mubr.msk.f32.vlgmr.msra.gmra.mxu1 %vm51_vm0, %v2680_v9  ;;  %2928 = vmatpush1.msra.mxu0 %v4525_v15 }
0x2349   :  { %2961 = vmatprep.mubr.f32.mxu0 %v3915_v1  ;;  %3760 = vmatprep.subr.mxu0 %v3915_v1 }
0x234a   :  { %3771 = vmatprep.subr.mxu1 %v3915_v1  ;;  %3779 = vmatprep.mubr.msk.f32.mxu1 %vm3916_vm1, %v3915_v1 }
0x234b   :  { %3772 = vmatpush3.msra.mxu1 %v4553_v62 }
0x234c   :  { %3773 = vmatprep.subr.mxu1 %v3915_v1 }
0x234d   :  { %3774 = vmatpush3.msra.mxu1 %v4563_v12 }
0x234e   :  { %3775 = vmatprep.subr.mxu1 %v3915_v1 }
0x234f   :  { %3776 = vmatpush3.msra.mxu1 %v4577_v0 }
0x2350   :  { %3777 = vmatprep.subr.mxu1 %v3915_v1 }
0x2351   :  { %3778 = vmatpush3.msra.mxu1 %v4591_v18 }
0x2400   :  { %v2749_v26 = vpop.f32.mrf.mxu0  ;;  %v2876_v28 = vpop.f32.mrf.mxu1 }
0x2401   :  { %v2753_v29 = vadd.f32 %v2749_v26, %v2673_v25  ;;  %v2877_v30 = vadd.f32 %v4754_v32, %v2876_v28 }
0x2402   :  { %v3737_v15 = vpop.f32.mrf.mxu0  ;;  %v3748_v62 = vpop.f32.mrf.mxu1 }
0x2403   :  { %3891 = vtanh.f32 %v2753_v29  ;;  %3386 = vst [vmem:[%s4922_s12 + $0x30] sm:$0xff] %v2877_v30  ;;  %v3383_v18 = vmul.f32 -1.442695, %v2753_v29 }
0x2405   :  { %3893 = vpow2.f32 %v3383_v18 }
0x2408   :  { %v3039_v12 = vpop.f32.mrf.mxu1 }
0x240a   :  { %v3759_v0 = vpop.f32.mrf.mxu1 }
0x2410   :  { %v3892_v8 = vpop.eup %3891 }
0x2411   :  { %2767 = vrot.lane.b32.xlu1 %v3892_v8, %s3917_s19  ;;  %v3388_v8 = vld [vmem:[%s4923_s1 + $0x38] sm:$0xff] }
0x2412   :  { %v3894_v11 = vpop.eup %3893 }
0x2413   :  { %v2757_v19 = vadd.f32 1.0, %v3894_v11 }
0x2415   :  { %3895 = vrcp.f32 %v2757_v19 }
0x2422   :  { %v3896_v2 = vpop.eup %3895 }
0x2423   :  { %v2765_v57 = vmul.f32 %v3896_v2, %v2763_v55 }
0x2483   :  { %v2768_v27 = vpop.permute.xlu1 %2767 }
0x2484   :  { %v2770_v31 = vmul.f32 %v3896_v2, %v2768_v27 }
0x2486   :  { %2772 = vrot.lane.b32.xlu1 %v2770_v31, %s3917_s19 }
0x248a   :  { %2782 = vrot.lane.b32.xlu1 %v4771_v51, %s3918_s2 }
0x24f8   :  { %v2773_v53 = vpop.permute.xlu1 %2772 }
0x24f9   :  { %v2775_v39 = vadd.f32 %v2773_v53, %v2765_v57 }
0x24fb   :  { %3897 = vtanh.f32 %v2775_v39  ;;  %v2792_v38 = vsub.f32 %v2775_v39, %v2763_v55 }
0x24fc   :  { %v2783_v60 = vpop.permute.xlu1 %2782 }
0x2508   :  { %v3898_v58 = vpop.eup %3897 }
0x2509   :  { %2778 = vrot.lane.b32.xlu0 %v3898_v58, %s3917_s19 }
0x257b   :  { %v2779_v59 = vpop.permute.xlu0 %2778 }
0x257c   :  { %v2781_v49 = vmul.f32 %v3896_v2, %v2779_v59 }
0x257e   :  { %v2785_v61 = vsub.f32 %v2781_v49, %v2783_v60 }
0x2580   :  { %2787 = vrot.lane.b32.xlu0 %v2785_v61, %s3918_s2 }
0x25f2   :  { %v2788_v3 = vpop.permute.xlu0 %2787 }
0x25f3   :  { %v2790_v20 = vmul.f32 %v3377_v17, %v2788_v3 }
0x25f5   :  { %v4848_v21 = vadd.f32 %v2790_v20, %v4771_v51 }
0x25f7   :  { %3389 = vmatmul.mubr.msk.f32.vlgmr.msra.gmra.mxu0 %vm51_vm0, %v4848_v21 }
0x25f8   :  { %3761 = vmatpush3.msra.mxu0 %v4558_v48  ;;  %3768 = vmatprep.mubr.msk.f32.mxu0 %vm3916_vm1, %v3915_v1 }
0x25f9   :  { %3762 = vmatprep.subr.mxu0 %v3915_v1 }
0x25fa   :  { %3763 = vmatpush3.msra.mxu0 %v4570_v63 }
0x25fb   :  { %3764 = vmatprep.subr.mxu0 %v3915_v1 }
0x25fc   :  { %3765 = vmatpush3.msra.mxu0 %v4584_v13 }
0x25fd   :  { %3766 = vmatprep.subr.mxu0 %v3915_v1 }
0x25fe   :  { %3767 = vmatpush3.msra.mxu0 %v4598_v16 }
0x26b7   :  { %v2963_v48 = vpop.f32.mrf.mxu0 }
0x26b8   :  { %v2968_v22 = vadd.f32 %v3387_v6, %v2963_v48 }
0x26b9   :  { %v2965_v34 = vpop.f32.mrf.mxu0 }
0x26ba   :  { %v3043_v56 = vadd.f32 %v3039_v12, %v2968_v22 }
0x26bc   :  { %3899 = vtanh.f32 %v3043_v56  ;;  %v3391_v63 = vmul.f32 -1.442695, %v3043_v56 }
0x26be   :  { %3901 = vpow2.f32 %v3391_v63 }
0x26c9   :  { %v3900_v4 = vpop.eup %3899 }
0x26ca   :  { %3053 = vrot.lane.b32.xlu1 %v3900_v4, %s3917_s19 }
0x26cb   :  { %v3902_v51 = vpop.eup %3901 }
0x26cc   :  { %v3047_v41 = vadd.f32 1.0, %v3902_v51 }
0x26ce   :  { %3903 = vrcp.f32 %v3047_v41 }
0x26db   :  { %v3904_v13 = vpop.eup %3903 }
0x26dc   :  { %v3051_v16 = vmul.f32 %v3904_v13, %v4791_v44  ;;  %v3075_v44 = vadd.f32 %v4671_v5, %v2965_v34 }
0x273c   :  { %v3054_v1 = vpop.permute.xlu1 %3053 }
0x273d   :  { %v3056_v7 = vmul.f32 %v3904_v13, %v3054_v1 }
0x273f   :  { %3058 = vrot.lane.b32.xlu0 %v3056_v7, %s3917_s19 }
0x27b1   :  { %v3059_v10 = vpop.permute.xlu0 %3058 }
0x27b2   :  { %v3061_v14 = vadd.f32 %v3059_v10, %v3051_v16 }
0x27b4   :  { %3905 = vtanh.f32 %v3061_v14 }
0x27c1   :  { %v3906_v36 = vpop.eup %3905 }
0x27c2   :  { %3064 = vrot.lane.b32.xlu1 %v3906_v36, %s3917_s19 }
0x27c6   :  { %2794 = vrot.lane.b32.xlu1 %v2792_v38, %s3919_s21 }
0x2834   :  { %v3065_v40 = vpop.permute.xlu1 %3064 }
0x2835   :  { %v3067_v42 = vmul.f32 %v3904_v13, %v3065_v40 }
0x2837   :  { %3081 = vrot.lane.b32.xlu0 %v3067_v42, %s3918_s2 }
0x2838   :  { %v2795_v43 = vpop.permute.xlu1 %2794 }
0x2839   :  { %v2797_v23 = vmul.f32 %v3377_v17, %v2795_v43 }
0x283b   :  { %v2798_v33 = vadd.f32 %v2797_v23, %v4798_v37 }
0x283d   :  { %3164 = vrot.lane.b32.xlu1 %v2798_v33, %s3917_s19 }
0x28a9   :  { %v3082_v35 = vpop.permute.xlu0 %3081 }
0x28aa   :  { %3285 = vst.msk [vmem:[%s4912_s13] sm:$0xff] %vm51_vm0, %v3082_v35  ;;  %3769 = vmatmul.mubr.msk.f32.vlgmr.msra.gmra.mxu0 %vm51_vm0, %v3082_v35  ;;  %3780 = vmatmul.mubr.msk.f32.vlgmr.msra.gmra.mxu1 %vm51_vm0, %v3082_v35 }
0x296a   :  { %v3151_v45 = vpop.f32.mrf.mxu0  ;;  %v3278_v52 = vpop.f32.mrf.mxu1 }
0x296b   :  { %v3155_v46 = vadd.f32 %v3151_v45, %v3075_v44  ;;  %v3279_v47 = vadd.f32 %v4754_v32, %v3278_v52  ;;  %v3165_v32 = vpop.permute.xlu1 %3164 }
0x296c   :  { %v3770_v50 = vpop.f32.mrf.mxu0  ;;  %v3781_v54 = vpop.f32.mrf.mxu1 }
0x296d   :  { %3907 = vtanh.f32 %v3155_v46  ;;  %3397 = vst [vmem:[%s4922_s12 + $0x38] sm:$0xff] %v3279_v47  ;;  %v3394_v9 = vmul.f32 -1.442695, %v3155_v46 }
0x296f   :  { %3909 = vpow2.f32 %v3394_v9 }
0x297a   :  { %v3908_v37 = vpop.eup %3907 }
0x297b   :  { %3169 = vrot.lane.b32.xlu0 %v3908_v37, %s3917_s19 }
0x297c   :  { %v3910_v24 = vpop.eup %3909 }
0x297d   :  { %v3159_v25 = vadd.f32 1.0, %v3910_v24 }
0x297f   :  { %3911 = vrcp.f32 %v3159_v25 }
0x298c   :  { %v3912_v5 = vpop.eup %3911 }
0x298d   :  { %v3167_v29 = vmul.f32 %v3912_v5, %v3165_v32 }
0x29ed   :  { %v3170_v26 = vpop.permute.xlu0 %3169 }
0x29ee   :  { %v3172_v28 = vmul.f32 %v3912_v5, %v3170_v26 }
0x29f0   :  { %3174 = vrot.lane.b32.xlu0 %v3172_v28, %s3917_s19 }
0x29f4   :  { %3184 = vrot.lane.b32.xlu0 %v4848_v21, %s3918_s2 }
0x2a62   :  { %v3175_v30 = vpop.permute.xlu0 %3174 }
0x2a63   :  { %v3177_v15 = vadd.f32 %v3175_v30, %v3167_v29 }
0x2a65   :  { %3913 = vtanh.f32 %v3177_v15  ;;  %v3194_v62 = vsub.f32 %v3177_v15, %v3165_v32 }
0x2a66   :  { %v3185_v0 = vpop.permute.xlu0 %3184 }
0x2a67   :  { %3196 = vrot.lane.b32.xlu0 %v3194_v62, %s3919_s21 }
0x2a72   :  { %v3914_v12 = vpop.eup %3913 }
0x2a73   :  { %3180 = vrot.lane.b32.xlu1 %v3914_v12, %s3917_s19 }
0x2ad9   :  { %v3197_v18 = vpop.permute.xlu0 %3196 }
0x2ada   :  { %v3199_v11 = vmul.f32 %v3388_v8, %v3197_v18 }
0x2adc   :  { %v3200_v19 = vadd.f32 %v3199_v11, %v2798_v33 }
0x2ade   :  { %3292 = vst.msk [vmem:[%s4919_s16] sm:$0xff] %vm51_vm0, %v3200_v19 }
0x2ae5   :  { %v3181_v2 = vpop.permute.xlu1 %3180 }
0x2ae6   :  { %v3183_v27 = vmul.f32 %v3912_v5, %v3181_v2 }
0x2ae8   :  { %v3187_v31 = vsub.f32 %v3183_v27, %v3185_v0 }
0x2aea   :  { %3189 = vrot.lane.b32.xlu1 %v3187_v31, %s3918_s2 }
0x2aee   :  { %3287 = vrot.lane.b32.xlu1 %v3061_v14, %s3919_s21 }
0x2b5c   :  { %v3190_v55 = vpop.permute.xlu1 %3189 }
0x2b5d   :  { %v3192_v57 = vmul.f32 %v3388_v8, %v3190_v55 }
0x2b5f   :  { %v3193_v53 = vadd.f32 %v3192_v57, %v4848_v21 }
0x2b60   :  { %v3288_v39 = vpop.permute.xlu1 %3287 }
0x2b61   :  { %3291 = vst.msk [vmem:[%s4911_s15] sm:$0xff] %vm51_vm0, %v3193_v53  ;;  %3290 = vst.msk [vmem:[%s4914_s14] sm:$0xff] %vm51_vm0, %v3288_v39 }

</bundles_post_ra>
